<compile_context>
chip_gen: v5e
topology: v5e:2x2
jax: 0.10.0
libtpu: 0.0.40
codegen_flags: <defaults>
</compile_context>

<pallas_src>
import functools

import jax
import jax.numpy as jnp
from jax.experimental import pallas as pl
from jax.experimental.pallas import tpu as pltpu


IMG_MEAN = jnp.array([0.485, 0.456, 0.406], jnp.float32)
IMG_STD = jnp.array([0.229, 0.224, 0.225], jnp.float32)


# ------------------------------------------------------------------
# Kernel A: fused backbone conv + RPN conv + objectness (per image)
# ------------------------------------------------------------------
def _backbone_rpn_kernel(xrow_ref, yrow_ref, img_ref, wb_ref, bb_ref,
                         wr_ref, br_ref, wo_ref, bo_ref,
                         feat_ref, score_ref, *, H, W):
    """Channels on sublanes, flattened H*W on lanes.  Each 3x3 conv is 9
    lane-rolled [Cout,Cin]x[Cin,HW] MXU matmuls accumulated in f32; spatial
    zero padding is emulated with validity masks built from coordinate rows."""
    HW = H * W
    xpos = xrow_ref[...]                      # [1, HW] f32 (x of each position)
    ypos = yrow_ref[...]                      # [1, HW] f32 (y of each position)

    valid = []
    for dy in range(3):
        for dx in range(3):
            valid.append((xpos + (dx - 1) >= 0.0) & (xpos + (dx - 1) <= W - 1.0)
                         & (ypos + (dy - 1) >= 0.0) & (ypos + (dy - 1) <= H - 1.0))

    def conv3x3(inp, w9_ref, bias_ref):
        # inp: [Cin, HW] f32 ; w9_ref: [9, Cout, Cin] bf16 ; bias: [Cout, 1] f32
        acc = None
        for dy in range(3):
            for dx in range(3):
                k = dy * 3 + dx
                shift = (dy - 1) * W + (dx - 1)        # flat offset of this tap
                if shift == 0:
                    src = inp
                else:
                    src = pltpu.roll(inp, (-shift) % HW, axis=1)
                    src = jnp.where(valid[k], src, 0.0)
                contrib = jnp.dot(w9_ref[k], src.astype(jnp.bfloat16),
                                  preferred_element_type=jnp.float32)
                acc = contrib if acc is None else acc + contrib
        return acc + bias_ref[...]

    img = img_ref[0]                                              # [Cin, HW] f32
    feat = jnp.maximum(conv3x3(img, wb_ref, bb_ref), 0.0)         # [C, HW] f32
    feat_ref[0] = feat.astype(jnp.bfloat16)                       # bf16 to HBM

    t = jnp.maximum(conv3x3(feat, wr_ref, br_ref), 0.0)           # [C, HW] f32
    obj = jnp.dot(wo_ref[...], t.astype(jnp.bfloat16),
                  preferred_element_type=jnp.float32) + bo_ref[...]   # [A, HW]
    score_ref[0] = jnp.max(obj, axis=0, keepdims=True)            # [1, HW]


def pallas_backbone_rpn(ximg, xrow, yrow, p, H, W):
    """ximg: [B, Cin, HW] f32 (mean-subtracted) -> (feat [B,C,HW] bf16,
    score [B,1,HW] f32)."""
    B, Cin, HW = ximg.shape
    C = p["wb9"].shape[1]
    A = p["wobj"].shape[0]
    two = lambda b: (0, 0)
    three0 = lambda b: (0, 0, 0)
    threeb = lambda b: (b, 0, 0)
    return pl.pallas_call(
        functools.partial(_backbone_rpn_kernel, H=H, W=W),
        out_shape=(jax.ShapeDtypeStruct((B, C, HW), jnp.bfloat16),
                   jax.ShapeDtypeStruct((B, 1, HW), jnp.float32)),
        grid=(B,),
        in_specs=[
            pl.BlockSpec((1, HW), two),            # xrow
            pl.BlockSpec((1, HW), two),            # yrow
            pl.BlockSpec((1, Cin, HW), threeb),    # image (per b)
            pl.BlockSpec((9, C, Cin), three0),     # backbone conv weights
            pl.BlockSpec((C, 1), two),             # backbone bias
            pl.BlockSpec((9, C, C), three0),       # rpn conv weights
            pl.BlockSpec((C, 1), two),             # rpn conv bias
            pl.BlockSpec((A, C), two),             # objectness weights (T)
            pl.BlockSpec((A, 1), two),             # objectness bias
        ],
        out_specs=(pl.BlockSpec((1, C, HW), threeb),
                   pl.BlockSpec((1, 1, HW), threeb)),
        compiler_params=pltpu.CompilerParams(
            dimension_semantics=("parallel",)),
    )(xrow, yrow, ximg, p["wb9"], p["bb"], p["wr9"], p["br"],
      p["wobj"], p["bobj"])


# ------------------------------------------------------------------
# Kernel B: fused ROI pool + box/mask heads + cls/reg + affinity + s2new
# ------------------------------------------------------------------
def _roi_head_kernel(xrow_ref, yrow_ref, feat_ref, prop_ref,
                     wbox_ref, bbox_ref, wmask_ref, bmask_ref,
                     wcr_ref, bcr_ref, waff_ref, baff_ref, ws2_ref, bs2_ref,
                     clsreg_ref, imglog_ref, *, C):
    xrow = xrow_ref[...]                      # [1, HW] f32
    yrow = yrow_ref[...]                      # [1, HW] f32
    prop = prop_ref[0]                        # [P, 4] f32  (x1, y1, x2, y2)
    x1 = prop[:, 0:1]; y1 = prop[:, 1:2]; x2 = prop[:, 2:3]; y2 = prop[:, 3:4]

    # Box mask built in-kernel (no [B,P,HW] tensor ever hits HBM).
    inbox = ((xrow >= x1) & (xrow <= x2) & (yrow >= y1) & (yrow <= y2))
    boxmask = inbox.astype(jnp.float32).astype(jnp.bfloat16)      # [P, HW]

    # TODO(synk): ROIAlign bilinear sampling replaced by box-masked average pool.
    feat = feat_ref[0]                                            # [C, HW] bf16
    pooled = jax.lax.dot_general(boxmask, feat, (((1,), (1,)), ((), ())),
                                 preferred_element_type=jnp.float32)   # [P, C]
    count = (x2 - x1 + 1.0) * (y2 - y1 + 1.0)                     # [P, 1]
    pooled = pooled / jnp.maximum(count, 1.0)
    pooled_b16 = pooled.astype(jnp.bfloat16)

    # box_fc and mask heads (share the pooled input; all VMEM-resident).
    hbox = jnp.maximum(jnp.dot(pooled_b16, wbox_ref[...],
                               preferred_element_type=jnp.float32)
                       + bbox_ref[...], 0.0)                      # [P, d_fc]
    # NOTE: ReLU kept on the mask branch (same decomposition as previous version).
    mfeat = jnp.maximum(jnp.dot(pooled_b16, wmask_ref[...],
                                preferred_element_type=jnp.float32)
                        + bmask_ref[...], 0.0)                    # [P, C]
    clsreg_ref[0] = (jnp.dot(hbox.astype(jnp.bfloat16), wcr_ref[...],
                             preferred_element_type=jnp.float32)
                     + bcr_ref[...])                              # [P, n_cls+4n]

    # Affinity: softmax(F F^T / sqrt(C)) @ F -> mean over proposals -> s2new.
    mb = mfeat.astype(jnp.bfloat16)
    s = jax.lax.dot_general(mb, mb, (((1,), (1,)), ((), ())),
                            preferred_element_type=jnp.float32)
    s = s * (1.0 / (float(C) ** 0.5))                             # [P, P]
    m = jnp.max(s, axis=-1, keepdims=True)
    e = jnp.exp(s - m)
    a = e * pl.reciprocal(jnp.sum(e, axis=-1, keepdims=True), approx=True)
    att = jnp.dot(a.astype(jnp.bfloat16), mb,
                  preferred_element_type=jnp.float32)             # [P, C]
    num_p = att.shape[0]
    v = jnp.sum(att, axis=0, keepdims=True) * (1.0 / float(num_p))    # [1, C]
    aff = jnp.dot(v.astype(jnp.bfloat16), waff_ref[...],
                  preferred_element_type=jnp.float32) + baff_ref[...]  # [1, d_aff]
    imglog_ref[0] = (jnp.dot(aff.astype(jnp.bfloat16), ws2_ref[...],
                             preferred_element_type=jnp.float32)
                     + bs2_ref[...])                              # [1, n_img]


def pallas_roi_heads(feat, proposals, xrow, yrow, p):
    """feat: [B, C, HW] bf16, proposals: [B, P, 4] f32 ->
    (clsreg [B, P, n_det + 4*n_det] f32, img_logits [B, 1, n_img] f32)."""
    B, C, HW = feat.shape
    P = proposals.shape[1]
    d_fc = p["wbox"].shape[1]
    n_cr = p["wcr"].shape[1]
    d_aff = p["waff"].shape[1]
    n_img = p["ws2"].shape[1]
    two = lambda b: (0, 0)
    threeb = lambda b: (b, 0, 0)
    return pl.pallas_call(
        functools.partial(_roi_head_kernel, C=C),
        out_shape=(jax.ShapeDtypeStruct((B, P, n_cr), jnp.float32),
                   jax.ShapeDtypeStruct((B, 1, n_img), jnp.float32)),
        grid=(B,),
        in_specs=[
            pl.BlockSpec((1, HW), two),            # xrow
            pl.BlockSpec((1, HW), two),            # yrow
            pl.BlockSpec((1, C, HW), threeb),      # feat (per b)
            pl.BlockSpec((1, P, 4), threeb),       # proposals (per b)
            pl.BlockSpec((C, d_fc), two),          # box_fc
            pl.BlockSpec((1, d_fc), two),
            pl.BlockSpec((C, C), two),             # mask head
            pl.BlockSpec((1, C), two),
            pl.BlockSpec((d_fc, n_cr), two),       # cls || reg
            pl.BlockSpec((1, n_cr), two),
            pl.BlockSpec((C, d_aff), two),         # affinity projection
            pl.BlockSpec((1, d_aff), two),
            pl.BlockSpec((d_aff, n_img), two),     # s2new classifier
            pl.BlockSpec((1, n_img), two),
        ],
        out_specs=(pl.BlockSpec((1, P, n_cr), threeb),
                   pl.BlockSpec((1, 1, n_img), threeb)),
        compiler_params=pltpu.CompilerParams(
            dimension_semantics=("parallel",)),
    )(xrow, yrow, feat, proposals.astype(jnp.float32),
      p["wbox"], p["bbox"], p["wmask"], p["bmask"],
      p["wcr"], p["bcr"], p["waff"], p["baff"], p["ws2"], p["bs2"])


# ------------------------------------------------------------------
# Parameters
# ------------------------------------------------------------------
def init_params(key, cin=3, c=32, a=3, n_det=5, d_aff=32, n_img=3):
    ks = jax.random.split(key, 10)

    def w(k, shape, scale=0.05):
        return scale * jax.random.normal(k, shape, jnp.float32)

    return dict(
        backbone_w=w(ks[0], (9 * cin, c)), backbone_b=jnp.zeros((c,), jnp.float32),
        rpn_conv_w=w(ks[1], (9 * c, c)), rpn_conv_b=jnp.zeros((c,), jnp.float32),
        rpn_obj_w=w(ks[2], (c, a)), rpn_obj_b=jnp.zeros((a,), jnp.float32),
        rpn_box_w=w(ks[3], (c, 4 * a)), rpn_box_b=jnp.zeros((4 * a,), jnp.float32),
        box_fc_w=w(ks[4], (c, 64)), box_fc_b=jnp.zeros((64,), jnp.float32),
        cls_w=w(ks[5], (64, n_det)), cls_b=jnp.zeros((n_det,), jnp.float32),
        reg_w=w(ks[6], (64, 4 * n_det)), reg_b=jnp.zeros((4 * n_det,), jnp.float32),
        mask_w=w(ks[7], (c, c)), mask_b=jnp.zeros((c,), jnp.float32),
        aff_w=w(ks[8], (c, d_aff)), aff_b=jnp.zeros((d_aff,), jnp.float32),
        s2new_w=w(ks[9], (d_aff, n_img)), s2new_b=jnp.zeros((n_img,), jnp.float32),
    )


def prepare_inference_params(params):
    """One-time repack into the layouts the fused kernels consume
    (channels-first conv weights, bf16 MXU operands, f32 biases)."""
    cin = params["backbone_w"].shape[0] // 9
    c = params["backbone_w"].shape[1]
    a = params["rpn_obj_w"].shape[1]
    assert cin == 3, "image normalization constants assume RGB input"
    f32, bf16 = jnp.float32, jnp.bfloat16
    # Fold per-channel 1/std of GeneralizedRCNNTransform into the backbone conv
    # weights (mean subtraction stays on the raw image so zero-padding at the
    # borders keeps exactly the normalized-domain-zero semantics).
    inv_std_rows = jnp.tile(1.0 / IMG_STD, 9)[:, None]              # [9*cin, 1]
    wb = (params["backbone_w"].astype(f32) * inv_std_rows).reshape(9, cin, c)
    wr = params["rpn_conv_w"].astype(f32).reshape(9, c, c)
    # TODO(synk): rpn_box_w deltas are unused (no anchor decoding / NMS) — dropped.
    return dict(
        wb9=jnp.transpose(wb, (0, 2, 1)).astype(bf16),              # [9, C, Cin]
        bb=params["backbone_b"].reshape(c, 1).astype(f32),
        wr9=jnp.transpose(wr, (0, 2, 1)).astype(bf16),              # [9, C, C]
        br=params["rpn_conv_b"].reshape(c, 1).astype(f32),
        wobj=params["rpn_obj_w"].T.astype(bf16),                    # [A, C]
        bobj=params["rpn_obj_b"].reshape(a, 1).astype(f32),
        wbox=params["box_fc_w"].astype(bf16),                       # [C, d_fc]
        bbox=params["box_fc_b"].reshape(1, -1).astype(f32),
        wmask=params["mask_w"].astype(bf16),                        # [C, C]
        bmask=params["mask_b"].reshape(1, -1).astype(f32),
        wcr=jnp.concatenate([params["cls_w"], params["reg_w"]], axis=1).astype(bf16),
        bcr=jnp.concatenate([params["cls_b"], params["reg_b"]],
                            axis=0).reshape(1, -1).astype(f32),
        waff=params["aff_w"].astype(bf16),                          # [C, d_aff]
        baff=params["aff_b"].reshape(1, -1).astype(f32),
        ws2=params["s2new_w"].astype(bf16),                         # [d_aff, n_img]
        bs2=params["s2new_b"].reshape(1, -1).astype(f32),
    )


# ------------------------------------------------------------------
# Forward (inference path)
# ------------------------------------------------------------------
def generalized_rcnn_affinity_forward(p, images_nchw, *, n_det=5,
                                      num_proposals=8, anchor_size=6.0):
    """Inference-mode forward (self.training == False).
    Returns (losses, scores_covid_img, detections) like the PyTorch module."""
    # TODO(synk): training-mode losses and GeneralizedRCNNTransform resize /
    # variable-size batching are not implemented (fixed-size inference only).
    B, Cin, H, W = images_nchw.shape
    HW = H * W

    # Normalization: 1/std is folded into the backbone weights, mean here.
    x = images_nchw.astype(jnp.float32) - IMG_MEAN.reshape(1, Cin, 1, 1)
    ximg = x.reshape(B, Cin, HW)                     # channels-first, lane-dense

    pos = jnp.arange(HW, dtype=jnp.int32)
    xrow = (pos % W).astype(jnp.float32).reshape(1, HW)
    yrow = (pos // W).astype(jnp.float32).reshape(1, HW)

    # Kernel A: backbone + RPN conv + objectness + score (fused, per image).
    feat, score = pallas_backbone_rpn(ximg, xrow, yrow, p, H, W)

    # Proposals: fixed-size boxes centered on top-k objectness peaks.
    # TODO(synk): anchor-delta decoding and NMS have no clean Pallas equivalent.
    _, idx = jax.lax.top_k(score.reshape(B, HW), num_proposals)
    cy = (idx // W).astype(jnp.float32)
    cx = (idx % W).astype(jnp.float32)
    half = anchor_size / 2.0
    x1 = jnp.clip(cx - half, 0.0, W - 1.0)
    y1 = jnp.clip(cy - half, 0.0, H - 1.0)
    x2 = jnp.clip(cx + half, 0.0, W - 1.0)
    y2 = jnp.clip(cy + half, 0.0, H - 1.0)
    proposals = jnp.stack([x1, y1, x2, y2], axis=-1)                 # [B, P, 4]

    # Kernel B: ROI pool + box/mask + cls/reg + affinity + s2new (fused).
    clsreg, imglog = pallas_roi_heads(feat, proposals, xrow, yrow, p)

    cr = clsreg.reshape(B * num_proposals, -1)
    cls_logits = cr[:, :n_det]
    box_reg = cr[:, n_det:n_det + 4 * n_det]
    probs = jax.nn.softmax(cls_logits, axis=-1)
    scores = jnp.max(probs, axis=-1)
    labels = jnp.argmax(probs, axis=-1)

    # Image-level classifier uses mask_features[0] (first image), like PyTorch.
    img_class_logits = imglog[0]                                     # [1, n_img]
    scores_covid_img = [dict(final_scores=img_class_logits)]

    detections = []
    for i in range(B):
        sl = slice(i * num_proposals, (i + 1) * num_proposals)
        detections.append(dict(boxes=proposals[i], labels=labels[sl],
                               scores=scores[sl], box_regression=box_reg[sl]))

    # transform.postprocess is the identity here (no resize was applied).
    losses = {}
    return losses, scores_covid_img, detections


if __name__ == "__main__":
    key = jax.random.PRNGKey(0)
    pkey, ikey = jax.random.split(key)
    raw_params = init_params(pkey)
    params = prepare_inference_params(raw_params)       # one-time repack / bf16
    images = jax.random.uniform(ikey, (2, 3, 16, 16), jnp.float32)  # NCHW

    fwd = jax.jit(generalized_rcnn_affinity_forward)
    losses, scores_covid_img, detections = fwd(params, images)
    jax.block_until_ready((losses, scores_covid_img, detections))

    assert scores_covid_img[0]["final_scores"].shape == (1, 3)
    assert detections[0]["boxes"].shape == (8, 4)
    print("KERNEL_OK")
</pallas_src>

<mosaic_0001>
module attributes {stable_mosaic.version = 11 : i64} {
  func.func @_backbone_rpn_kernel(%arg0: i32, %arg1: memref<1x256xf32, #tpu.memory_space<vmem>>, %arg2: memref<1x256xf32, #tpu.memory_space<vmem>>, %arg3: memref<1x3x256xf32, #tpu.memory_space<vmem>>, %arg4: memref<9x32x3xbf16, #tpu.memory_space<vmem>>, %arg5: memref<32x1xf32, #tpu.memory_space<vmem>>, %arg6: memref<9x32x32xbf16, #tpu.memory_space<vmem>>, %arg7: memref<32x1xf32, #tpu.memory_space<vmem>>, %arg8: memref<3x32xbf16, #tpu.memory_space<vmem>>, %arg9: memref<3x1xf32, #tpu.memory_space<vmem>>, %arg10: memref<1x32x256xbf16, #tpu.memory_space<vmem>>, %arg11: memref<1x1x256xf32, #tpu.memory_space<vmem>>) attributes {dimension_semantics = [#tpu.dimension_semantics<parallel>], iteration_bounds = array<i64: 2>, scalar_prefetch = 0 : i64, scratch_operands = 0 : i64, tpu.core_type = #tpu.core_type<tc>, window_params = [{pipeline_mode = #tpu.pipeline_mode<synchronous>, transform_indices = @transform_0, window_bounds = array<i64: 1, 256>}, {pipeline_mode = #tpu.pipeline_mode<synchronous>, transform_indices = @transform_1, window_bounds = array<i64: 1, 256>}, {transform_indices = @transform_2, window_bounds = array<i64: 1, 3, 256>}, {pipeline_mode = #tpu.pipeline_mode<synchronous>, transform_indices = @transform_3, window_bounds = array<i64: 9, 32, 3>}, {pipeline_mode = #tpu.pipeline_mode<synchronous>, transform_indices = @transform_4, window_bounds = array<i64: 32, 1>}, {pipeline_mode = #tpu.pipeline_mode<synchronous>, transform_indices = @transform_5, window_bounds = array<i64: 9, 32, 32>}, {pipeline_mode = #tpu.pipeline_mode<synchronous>, transform_indices = @transform_6, window_bounds = array<i64: 32, 1>}, {pipeline_mode = #tpu.pipeline_mode<synchronous>, transform_indices = @transform_7, window_bounds = array<i64: 3, 32>}, {pipeline_mode = #tpu.pipeline_mode<synchronous>, transform_indices = @transform_8, window_bounds = array<i64: 3, 1>}, {transform_indices = @transform_9, window_bounds = array<i64: 1, 32, 256>}, {transform_indices = @transform_10, window_bounds = array<i64: 1, 1, 256>}]} {
    %c0 = arith.constant 0 : index
    %c0_0 = arith.constant 0 : index
    %0 = vector.load %arg1[%c0, %c0_0] : memref<1x256xf32, #tpu.memory_space<vmem>>, vector<1x256xf32>
    %c0_1 = arith.constant 0 : index
    %c0_2 = arith.constant 0 : index
    %1 = vector.load %arg2[%c0_1, %c0_2] : memref<1x256xf32, #tpu.memory_space<vmem>>, vector<1x256xf32>
    %cst = arith.constant -1.000000e+00 : f32
    %2 = vector.broadcast %cst : f32 to vector<1x256xf32>
    %3 = arith.addf %0, %2 : vector<1x256xf32>
    %cst_3 = arith.constant 0.000000e+00 : f32
    %4 = vector.broadcast %cst_3 : f32 to vector<1x256xf32>
    %5 = arith.cmpf oge, %3, %4 : vector<1x256xf32>
    %cst_4 = arith.constant -1.000000e+00 : f32
    %6 = vector.broadcast %cst_4 : f32 to vector<1x256xf32>
    %7 = arith.addf %0, %6 : vector<1x256xf32>
    %cst_5 = arith.constant 1.500000e+01 : f32
    %8 = vector.broadcast %cst_5 : f32 to vector<1x256xf32>
    %9 = arith.cmpf ole, %7, %8 : vector<1x256xf32>
    %10 = arith.andi %5, %9 : vector<1x256xi1>
    %cst_6 = arith.constant -1.000000e+00 : f32
    %11 = vector.broadcast %cst_6 : f32 to vector<1x256xf32>
    %12 = arith.addf %1, %11 : vector<1x256xf32>
    %cst_7 = arith.constant 0.000000e+00 : f32
    %13 = vector.broadcast %cst_7 : f32 to vector<1x256xf32>
    %14 = arith.cmpf oge, %12, %13 : vector<1x256xf32>
    %15 = arith.andi %10, %14 : vector<1x256xi1>
    %cst_8 = arith.constant -1.000000e+00 : f32
    %16 = vector.broadcast %cst_8 : f32 to vector<1x256xf32>
    %17 = arith.addf %1, %16 : vector<1x256xf32>
    %cst_9 = arith.constant 1.500000e+01 : f32
    %18 = vector.broadcast %cst_9 : f32 to vector<1x256xf32>
    %19 = arith.cmpf ole, %17, %18 : vector<1x256xf32>
    %20 = arith.andi %15, %19 : vector<1x256xi1>
    %cst_10 = arith.constant 0.000000e+00 : f32
    %21 = vector.broadcast %cst_10 : f32 to vector<1x256xf32>
    %22 = arith.addf %0, %21 : vector<1x256xf32>
    %cst_11 = arith.constant 0.000000e+00 : f32
    %23 = vector.broadcast %cst_11 : f32 to vector<1x256xf32>
    %24 = arith.cmpf oge, %22, %23 : vector<1x256xf32>
    %cst_12 = arith.constant 0.000000e+00 : f32
    %25 = vector.broadcast %cst_12 : f32 to vector<1x256xf32>
    %26 = arith.addf %0, %25 : vector<1x256xf32>
    %cst_13 = arith.constant 1.500000e+01 : f32
    %27 = vector.broadcast %cst_13 : f32 to vector<1x256xf32>
    %28 = arith.cmpf ole, %26, %27 : vector<1x256xf32>
    %29 = arith.andi %24, %28 : vector<1x256xi1>
    %cst_14 = arith.constant -1.000000e+00 : f32
    %30 = vector.broadcast %cst_14 : f32 to vector<1x256xf32>
    %31 = arith.addf %1, %30 : vector<1x256xf32>
    %cst_15 = arith.constant 0.000000e+00 : f32
    %32 = vector.broadcast %cst_15 : f32 to vector<1x256xf32>
    %33 = arith.cmpf oge, %31, %32 : vector<1x256xf32>
    %34 = arith.andi %29, %33 : vector<1x256xi1>
    %cst_16 = arith.constant -1.000000e+00 : f32
    %35 = vector.broadcast %cst_16 : f32 to vector<1x256xf32>
    %36 = arith.addf %1, %35 : vector<1x256xf32>
    %cst_17 = arith.constant 1.500000e+01 : f32
    %37 = vector.broadcast %cst_17 : f32 to vector<1x256xf32>
    %38 = arith.cmpf ole, %36, %37 : vector<1x256xf32>
    %39 = arith.andi %34, %38 : vector<1x256xi1>
    %cst_18 = arith.constant 1.000000e+00 : f32
    %40 = vector.broadcast %cst_18 : f32 to vector<1x256xf32>
    %41 = arith.addf %0, %40 : vector<1x256xf32>
    %cst_19 = arith.constant 0.000000e+00 : f32
    %42 = vector.broadcast %cst_19 : f32 to vector<1x256xf32>
    %43 = arith.cmpf oge, %41, %42 : vector<1x256xf32>
    %cst_20 = arith.constant 1.000000e+00 : f32
    %44 = vector.broadcast %cst_20 : f32 to vector<1x256xf32>
    %45 = arith.addf %0, %44 : vector<1x256xf32>
    %cst_21 = arith.constant 1.500000e+01 : f32
    %46 = vector.broadcast %cst_21 : f32 to vector<1x256xf32>
    %47 = arith.cmpf ole, %45, %46 : vector<1x256xf32>
    %48 = arith.andi %43, %47 : vector<1x256xi1>
    %cst_22 = arith.constant -1.000000e+00 : f32
    %49 = vector.broadcast %cst_22 : f32 to vector<1x256xf32>
    %50 = arith.addf %1, %49 : vector<1x256xf32>
    %cst_23 = arith.constant 0.000000e+00 : f32
    %51 = vector.broadcast %cst_23 : f32 to vector<1x256xf32>
    %52 = arith.cmpf oge, %50, %51 : vector<1x256xf32>
    %53 = arith.andi %48, %52 : vector<1x256xi1>
    %cst_24 = arith.constant -1.000000e+00 : f32
    %54 = vector.broadcast %cst_24 : f32 to vector<1x256xf32>
    %55 = arith.addf %1, %54 : vector<1x256xf32>
    %cst_25 = arith.constant 1.500000e+01 : f32
    %56 = vector.broadcast %cst_25 : f32 to vector<1x256xf32>
    %57 = arith.cmpf ole, %55, %56 : vector<1x256xf32>
    %58 = arith.andi %53, %57 : vector<1x256xi1>
    %cst_26 = arith.constant -1.000000e+00 : f32
    %59 = vector.broadcast %cst_26 : f32 to vector<1x256xf32>
    %60 = arith.addf %0, %59 : vector<1x256xf32>
    %cst_27 = arith.constant 0.000000e+00 : f32
    %61 = vector.broadcast %cst_27 : f32 to vector<1x256xf32>
    %62 = arith.cmpf oge, %60, %61 : vector<1x256xf32>
    %cst_28 = arith.constant -1.000000e+00 : f32
    %63 = vector.broadcast %cst_28 : f32 to vector<1x256xf32>
    %64 = arith.addf %0, %63 : vector<1x256xf32>
    %cst_29 = arith.constant 1.500000e+01 : f32
    %65 = vector.broadcast %cst_29 : f32 to vector<1x256xf32>
    %66 = arith.cmpf ole, %64, %65 : vector<1x256xf32>
    %67 = arith.andi %62, %66 : vector<1x256xi1>
    %cst_30 = arith.constant 0.000000e+00 : f32
    %68 = vector.broadcast %cst_30 : f32 to vector<1x256xf32>
    %69 = arith.addf %1, %68 : vector<1x256xf32>
    %cst_31 = arith.constant 0.000000e+00 : f32
    %70 = vector.broadcast %cst_31 : f32 to vector<1x256xf32>
    %71 = arith.cmpf oge, %69, %70 : vector<1x256xf32>
    %72 = arith.andi %67, %71 : vector<1x256xi1>
    %cst_32 = arith.constant 0.000000e+00 : f32
    %73 = vector.broadcast %cst_32 : f32 to vector<1x256xf32>
    %74 = arith.addf %1, %73 : vector<1x256xf32>
    %cst_33 = arith.constant 1.500000e+01 : f32
    %75 = vector.broadcast %cst_33 : f32 to vector<1x256xf32>
    %76 = arith.cmpf ole, %74, %75 : vector<1x256xf32>
    %77 = arith.andi %72, %76 : vector<1x256xi1>
    %cst_34 = arith.constant 1.000000e+00 : f32
    %78 = vector.broadcast %cst_34 : f32 to vector<1x256xf32>
    %79 = arith.addf %0, %78 : vector<1x256xf32>
    %cst_35 = arith.constant 0.000000e+00 : f32
    %80 = vector.broadcast %cst_35 : f32 to vector<1x256xf32>
    %81 = arith.cmpf oge, %79, %80 : vector<1x256xf32>
    %cst_36 = arith.constant 1.000000e+00 : f32
    %82 = vector.broadcast %cst_36 : f32 to vector<1x256xf32>
    %83 = arith.addf %0, %82 : vector<1x256xf32>
    %cst_37 = arith.constant 1.500000e+01 : f32
    %84 = vector.broadcast %cst_37 : f32 to vector<1x256xf32>
    %85 = arith.cmpf ole, %83, %84 : vector<1x256xf32>
    %86 = arith.andi %81, %85 : vector<1x256xi1>
    %cst_38 = arith.constant 0.000000e+00 : f32
    %87 = vector.broadcast %cst_38 : f32 to vector<1x256xf32>
    %88 = arith.addf %1, %87 : vector<1x256xf32>
    %cst_39 = arith.constant 0.000000e+00 : f32
    %89 = vector.broadcast %cst_39 : f32 to vector<1x256xf32>
    %90 = arith.cmpf oge, %88, %89 : vector<1x256xf32>
    %91 = arith.andi %86, %90 : vector<1x256xi1>
    %cst_40 = arith.constant 0.000000e+00 : f32
    %92 = vector.broadcast %cst_40 : f32 to vector<1x256xf32>
    %93 = arith.addf %1, %92 : vector<1x256xf32>
    %cst_41 = arith.constant 1.500000e+01 : f32
    %94 = vector.broadcast %cst_41 : f32 to vector<1x256xf32>
    %95 = arith.cmpf ole, %93, %94 : vector<1x256xf32>
    %96 = arith.andi %91, %95 : vector<1x256xi1>
    %cst_42 = arith.constant -1.000000e+00 : f32
    %97 = vector.broadcast %cst_42 : f32 to vector<1x256xf32>
    %98 = arith.addf %0, %97 : vector<1x256xf32>
    %cst_43 = arith.constant 0.000000e+00 : f32
    %99 = vector.broadcast %cst_43 : f32 to vector<1x256xf32>
    %100 = arith.cmpf oge, %98, %99 : vector<1x256xf32>
    %cst_44 = arith.constant -1.000000e+00 : f32
    %101 = vector.broadcast %cst_44 : f32 to vector<1x256xf32>
    %102 = arith.addf %0, %101 : vector<1x256xf32>
    %cst_45 = arith.constant 1.500000e+01 : f32
    %103 = vector.broadcast %cst_45 : f32 to vector<1x256xf32>
    %104 = arith.cmpf ole, %102, %103 : vector<1x256xf32>
    %105 = arith.andi %100, %104 : vector<1x256xi1>
    %cst_46 = arith.constant 1.000000e+00 : f32
    %106 = vector.broadcast %cst_46 : f32 to vector<1x256xf32>
    %107 = arith.addf %1, %106 : vector<1x256xf32>
    %cst_47 = arith.constant 0.000000e+00 : f32
    %108 = vector.broadcast %cst_47 : f32 to vector<1x256xf32>
    %109 = arith.cmpf oge, %107, %108 : vector<1x256xf32>
    %110 = arith.andi %105, %109 : vector<1x256xi1>
    %cst_48 = arith.constant 1.000000e+00 : f32
    %111 = vector.broadcast %cst_48 : f32 to vector<1x256xf32>
    %112 = arith.addf %1, %111 : vector<1x256xf32>
    %cst_49 = arith.constant 1.500000e+01 : f32
    %113 = vector.broadcast %cst_49 : f32 to vector<1x256xf32>
    %114 = arith.cmpf ole, %112, %113 : vector<1x256xf32>
    %115 = arith.andi %110, %114 : vector<1x256xi1>
    %cst_50 = arith.constant 0.000000e+00 : f32
    %116 = vector.broadcast %cst_50 : f32 to vector<1x256xf32>
    %117 = arith.addf %0, %116 : vector<1x256xf32>
    %cst_51 = arith.constant 0.000000e+00 : f32
    %118 = vector.broadcast %cst_51 : f32 to vector<1x256xf32>
    %119 = arith.cmpf oge, %117, %118 : vector<1x256xf32>
    %cst_52 = arith.constant 0.000000e+00 : f32
    %120 = vector.broadcast %cst_52 : f32 to vector<1x256xf32>
    %121 = arith.addf %0, %120 : vector<1x256xf32>
    %cst_53 = arith.constant 1.500000e+01 : f32
    %122 = vector.broadcast %cst_53 : f32 to vector<1x256xf32>
    %123 = arith.cmpf ole, %121, %122 : vector<1x256xf32>
    %124 = arith.andi %119, %123 : vector<1x256xi1>
    %cst_54 = arith.constant 1.000000e+00 : f32
    %125 = vector.broadcast %cst_54 : f32 to vector<1x256xf32>
    %126 = arith.addf %1, %125 : vector<1x256xf32>
    %cst_55 = arith.constant 0.000000e+00 : f32
    %127 = vector.broadcast %cst_55 : f32 to vector<1x256xf32>
    %128 = arith.cmpf oge, %126, %127 : vector<1x256xf32>
    %129 = arith.andi %124, %128 : vector<1x256xi1>
    %cst_56 = arith.constant 1.000000e+00 : f32
    %130 = vector.broadcast %cst_56 : f32 to vector<1x256xf32>
    %131 = arith.addf %1, %130 : vector<1x256xf32>
    %cst_57 = arith.constant 1.500000e+01 : f32
    %132 = vector.broadcast %cst_57 : f32 to vector<1x256xf32>
    %133 = arith.cmpf ole, %131, %132 : vector<1x256xf32>
    %134 = arith.andi %129, %133 : vector<1x256xi1>
    %cst_58 = arith.constant 1.000000e+00 : f32
    %135 = vector.broadcast %cst_58 : f32 to vector<1x256xf32>
    %136 = arith.addf %0, %135 : vector<1x256xf32>
    %cst_59 = arith.constant 0.000000e+00 : f32
    %137 = vector.broadcast %cst_59 : f32 to vector<1x256xf32>
    %138 = arith.cmpf oge, %136, %137 : vector<1x256xf32>
    %cst_60 = arith.constant 1.000000e+00 : f32
    %139 = vector.broadcast %cst_60 : f32 to vector<1x256xf32>
    %140 = arith.addf %0, %139 : vector<1x256xf32>
    %cst_61 = arith.constant 1.500000e+01 : f32
    %141 = vector.broadcast %cst_61 : f32 to vector<1x256xf32>
    %142 = arith.cmpf ole, %140, %141 : vector<1x256xf32>
    %143 = arith.andi %138, %142 : vector<1x256xi1>
    %cst_62 = arith.constant 1.000000e+00 : f32
    %144 = vector.broadcast %cst_62 : f32 to vector<1x256xf32>
    %145 = arith.addf %1, %144 : vector<1x256xf32>
    %cst_63 = arith.constant 0.000000e+00 : f32
    %146 = vector.broadcast %cst_63 : f32 to vector<1x256xf32>
    %147 = arith.cmpf oge, %145, %146 : vector<1x256xf32>
    %148 = arith.andi %143, %147 : vector<1x256xi1>
    %cst_64 = arith.constant 1.000000e+00 : f32
    %149 = vector.broadcast %cst_64 : f32 to vector<1x256xf32>
    %150 = arith.addf %1, %149 : vector<1x256xf32>
    %cst_65 = arith.constant 1.500000e+01 : f32
    %151 = vector.broadcast %cst_65 : f32 to vector<1x256xf32>
    %152 = arith.cmpf ole, %150, %151 : vector<1x256xf32>
    %153 = arith.andi %148, %152 : vector<1x256xi1>
    %c0_66 = arith.constant 0 : index
    %c0_67 = arith.constant 0 : index
    %c0_68 = arith.constant 0 : index
    %154 = vector.load %arg3[%c0_66, %c0_67, %c0_68] : memref<1x3x256xf32, #tpu.memory_space<vmem>>, vector<1x3x256xf32>
    %155 = vector.shape_cast %154 : vector<1x3x256xf32> to vector<3x256xf32>
    %c17_i32 = arith.constant 17 : i32
    %156 = tpu.dynamic_rotate %155 by %c17_i32 dim 1 : vector<3x256xf32>, i32 -> vector<3x256xf32>
    %cst_69 = arith.constant 0.000000e+00 : f32
    %157 = vector.shape_cast %20 : vector<1x256xi1> to vector<1x256xi1>
    %158 = vector.broadcast %157 : vector<1x256xi1> to vector<3x256xi1>
    %159 = vector.broadcast %cst_69 : f32 to vector<3x256xf32>
    %160 = arith.select %158, %156, %159 : vector<3x256xi1>, vector<3x256xf32>
    %c0_70 = arith.constant 0 : index
    %c0_71 = arith.constant 0 : index
    %c0_72 = arith.constant 0 : index
    %161 = vector.load %arg4[%c0_70, %c0_71, %c0_72] : memref<9x32x3xbf16, #tpu.memory_space<vmem>>, vector<1x32x3xbf16>
    %162 = vector.shape_cast %161 : vector<1x32x3xbf16> to vector<32x3xbf16>
    %163 = arith.truncf %160 : vector<3x256xf32> to vector<3x256xbf16>
    %cst_73 = arith.constant dense<0.000000e+00> : vector<32x256xf32>
    %164 = tpu.matmul %162, %163, %cst_73 {dimension_numbers = #tpu.dot_dimension_numbers<[1], [0], [0], [1], [0, 0, 1, 1], [], []>} : vector<32x3xbf16>, vector<3x256xbf16>, vector<32x256xf32> -> vector<32x256xf32>
    %c16_i32 = arith.constant 16 : i32
    %165 = tpu.dynamic_rotate %155 by %c16_i32 dim 1 : vector<3x256xf32>, i32 -> vector<3x256xf32>
    %cst_74 = arith.constant 0.000000e+00 : f32
    %166 = vector.shape_cast %39 : vector<1x256xi1> to vector<1x256xi1>
    %167 = vector.broadcast %166 : vector<1x256xi1> to vector<3x256xi1>
    %168 = vector.broadcast %cst_74 : f32 to vector<3x256xf32>
    %169 = arith.select %167, %165, %168 : vector<3x256xi1>, vector<3x256xf32>
    %c1 = arith.constant 1 : index
    %c0_75 = arith.constant 0 : index
    %c0_76 = arith.constant 0 : index
    %170 = vector.load %arg4[%c1, %c0_75, %c0_76] : memref<9x32x3xbf16, #tpu.memory_space<vmem>>, vector<1x32x3xbf16>
    %171 = vector.shape_cast %170 : vector<1x32x3xbf16> to vector<32x3xbf16>
    %172 = arith.truncf %169 : vector<3x256xf32> to vector<3x256xbf16>
    %cst_77 = arith.constant dense<0.000000e+00> : vector<32x256xf32>
    %173 = tpu.matmul %171, %172, %cst_77 {dimension_numbers = #tpu.dot_dimension_numbers<[1], [0], [0], [1], [0, 0, 1, 1], [], []>} : vector<32x3xbf16>, vector<3x256xbf16>, vector<32x256xf32> -> vector<32x256xf32>
    %174 = arith.addf %164, %173 : vector<32x256xf32>
    %c15_i32 = arith.constant 15 : i32
    %175 = tpu.dynamic_rotate %155 by %c15_i32 dim 1 : vector<3x256xf32>, i32 -> vector<3x256xf32>
    %cst_78 = arith.constant 0.000000e+00 : f32
    %176 = vector.shape_cast %58 : vector<1x256xi1> to vector<1x256xi1>
    %177 = vector.broadcast %176 : vector<1x256xi1> to vector<3x256xi1>
    %178 = vector.broadcast %cst_78 : f32 to vector<3x256xf32>
    %179 = arith.select %177, %175, %178 : vector<3x256xi1>, vector<3x256xf32>
    %c2 = arith.constant 2 : index
    %c0_79 = arith.constant 0 : index
    %c0_80 = arith.constant 0 : index
    %180 = vector.load %arg4[%c2, %c0_79, %c0_80] : memref<9x32x3xbf16, #tpu.memory_space<vmem>>, vector<1x32x3xbf16>
    %181 = vector.shape_cast %180 : vector<1x32x3xbf16> to vector<32x3xbf16>
    %182 = arith.truncf %179 : vector<3x256xf32> to vector<3x256xbf16>
    %cst_81 = arith.constant dense<0.000000e+00> : vector<32x256xf32>
    %183 = tpu.matmul %181, %182, %cst_81 {dimension_numbers = #tpu.dot_dimension_numbers<[1], [0], [0], [1], [0, 0, 1, 1], [], []>} : vector<32x3xbf16>, vector<3x256xbf16>, vector<32x256xf32> -> vector<32x256xf32>
    %184 = arith.addf %174, %183 : vector<32x256xf32>
    %c1_i32 = arith.constant 1 : i32
    %185 = tpu.dynamic_rotate %155 by %c1_i32 dim 1 : vector<3x256xf32>, i32 -> vector<3x256xf32>
    %cst_82 = arith.constant 0.000000e+00 : f32
    %186 = vector.shape_cast %77 : vector<1x256xi1> to vector<1x256xi1>
    %187 = vector.broadcast %186 : vector<1x256xi1> to vector<3x256xi1>
    %188 = vector.broadcast %cst_82 : f32 to vector<3x256xf32>
    %189 = arith.select %187, %185, %188 : vector<3x256xi1>, vector<3x256xf32>
    %c3 = arith.constant 3 : index
    %c0_83 = arith.constant 0 : index
    %c0_84 = arith.constant 0 : index
    %190 = vector.load %arg4[%c3, %c0_83, %c0_84] : memref<9x32x3xbf16, #tpu.memory_space<vmem>>, vector<1x32x3xbf16>
    %191 = vector.shape_cast %190 : vector<1x32x3xbf16> to vector<32x3xbf16>
    %192 = arith.truncf %189 : vector<3x256xf32> to vector<3x256xbf16>
    %cst_85 = arith.constant dense<0.000000e+00> : vector<32x256xf32>
    %193 = tpu.matmul %191, %192, %cst_85 {dimension_numbers = #tpu.dot_dimension_numbers<[1], [0], [0], [1], [0, 0, 1, 1], [], []>} : vector<32x3xbf16>, vector<3x256xbf16>, vector<32x256xf32> -> vector<32x256xf32>
    %194 = arith.addf %184, %193 : vector<32x256xf32>
    %c4 = arith.constant 4 : index
    %c0_86 = arith.constant 0 : index
    %c0_87 = arith.constant 0 : index
    %195 = vector.load %arg4[%c4, %c0_86, %c0_87] : memref<9x32x3xbf16, #tpu.memory_space<vmem>>, vector<1x32x3xbf16>
    %196 = vector.shape_cast %195 : vector<1x32x3xbf16> to vector<32x3xbf16>
    %197 = arith.truncf %155 : vector<3x256xf32> to vector<3x256xbf16>
    %cst_88 = arith.constant dense<0.000000e+00> : vector<32x256xf32>
    %198 = tpu.matmul %196, %197, %cst_88 {dimension_numbers = #tpu.dot_dimension_numbers<[1], [0], [0], [1], [0, 0, 1, 1], [], []>} : vector<32x3xbf16>, vector<3x256xbf16>, vector<32x256xf32> -> vector<32x256xf32>
    %199 = arith.addf %194, %198 : vector<32x256xf32>
    %c255_i32 = arith.constant 255 : i32
    %200 = tpu.dynamic_rotate %155 by %c255_i32 dim 1 : vector<3x256xf32>, i32 -> vector<3x256xf32>
    %cst_89 = arith.constant 0.000000e+00 : f32
    %201 = vector.shape_cast %96 : vector<1x256xi1> to vector<1x256xi1>
    %202 = vector.broadcast %201 : vector<1x256xi1> to vector<3x256xi1>
    %203 = vector.broadcast %cst_89 : f32 to vector<3x256xf32>
    %204 = arith.select %202, %200, %203 : vector<3x256xi1>, vector<3x256xf32>
    %c5 = arith.constant 5 : index
    %c0_90 = arith.constant 0 : index
    %c0_91 = arith.constant 0 : index
    %205 = vector.load %arg4[%c5, %c0_90, %c0_91] : memref<9x32x3xbf16, #tpu.memory_space<vmem>>, vector<1x32x3xbf16>
    %206 = vector.shape_cast %205 : vector<1x32x3xbf16> to vector<32x3xbf16>
    %207 = arith.truncf %204 : vector<3x256xf32> to vector<3x256xbf16>
    %cst_92 = arith.constant dense<0.000000e+00> : vector<32x256xf32>
    %208 = tpu.matmul %206, %207, %cst_92 {dimension_numbers = #tpu.dot_dimension_numbers<[1], [0], [0], [1], [0, 0, 1, 1], [], []>} : vector<32x3xbf16>, vector<3x256xbf16>, vector<32x256xf32> -> vector<32x256xf32>
    %209 = arith.addf %199, %208 : vector<32x256xf32>
    %c241_i32 = arith.constant 241 : i32
    %210 = tpu.dynamic_rotate %155 by %c241_i32 dim 1 : vector<3x256xf32>, i32 -> vector<3x256xf32>
    %cst_93 = arith.constant 0.000000e+00 : f32
    %211 = vector.shape_cast %115 : vector<1x256xi1> to vector<1x256xi1>
    %212 = vector.broadcast %211 : vector<1x256xi1> to vector<3x256xi1>
    %213 = vector.broadcast %cst_93 : f32 to vector<3x256xf32>
    %214 = arith.select %212, %210, %213 : vector<3x256xi1>, vector<3x256xf32>
    %c6 = arith.constant 6 : index
    %c0_94 = arith.constant 0 : index
    %c0_95 = arith.constant 0 : index
    %215 = vector.load %arg4[%c6, %c0_94, %c0_95] : memref<9x32x3xbf16, #tpu.memory_space<vmem>>, vector<1x32x3xbf16>
    %216 = vector.shape_cast %215 : vector<1x32x3xbf16> to vector<32x3xbf16>
    %217 = arith.truncf %214 : vector<3x256xf32> to vector<3x256xbf16>
    %cst_96 = arith.constant dense<0.000000e+00> : vector<32x256xf32>
    %218 = tpu.matmul %216, %217, %cst_96 {dimension_numbers = #tpu.dot_dimension_numbers<[1], [0], [0], [1], [0, 0, 1, 1], [], []>} : vector<32x3xbf16>, vector<3x256xbf16>, vector<32x256xf32> -> vector<32x256xf32>
    %219 = arith.addf %209, %218 : vector<32x256xf32>
    %c240_i32 = arith.constant 240 : i32
    %220 = tpu.dynamic_rotate %155 by %c240_i32 dim 1 : vector<3x256xf32>, i32 -> vector<3x256xf32>
    %cst_97 = arith.constant 0.000000e+00 : f32
    %221 = vector.shape_cast %134 : vector<1x256xi1> to vector<1x256xi1>
    %222 = vector.broadcast %221 : vector<1x256xi1> to vector<3x256xi1>
    %223 = vector.broadcast %cst_97 : f32 to vector<3x256xf32>
    %224 = arith.select %222, %220, %223 : vector<3x256xi1>, vector<3x256xf32>
    %c7 = arith.constant 7 : index
    %c0_98 = arith.constant 0 : index
    %c0_99 = arith.constant 0 : index
    %225 = vector.load %arg4[%c7, %c0_98, %c0_99] : memref<9x32x3xbf16, #tpu.memory_space<vmem>>, vector<1x32x3xbf16>
    %226 = vector.shape_cast %225 : vector<1x32x3xbf16> to vector<32x3xbf16>
    %227 = arith.truncf %224 : vector<3x256xf32> to vector<3x256xbf16>
    %cst_100 = arith.constant dense<0.000000e+00> : vector<32x256xf32>
    %228 = tpu.matmul %226, %227, %cst_100 {dimension_numbers = #tpu.dot_dimension_numbers<[1], [0], [0], [1], [0, 0, 1, 1], [], []>} : vector<32x3xbf16>, vector<3x256xbf16>, vector<32x256xf32> -> vector<32x256xf32>
    %229 = arith.addf %219, %228 : vector<32x256xf32>
    %c239_i32 = arith.constant 239 : i32
    %230 = tpu.dynamic_rotate %155 by %c239_i32 dim 1 : vector<3x256xf32>, i32 -> vector<3x256xf32>
    %cst_101 = arith.constant 0.000000e+00 : f32
    %231 = vector.shape_cast %153 : vector<1x256xi1> to vector<1x256xi1>
    %232 = vector.broadcast %231 : vector<1x256xi1> to vector<3x256xi1>
    %233 = vector.broadcast %cst_101 : f32 to vector<3x256xf32>
    %234 = arith.select %232, %230, %233 : vector<3x256xi1>, vector<3x256xf32>
    %c8 = arith.constant 8 : index
    %c0_102 = arith.constant 0 : index
    %c0_103 = arith.constant 0 : index
    %235 = vector.load %arg4[%c8, %c0_102, %c0_103] : memref<9x32x3xbf16, #tpu.memory_space<vmem>>, vector<1x32x3xbf16>
    %236 = vector.shape_cast %235 : vector<1x32x3xbf16> to vector<32x3xbf16>
    %237 = arith.truncf %234 : vector<3x256xf32> to vector<3x256xbf16>
    %cst_104 = arith.constant dense<0.000000e+00> : vector<32x256xf32>
    %238 = tpu.matmul %236, %237, %cst_104 {dimension_numbers = #tpu.dot_dimension_numbers<[1], [0], [0], [1], [0, 0, 1, 1], [], []>} : vector<32x3xbf16>, vector<3x256xbf16>, vector<32x256xf32> -> vector<32x256xf32>
    %239 = arith.addf %229, %238 : vector<32x256xf32>
    %c0_105 = arith.constant 0 : index
    %c0_106 = arith.constant 0 : index
    %240 = vector.load %arg5[%c0_105, %c0_106] : memref<32x1xf32, #tpu.memory_space<vmem>>, vector<32x1xf32>
    %241 = vector.broadcast %240 : vector<32x1xf32> to vector<32x256xf32>
    %242 = arith.addf %239, %241 : vector<32x256xf32>
    %cst_107 = arith.constant 0.000000e+00 : f32
    %243 = vector.broadcast %cst_107 : f32 to vector<32x256xf32>
    %244 = arith.maximumf %242, %243 : vector<32x256xf32>
    %245 = arith.truncf %244 : vector<32x256xf32> to vector<32x256xbf16>
    %c0_108 = arith.constant 0 : index
    %c0_109 = arith.constant 0 : index
    %c0_110 = arith.constant 0 : index
    %246 = vector.load %arg10[%c0_108, %c0_109, %c0_110] : memref<1x32x256xbf16, #tpu.memory_space<vmem>>, vector<1x32x256xbf16>
    %247 = vector.shape_cast %246 : vector<1x32x256xbf16> to vector<32x256xbf16>
    %248 = vector.shape_cast %245 : vector<32x256xbf16> to vector<1x32x256xbf16>
    tpu.vector_store %arg10[%c0_108, %c0_109, %c0_110], %248 {strides = array<i32>} : memref<1x32x256xbf16, #tpu.memory_space<vmem>>, vector<1x32x256xbf16>,
    %c17_i32_111 = arith.constant 17 : i32
    %249 = tpu.dynamic_rotate %244 by %c17_i32_111 dim 1 : vector<32x256xf32>, i32 -> vector<32x256xf32>
    %cst_112 = arith.constant 0.000000e+00 : f32
    %250 = vector.shape_cast %20 : vector<1x256xi1> to vector<1x256xi1>
    %251 = vector.broadcast %250 : vector<1x256xi1> to vector<32x256xi1>
    %252 = vector.broadcast %cst_112 : f32 to vector<32x256xf32>
    %253 = arith.select %251, %249, %252 : vector<32x256xi1>, vector<32x256xf32>
    %c0_113 = arith.constant 0 : index
    %c0_114 = arith.constant 0 : index
    %c0_115 = arith.constant 0 : index
    %254 = vector.load %arg6[%c0_113, %c0_114, %c0_115] : memref<9x32x32xbf16, #tpu.memory_space<vmem>>, vector<1x32x32xbf16>
    %255 = vector.shape_cast %254 : vector<1x32x32xbf16> to vector<32x32xbf16>
    %256 = arith.truncf %253 : vector<32x256xf32> to vector<32x256xbf16>
    %cst_116 = arith.constant dense<0.000000e+00> : vector<32x256xf32>
    %257 = tpu.matmul %255, %256, %cst_116 {dimension_numbers = #tpu.dot_dimension_numbers<[1], [0], [0], [1], [0, 0, 1, 1], [], []>} : vector<32x32xbf16>, vector<32x256xbf16>, vector<32x256xf32> -> vector<32x256xf32>
    %c16_i32_117 = arith.constant 16 : i32
    %258 = tpu.dynamic_rotate %244 by %c16_i32_117 dim 1 : vector<32x256xf32>, i32 -> vector<32x256xf32>
    %cst_118 = arith.constant 0.000000e+00 : f32
    %259 = vector.shape_cast %39 : vector<1x256xi1> to vector<1x256xi1>
    %260 = vector.broadcast %259 : vector<1x256xi1> to vector<32x256xi1>
    %261 = vector.broadcast %cst_118 : f32 to vector<32x256xf32>
    %262 = arith.select %260, %258, %261 : vector<32x256xi1>, vector<32x256xf32>
    %c1_119 = arith.constant 1 : index
    %c0_120 = arith.constant 0 : index
    %c0_121 = arith.constant 0 : index
    %263 = vector.load %arg6[%c1_119, %c0_120, %c0_121] : memref<9x32x32xbf16, #tpu.memory_space<vmem>>, vector<1x32x32xbf16>
    %264 = vector.shape_cast %263 : vector<1x32x32xbf16> to vector<32x32xbf16>
    %265 = arith.truncf %262 : vector<32x256xf32> to vector<32x256xbf16>
    %cst_122 = arith.constant dense<0.000000e+00> : vector<32x256xf32>
    %266 = tpu.matmul %264, %265, %cst_122 {dimension_numbers = #tpu.dot_dimension_numbers<[1], [0], [0], [1], [0, 0, 1, 1], [], []>} : vector<32x32xbf16>, vector<32x256xbf16>, vector<32x256xf32> -> vector<32x256xf32>
    %267 = arith.addf %257, %266 : vector<32x256xf32>
    %c15_i32_123 = arith.constant 15 : i32
    %268 = tpu.dynamic_rotate %244 by %c15_i32_123 dim 1 : vector<32x256xf32>, i32 -> vector<32x256xf32>
    %cst_124 = arith.constant 0.000000e+00 : f32
    %269 = vector.shape_cast %58 : vector<1x256xi1> to vector<1x256xi1>
    %270 = vector.broadcast %269 : vector<1x256xi1> to vector<32x256xi1>
    %271 = vector.broadcast %cst_124 : f32 to vector<32x256xf32>
    %272 = arith.select %270, %268, %271 : vector<32x256xi1>, vector<32x256xf32>
    %c2_125 = arith.constant 2 : index
    %c0_126 = arith.constant 0 : index
    %c0_127 = arith.constant 0 : index
    %273 = vector.load %arg6[%c2_125, %c0_126, %c0_127] : memref<9x32x32xbf16, #tpu.memory_space<vmem>>, vector<1x32x32xbf16>
    %274 = vector.shape_cast %273 : vector<1x32x32xbf16> to vector<32x32xbf16>
    %275 = arith.truncf %272 : vector<32x256xf32> to vector<32x256xbf16>
    %cst_128 = arith.constant dense<0.000000e+00> : vector<32x256xf32>
    %276 = tpu.matmul %274, %275, %cst_128 {dimension_numbers = #tpu.dot_dimension_numbers<[1], [0], [0], [1], [0, 0, 1, 1], [], []>} : vector<32x32xbf16>, vector<32x256xbf16>, vector<32x256xf32> -> vector<32x256xf32>
    %277 = arith.addf %267, %276 : vector<32x256xf32>
    %c1_i32_129 = arith.constant 1 : i32
    %278 = tpu.dynamic_rotate %244 by %c1_i32_129 dim 1 : vector<32x256xf32>, i32 -> vector<32x256xf32>
    %cst_130 = arith.constant 0.000000e+00 : f32
    %279 = vector.shape_cast %77 : vector<1x256xi1> to vector<1x256xi1>
    %280 = vector.broadcast %279 : vector<1x256xi1> to vector<32x256xi1>
    %281 = vector.broadcast %cst_130 : f32 to vector<32x256xf32>
    %282 = arith.select %280, %278, %281 : vector<32x256xi1>, vector<32x256xf32>
    %c3_131 = arith.constant 3 : index
    %c0_132 = arith.constant 0 : index
    %c0_133 = arith.constant 0 : index
    %283 = vector.load %arg6[%c3_131, %c0_132, %c0_133] : memref<9x32x32xbf16, #tpu.memory_space<vmem>>, vector<1x32x32xbf16>
    %284 = vector.shape_cast %283 : vector<1x32x32xbf16> to vector<32x32xbf16>
    %285 = arith.truncf %282 : vector<32x256xf32> to vector<32x256xbf16>
    %cst_134 = arith.constant dense<0.000000e+00> : vector<32x256xf32>
    %286 = tpu.matmul %284, %285, %cst_134 {dimension_numbers = #tpu.dot_dimension_numbers<[1], [0], [0], [1], [0, 0, 1, 1], [], []>} : vector<32x32xbf16>, vector<32x256xbf16>, vector<32x256xf32> -> vector<32x256xf32>
    %287 = arith.addf %277, %286 : vector<32x256xf32>
    %c4_135 = arith.constant 4 : index
    %c0_136 = arith.constant 0 : index
    %c0_137 = arith.constant 0 : index
    %288 = vector.load %arg6[%c4_135, %c0_136, %c0_137] : memref<9x32x32xbf16, #tpu.memory_space<vmem>>, vector<1x32x32xbf16>
    %289 = vector.shape_cast %288 : vector<1x32x32xbf16> to vector<32x32xbf16>
    %290 = arith.truncf %244 : vector<32x256xf32> to vector<32x256xbf16>
    %cst_138 = arith.constant dense<0.000000e+00> : vector<32x256xf32>
    %291 = tpu.matmul %289, %290, %cst_138 {dimension_numbers = #tpu.dot_dimension_numbers<[1], [0], [0], [1], [0, 0, 1, 1], [], []>} : vector<32x32xbf16>, vector<32x256xbf16>, vector<32x256xf32> -> vector<32x256xf32>
    %292 = arith.addf %287, %291 : vector<32x256xf32>
    %c255_i32_139 = arith.constant 255 : i32
    %293 = tpu.dynamic_rotate %244 by %c255_i32_139 dim 1 : vector<32x256xf32>, i32 -> vector<32x256xf32>
    %cst_140 = arith.constant 0.000000e+00 : f32
    %294 = vector.shape_cast %96 : vector<1x256xi1> to vector<1x256xi1>
    %295 = vector.broadcast %294 : vector<1x256xi1> to vector<32x256xi1>
    %296 = vector.broadcast %cst_140 : f32 to vector<32x256xf32>
    %297 = arith.select %295, %293, %296 : vector<32x256xi1>, vector<32x256xf32>
    %c5_141 = arith.constant 5 : index
    %c0_142 = arith.constant 0 : index
    %c0_143 = arith.constant 0 : index
    %298 = vector.load %arg6[%c5_141, %c0_142, %c0_143] : memref<9x32x32xbf16, #tpu.memory_space<vmem>>, vector<1x32x32xbf16>
    %299 = vector.shape_cast %298 : vector<1x32x32xbf16> to vector<32x32xbf16>
    %300 = arith.truncf %297 : vector<32x256xf32> to vector<32x256xbf16>
    %cst_144 = arith.constant dense<0.000000e+00> : vector<32x256xf32>
    %301 = tpu.matmul %299, %300, %cst_144 {dimension_numbers = #tpu.dot_dimension_numbers<[1], [0], [0], [1], [0, 0, 1, 1], [], []>} : vector<32x32xbf16>, vector<32x256xbf16>, vector<32x256xf32> -> vector<32x256xf32>
    %302 = arith.addf %292, %301 : vector<32x256xf32>
    %c241_i32_145 = arith.constant 241 : i32
    %303 = tpu.dynamic_rotate %244 by %c241_i32_145 dim 1 : vector<32x256xf32>, i32 -> vector<32x256xf32>
    %cst_146 = arith.constant 0.000000e+00 : f32
    %304 = vector.shape_cast %115 : vector<1x256xi1> to vector<1x256xi1>
    %305 = vector.broadcast %304 : vector<1x256xi1> to vector<32x256xi1>
    %306 = vector.broadcast %cst_146 : f32 to vector<32x256xf32>
    %307 = arith.select %305, %303, %306 : vector<32x256xi1>, vector<32x256xf32>
    %c6_147 = arith.constant 6 : index
    %c0_148 = arith.constant 0 : index
    %c0_149 = arith.constant 0 : index
    %308 = vector.load %arg6[%c6_147, %c0_148, %c0_149] : memref<9x32x32xbf16, #tpu.memory_space<vmem>>, vector<1x32x32xbf16>
    %309 = vector.shape_cast %308 : vector<1x32x32xbf16> to vector<32x32xbf16>
    %310 = arith.truncf %307 : vector<32x256xf32> to vector<32x256xbf16>
    %cst_150 = arith.constant dense<0.000000e+00> : vector<32x256xf32>
    %311 = tpu.matmul %309, %310, %cst_150 {dimension_numbers = #tpu.dot_dimension_numbers<[1], [0], [0], [1], [0, 0, 1, 1], [], []>} : vector<32x32xbf16>, vector<32x256xbf16>, vector<32x256xf32> -> vector<32x256xf32>
    %312 = arith.addf %302, %311 : vector<32x256xf32>
    %c240_i32_151 = arith.constant 240 : i32
    %313 = tpu.dynamic_rotate %244 by %c240_i32_151 dim 1 : vector<32x256xf32>, i32 -> vector<32x256xf32>
    %cst_152 = arith.constant 0.000000e+00 : f32
    %314 = vector.shape_cast %134 : vector<1x256xi1> to vector<1x256xi1>
    %315 = vector.broadcast %314 : vector<1x256xi1> to vector<32x256xi1>
    %316 = vector.broadcast %cst_152 : f32 to vector<32x256xf32>
    %317 = arith.select %315, %313, %316 : vector<32x256xi1>, vector<32x256xf32>
    %c7_153 = arith.constant 7 : index
    %c0_154 = arith.constant 0 : index
    %c0_155 = arith.constant 0 : index
    %318 = vector.load %arg6[%c7_153, %c0_154, %c0_155] : memref<9x32x32xbf16, #tpu.memory_space<vmem>>, vector<1x32x32xbf16>
    %319 = vector.shape_cast %318 : vector<1x32x32xbf16> to vector<32x32xbf16>
    %320 = arith.truncf %317 : vector<32x256xf32> to vector<32x256xbf16>
    %cst_156 = arith.constant dense<0.000000e+00> : vector<32x256xf32>
    %321 = tpu.matmul %319, %320, %cst_156 {dimension_numbers = #tpu.dot_dimension_numbers<[1], [0], [0], [1], [0, 0, 1, 1], [], []>} : vector<32x32xbf16>, vector<32x256xbf16>, vector<32x256xf32> -> vector<32x256xf32>
    %322 = arith.addf %312, %321 : vector<32x256xf32>
    %c239_i32_157 = arith.constant 239 : i32
    %323 = tpu.dynamic_rotate %244 by %c239_i32_157 dim 1 : vector<32x256xf32>, i32 -> vector<32x256xf32>
    %cst_158 = arith.constant 0.000000e+00 : f32
    %324 = vector.shape_cast %153 : vector<1x256xi1> to vector<1x256xi1>
    %325 = vector.broadcast %324 : vector<1x256xi1> to vector<32x256xi1>
    %326 = vector.broadcast %cst_158 : f32 to vector<32x256xf32>
    %327 = arith.select %325, %323, %326 : vector<32x256xi1>, vector<32x256xf32>
    %c8_159 = arith.constant 8 : index
    %c0_160 = arith.constant 0 : index
    %c0_161 = arith.constant 0 : index
    %328 = vector.load %arg6[%c8_159, %c0_160, %c0_161] : memref<9x32x32xbf16, #tpu.memory_space<vmem>>, vector<1x32x32xbf16>
    %329 = vector.shape_cast %328 : vector<1x32x32xbf16> to vector<32x32xbf16>
    %330 = arith.truncf %327 : vector<32x256xf32> to vector<32x256xbf16>
    %cst_162 = arith.constant dense<0.000000e+00> : vector<32x256xf32>
    %331 = tpu.matmul %329, %330, %cst_162 {dimension_numbers = #tpu.dot_dimension_numbers<[1], [0], [0], [1], [0, 0, 1, 1], [], []>} : vector<32x32xbf16>, vector<32x256xbf16>, vector<32x256xf32> -> vector<32x256xf32>
    %332 = arith.addf %322, %331 : vector<32x256xf32>
    %c0_163 = arith.constant 0 : index
    %c0_164 = arith.constant 0 : index
    %333 = vector.load %arg7[%c0_163, %c0_164] : memref<32x1xf32, #tpu.memory_space<vmem>>, vector<32x1xf32>
    %334 = vector.broadcast %333 : vector<32x1xf32> to vector<32x256xf32>
    %335 = arith.addf %332, %334 : vector<32x256xf32>
    %cst_165 = arith.constant 0.000000e+00 : f32
    %336 = vector.broadcast %cst_165 : f32 to vector<32x256xf32>
    %337 = arith.maximumf %335, %336 : vector<32x256xf32>
    %c0_166 = arith.constant 0 : index
    %c0_167 = arith.constant 0 : index
    %338 = vector.load %arg8[%c0_166, %c0_167] : memref<3x32xbf16, #tpu.memory_space<vmem>>, vector<3x32xbf16>
    %339 = arith.truncf %337 : vector<32x256xf32> to vector<32x256xbf16>
    %cst_168 = arith.constant dense<0.000000e+00> : vector<3x256xf32>
    %340 = tpu.matmul %338, %339, %cst_168 {dimension_numbers = #tpu.dot_dimension_numbers<[1], [0], [0], [1], [0, 0, 1, 1], [], []>} : vector<3x32xbf16>, vector<32x256xbf16>, vector<3x256xf32> -> vector<3x256xf32>
    %c0_169 = arith.constant 0 : index
    %c0_170 = arith.constant 0 : index
    %341 = vector.load %arg9[%c0_169, %c0_170] : memref<3x1xf32, #tpu.memory_space<vmem>>, vector<3x1xf32>
    %342 = vector.broadcast %341 : vector<3x1xf32> to vector<3x256xf32>
    %343 = arith.addf %340, %342 : vector<3x256xf32>
    %cst_171 = arith.constant dense<0xFF800000> : vector<256xf32>
    %344 = vector.multi_reduction <maximumf>, %343, %cst_171 [0] : vector<3x256xf32> to vector<256xf32>
    %345 = vector.shape_cast %344 : vector<256xf32> to vector<1x256xf32>
    %c0_172 = arith.constant 0 : index
    %c0_173 = arith.constant 0 : index
    %c0_174 = arith.constant 0 : index
    %346 = vector.load %arg11[%c0_172, %c0_173, %c0_174] : memref<1x1x256xf32, #tpu.memory_space<vmem>>, vector<1x1x256xf32>
    %347 = vector.shape_cast %346 : vector<1x1x256xf32> to vector<1x256xf32>
    %348 = vector.shape_cast %345 : vector<1x256xf32> to vector<1x1x256xf32>
    tpu.vector_store %arg11[%c0_172, %c0_173, %c0_174], %348 {strides = array<i32>} : memref<1x1x256xf32, #tpu.memory_space<vmem>>, vector<1x1x256xf32>,
    return
  }
  func.func @transform_0(%arg0: i32) -> (i32, i32) {
    %c0_i32 = arith.constant 0 : i32
    %c0_i32_0 = arith.constant 0 : i32
    %c0_i32_1 = arith.constant 0 : i32
    return %c0_i32, %c0_i32_0 : i32, i32
  }
  func.func @transform_1(%arg0: i32) -> (i32, i32) {
    %c0_i32 = arith.constant 0 : i32
    %c0_i32_0 = arith.constant 0 : i32
    %c0_i32_1 = arith.constant 0 : i32
    return %c0_i32, %c0_i32_0 : i32, i32
  }
  func.func @transform_2(%arg0: i32) -> (i32, i32, i32) {
    %c0_i32 = arith.constant 0 : i32
    %c0_i32_0 = arith.constant 0 : i32
    %c0_i32_1 = arith.constant 0 : i32
    return %arg0, %c0_i32, %c0_i32_0 : i32, i32, i32
  }
  func.func @transform_3(%arg0: i32) -> (i32, i32, i32) {
    %c0_i32 = arith.constant 0 : i32
    %c0_i32_0 = arith.constant 0 : i32
    %c0_i32_1 = arith.constant 0 : i32
    %c0_i32_2 = arith.constant 0 : i32
    return %c0_i32, %c0_i32_0, %c0_i32_1 : i32, i32, i32
  }
  func.func @transform_4(%arg0: i32) -> (i32, i32) {
    %c0_i32 = arith.constant 0 : i32
    %c0_i32_0 = arith.constant 0 : i32
    %c0_i32_1 = arith.constant 0 : i32
    return %c0_i32, %c0_i32_0 : i32, i32
  }
  func.func @transform_5(%arg0: i32) -> (i32, i32, i32) {
    %c0_i32 = arith.constant 0 : i32
    %c0_i32_0 = arith.constant 0 : i32
    %c0_i32_1 = arith.constant 0 : i32
    %c0_i32_2 = arith.constant 0 : i32
    return %c0_i32, %c0_i32_0, %c0_i32_1 : i32, i32, i32
  }
  func.func @transform_6(%arg0: i32) -> (i32, i32) {
    %c0_i32 = arith.constant 0 : i32
    %c0_i32_0 = arith.constant 0 : i32
    %c0_i32_1 = arith.constant 0 : i32
    return %c0_i32, %c0_i32_0 : i32, i32
  }
  func.func @transform_7(%arg0: i32) -> (i32, i32) {
    %c0_i32 = arith.constant 0 : i32
    %c0_i32_0 = arith.constant 0 : i32
    %c0_i32_1 = arith.constant 0 : i32
    return %c0_i32, %c0_i32_0 : i32, i32
  }
  func.func @transform_8(%arg0: i32) -> (i32, i32) {
    %c0_i32 = arith.constant 0 : i32
    %c0_i32_0 = arith.constant 0 : i32
    %c0_i32_1 = arith.constant 0 : i32
    return %c0_i32, %c0_i32_0 : i32, i32
  }
  func.func @transform_9(%arg0: i32) -> (i32, i32, i32) {
    %c0_i32 = arith.constant 0 : i32
    %c0_i32_0 = arith.constant 0 : i32
    %c0_i32_1 = arith.constant 0 : i32
    return %arg0, %c0_i32, %c0_i32_0 : i32, i32, i32
  }
  func.func @transform_10(%arg0: i32) -> (i32, i32, i32) {
    %c0_i32 = arith.constant 0 : i32
    %c0_i32_0 = arith.constant 0 : i32
    %c0_i32_1 = arith.constant 0 : i32
    return %arg0, %c0_i32, %c0_i32_0 : i32, i32, i32
  }
}

module attributes {stable_mosaic.version = 11 : i64} {
  func.func @_roi_head_kernel(%arg0: i32, %arg1: memref<1x256xf32, #tpu.memory_space<vmem>>, %arg2: memref<1x256xf32, #tpu.memory_space<vmem>>, %arg3: memref<1x32x256xbf16, #tpu.memory_space<vmem>>, %arg4: memref<1x8x4xf32, #tpu.memory_space<vmem>>, %arg5: memref<32x64xbf16, #tpu.memory_space<vmem>>, %arg6: memref<1x64xf32, #tpu.memory_space<vmem>>, %arg7: memref<32x32xbf16, #tpu.memory_space<vmem>>, %arg8: memref<1x32xf32, #tpu.memory_space<vmem>>, %arg9: memref<64x25xbf16, #tpu.memory_space<vmem>>, %arg10: memref<1x25xf32, #tpu.memory_space<vmem>>, %arg11: memref<32x32xbf16, #tpu.memory_space<vmem>>, %arg12: memref<1x32xf32, #tpu.memory_space<vmem>>, %arg13: memref<32x3xbf16, #tpu.memory_space<vmem>>, %arg14: memref<1x3xf32, #tpu.memory_space<vmem>>, %arg15: memref<1x8x25xf32, #tpu.memory_space<vmem>>, %arg16: memref<1x1x3xf32, #tpu.memory_space<vmem>>) attributes {dimension_semantics = [#tpu.dimension_semantics<parallel>], iteration_bounds = array<i64: 2>, scalar_prefetch = 0 : i64, scratch_operands = 0 : i64, tpu.core_type = #tpu.core_type<tc>, window_params = [{pipeline_mode = #tpu.pipeline_mode<synchronous>, transform_indices = @transform_0, window_bounds = array<i64: 1, 256>}, {pipeline_mode = #tpu.pipeline_mode<synchronous>, transform_indices = @transform_1, window_bounds = array<i64: 1, 256>}, {transform_indices = @transform_2, window_bounds = array<i64: 1, 32, 256>}, {transform_indices = @transform_3, window_bounds = array<i64: 1, 8, 4>}, {pipeline_mode = #tpu.pipeline_mode<synchronous>, transform_indices = @transform_4, window_bounds = array<i64: 32, 64>}, {pipeline_mode = #tpu.pipeline_mode<synchronous>, transform_indices = @transform_5, window_bounds = array<i64: 1, 64>}, {pipeline_mode = #tpu.pipeline_mode<synchronous>, transform_indices = @transform_6, window_bounds = array<i64: 32, 32>}, {pipeline_mode = #tpu.pipeline_mode<synchronous>, transform_indices = @transform_7, window_bounds = array<i64: 1, 32>}, {pipeline_mode = #tpu.pipeline_mode<synchronous>, transform_indices = @transform_8, window_bounds = array<i64: 64, 25>}, {pipeline_mode = #tpu.pipeline_mode<synchronous>, transform_indices = @transform_9, window_bounds = array<i64: 1, 25>}, {pipeline_mode = #tpu.pipeline_mode<synchronous>, transform_indices = @transform_10, window_bounds = array<i64: 32, 32>}, {pipeline_mode = #tpu.pipeline_mode<synchronous>, transform_indices = @transform_11, window_bounds = array<i64: 1, 32>}, {pipeline_mode = #tpu.pipeline_mode<synchronous>, transform_indices = @transform_12, window_bounds = array<i64: 32, 3>}, {pipeline_mode = #tpu.pipeline_mode<synchronous>, transform_indices = @transform_13, window_bounds = array<i64: 1, 3>}, {transform_indices = @transform_14, window_bounds = array<i64: 1, 8, 25>}, {transform_indices = @transform_15, window_bounds = array<i64: 1, 1, 3>}]} {
    %c0 = arith.constant 0 : index
    %c0_0 = arith.constant 0 : index
    %0 = vector.load %arg1[%c0, %c0_0] : memref<1x256xf32, #tpu.memory_space<vmem>>, vector<1x256xf32>
    %c0_1 = arith.constant 0 : index
    %c0_2 = arith.constant 0 : index
    %1 = vector.load %arg2[%c0_1, %c0_2] : memref<1x256xf32, #tpu.memory_space<vmem>>, vector<1x256xf32>
    %c0_3 = arith.constant 0 : index
    %c0_4 = arith.constant 0 : index
    %c0_5 = arith.constant 0 : index
    %2 = vector.load %arg4[%c0_3, %c0_4, %c0_5] : memref<1x8x4xf32, #tpu.memory_space<vmem>>, vector<1x8x4xf32>
    %3 = vector.shape_cast %2 : vector<1x8x4xf32> to vector<8x4xf32>
    %4 = vector.extract_strided_slice %3 {offsets = [0, 0], sizes = [8, 1], strides = [1, 1]} : vector<8x4xf32> to vector<8x1xf32>
    %5 = vector.extract_strided_slice %3 {offsets = [0, 1], sizes = [8, 1], strides = [1, 1]} : vector<8x4xf32> to vector<8x1xf32>
    %6 = vector.extract_strided_slice %3 {offsets = [0, 2], sizes = [8, 1], strides = [1, 1]} : vector<8x4xf32> to vector<8x1xf32>
    %7 = vector.extract_strided_slice %3 {offsets = [0, 3], sizes = [8, 1], strides = [1, 1]} : vector<8x4xf32> to vector<8x1xf32>
    %8 = vector.broadcast %0 : vector<1x256xf32> to vector<8x256xf32>
    %9 = vector.broadcast %4 : vector<8x1xf32> to vector<8x256xf32>
    %10 = arith.cmpf oge, %8, %9 : vector<8x256xf32>
    %11 = vector.broadcast %0 : vector<1x256xf32> to vector<8x256xf32>
    %12 = vector.broadcast %6 : vector<8x1xf32> to vector<8x256xf32>
    %13 = arith.cmpf ole, %11, %12 : vector<8x256xf32>
    %14 = arith.andi %10, %13 : vector<8x256xi1>
    %15 = vector.broadcast %1 : vector<1x256xf32> to vector<8x256xf32>
    %16 = vector.broadcast %5 : vector<8x1xf32> to vector<8x256xf32>
    %17 = arith.cmpf oge, %15, %16 : vector<8x256xf32>
    %18 = arith.andi %14, %17 : vector<8x256xi1>
    %19 = vector.broadcast %1 : vector<1x256xf32> to vector<8x256xf32>
    %20 = vector.broadcast %7 : vector<8x1xf32> to vector<8x256xf32>
    %21 = arith.cmpf ole, %19, %20 : vector<8x256xf32>
    %22 = arith.andi %18, %21 : vector<8x256xi1>
    %23 = arith.extui %22 : vector<8x256xi1> to vector<8x256xi32>
    %24 = arith.sitofp %23 : vector<8x256xi32> to vector<8x256xf32>
    %25 = arith.truncf %24 : vector<8x256xf32> to vector<8x256xbf16>
    %c0_6 = arith.constant 0 : index
    %c0_7 = arith.constant 0 : index
    %c0_8 = arith.constant 0 : index
    %26 = vector.load %arg3[%c0_6, %c0_7, %c0_8] : memref<1x32x256xbf16, #tpu.memory_space<vmem>>, vector<1x32x256xbf16>
    %27 = vector.shape_cast %26 : vector<1x32x256xbf16> to vector<32x256xbf16>
    %cst = arith.constant dense<0.000000e+00> : vector<8x32xf32>
    %28 = tpu.matmul %25, %27, %cst {dimension_numbers = #tpu.dot_dimension_numbers<[1], [1], [0], [0], [0, 0, 1, 0], [], []>} : vector<8x256xbf16>, vector<32x256xbf16>, vector<8x32xf32> -> vector<8x32xf32>
    %29 = arith.subf %6, %4 : vector<8x1xf32>
    %cst_9 = arith.constant 1.000000e+00 : f32
    %30 = vector.broadcast %cst_9 : f32 to vector<8x1xf32>
    %31 = arith.addf %29, %30 : vector<8x1xf32>
    %32 = arith.subf %7, %5 : vector<8x1xf32>
    %cst_10 = arith.constant 1.000000e+00 : f32
    %33 = vector.broadcast %cst_10 : f32 to vector<8x1xf32>
    %34 = arith.addf %32, %33 : vector<8x1xf32>
    %35 = arith.mulf %31, %34 : vector<8x1xf32>
    %cst_11 = arith.constant 1.000000e+00 : f32
    %36 = vector.broadcast %cst_11 : f32 to vector<8x1xf32>
    %37 = arith.maximumf %35, %36 : vector<8x1xf32>
    %38 = vector.broadcast %37 : vector<8x1xf32> to vector<8x32xf32>
    %39 = arith.divf %28, %38 : vector<8x32xf32>
    %40 = arith.truncf %39 : vector<8x32xf32> to vector<8x32xbf16>
    %c0_12 = arith.constant 0 : index
    %c0_13 = arith.constant 0 : index
    %41 = vector.load %arg5[%c0_12, %c0_13] : memref<32x64xbf16, #tpu.memory_space<vmem>>, vector<32x64xbf16>
    %cst_14 = arith.constant dense<0.000000e+00> : vector<8x64xf32>
    %42 = tpu.matmul %40, %41, %cst_14 {dimension_numbers = #tpu.dot_dimension_numbers<[1], [0], [0], [1], [0, 0, 1, 1], [], []>} : vector<8x32xbf16>, vector<32x64xbf16>, vector<8x64xf32> -> vector<8x64xf32>
    %c0_15 = arith.constant 0 : index
    %c0_16 = arith.constant 0 : index
    %43 = vector.load %arg6[%c0_15, %c0_16] : memref<1x64xf32, #tpu.memory_space<vmem>>, vector<1x64xf32>
    %44 = vector.broadcast %43 : vector<1x64xf32> to vector<8x64xf32>
    %45 = arith.addf %42, %44 : vector<8x64xf32>
    %cst_17 = arith.constant 0.000000e+00 : f32
    %46 = vector.broadcast %cst_17 : f32 to vector<8x64xf32>
    %47 = arith.maximumf %45, %46 : vector<8x64xf32>
    %c0_18 = arith.constant 0 : index
    %c0_19 = arith.constant 0 : index
    %48 = vector.load %arg7[%c0_18, %c0_19] : memref<32x32xbf16, #tpu.memory_space<vmem>>, vector<32x32xbf16>
    %cst_20 = arith.constant dense<0.000000e+00> : vector<8x32xf32>
    %49 = tpu.matmul %40, %48, %cst_20 {dimension_numbers = #tpu.dot_dimension_numbers<[1], [0], [0], [1], [0, 0, 1, 1], [], []>} : vector<8x32xbf16>, vector<32x32xbf16>, vector<8x32xf32> -> vector<8x32xf32>
    %c0_21 = arith.constant 0 : index
    %c0_22 = arith.constant 0 : index
    %50 = vector.load %arg8[%c0_21, %c0_22] : memref<1x32xf32, #tpu.memory_space<vmem>>, vector<1x32xf32>
    %51 = vector.broadcast %50 : vector<1x32xf32> to vector<8x32xf32>
    %52 = arith.addf %49, %51 : vector<8x32xf32>
    %cst_23 = arith.constant 0.000000e+00 : f32
    %53 = vector.broadcast %cst_23 : f32 to vector<8x32xf32>
    %54 = arith.maximumf %52, %53 : vector<8x32xf32>
    %55 = arith.truncf %47 : vector<8x64xf32> to vector<8x64xbf16>
    %c0_24 = arith.constant 0 : index
    %c0_25 = arith.constant 0 : index
    %56 = vector.load %arg9[%c0_24, %c0_25] : memref<64x25xbf16, #tpu.memory_space<vmem>>, vector<64x25xbf16>
    %cst_26 = arith.constant dense<0.000000e+00> : vector<8x25xf32>
    %57 = tpu.matmul %55, %56, %cst_26 {dimension_numbers = #tpu.dot_dimension_numbers<[1], [0], [0], [1], [0, 0, 1, 1], [], []>} : vector<8x64xbf16>, vector<64x25xbf16>, vector<8x25xf32> -> vector<8x25xf32>
    %c0_27 = arith.constant 0 : index
    %c0_28 = arith.constant 0 : index
    %58 = vector.load %arg10[%c0_27, %c0_28] : memref<1x25xf32, #tpu.memory_space<vmem>>, vector<1x25xf32>
    %59 = vector.broadcast %58 : vector<1x25xf32> to vector<8x25xf32>
    %60 = arith.addf %57, %59 : vector<8x25xf32>
    %c0_29 = arith.constant 0 : index
    %c0_30 = arith.constant 0 : index
    %c0_31 = arith.constant 0 : index
    %61 = vector.load %arg15[%c0_29, %c0_30, %c0_31] : memref<1x8x25xf32, #tpu.memory_space<vmem>>, vector<1x8x25xf32>
    %62 = vector.shape_cast %61 : vector<1x8x25xf32> to vector<8x25xf32>
    %63 = vector.shape_cast %60 : vector<8x25xf32> to vector<1x8x25xf32>
    tpu.vector_store %arg15[%c0_29, %c0_30, %c0_31], %63 {strides = array<i32>} : memref<1x8x25xf32, #tpu.memory_space<vmem>>, vector<1x8x25xf32>,
    %64 = arith.truncf %54 : vector<8x32xf32> to vector<8x32xbf16>
    %cst_32 = arith.constant dense<0.000000e+00> : vector<8x8xf32>
    %65 = tpu.matmul %64, %64, %cst_32 {dimension_numbers = #tpu.dot_dimension_numbers<[1], [1], [0], [0], [0, 0, 1, 0], [], []>} : vector<8x32xbf16>, vector<8x32xbf16>, vector<8x8xf32> -> vector<8x8xf32>
    %cst_33 = arith.constant 0.176776692 : f32
    %66 = vector.broadcast %cst_33 : f32 to vector<8x8xf32>
    %67 = arith.mulf %65, %66 : vector<8x8xf32>
    %cst_34 = arith.constant dense<0xFF800000> : vector<8xf32>
    %68 = vector.multi_reduction <maximumf>, %67, %cst_34 [1] : vector<8x8xf32> to vector<8xf32>
    %69 = vector.shape_cast %68 : vector<8xf32> to vector<8x1xf32>
    %70 = vector.broadcast %69 : vector<8x1xf32> to vector<8x8xf32>
    %71 = arith.subf %67, %70 : vector<8x8xf32>
    %72 = math.exp %71 : vector<8x8xf32>
    %cst_35 = arith.constant dense<0.000000e+00> : vector<8xf32>
    %73 = vector.multi_reduction <add>, %72, %cst_35 [1] : vector<8x8xf32> to vector<8xf32>
    %74 = vector.shape_cast %73 : vector<8xf32> to vector<8x1xf32>
    %75 = tpu.reciprocal %74 {approx = true} : vector<8x1xf32> -> vector<8x1xf32>
    %76 = vector.broadcast %75 : vector<8x1xf32> to vector<8x8xf32>
    %77 = arith.mulf %72, %76 : vector<8x8xf32>
    %78 = arith.truncf %77 : vector<8x8xf32> to vector<8x8xbf16>
    %cst_36 = arith.constant dense<0.000000e+00> : vector<8x32xf32>
    %79 = tpu.matmul %78, %64, %cst_36 {dimension_numbers = #tpu.dot_dimension_numbers<[1], [0], [0], [1], [0, 0, 1, 1], [], []>} : vector<8x8xbf16>, vector<8x32xbf16>, vector<8x32xf32> -> vector<8x32xf32>
    %cst_37 = arith.constant dense<0.000000e+00> : vector<32xf32>
    %80 = vector.multi_reduction <add>, %79, %cst_37 [0] : vector<8x32xf32> to vector<32xf32>
    %81 = vector.shape_cast %80 : vector<32xf32> to vector<1x32xf32>
    %cst_38 = arith.constant 1.250000e-01 : f32
    %82 = vector.broadcast %cst_38 : f32 to vector<1x32xf32>
    %83 = arith.mulf %81, %82 : vector<1x32xf32>
    %84 = arith.truncf %83 : vector<1x32xf32> to vector<1x32xbf16>
    %c0_39 = arith.constant 0 : index
    %c0_40 = arith.constant 0 : index
    %85 = vector.load %arg11[%c0_39, %c0_40] : memref<32x32xbf16, #tpu.memory_space<vmem>>, vector<32x32xbf16>
    %cst_41 = arith.constant dense<0.000000e+00> : vector<1x32xf32>
    %86 = tpu.matmul %84, %85, %cst_41 {dimension_numbers = #tpu.dot_dimension_numbers<[1], [0], [0], [1], [0, 0, 1, 1], [], []>} : vector<1x32xbf16>, vector<32x32xbf16>, vector<1x32xf32> -> vector<1x32xf32>
    %c0_42 = arith.constant 0 : index
    %c0_43 = arith.constant 0 : index
    %87 = vector.load %arg12[%c0_42, %c0_43] : memref<1x32xf32, #tpu.memory_space<vmem>>, vector<1x32xf32>
    %88 = arith.addf %86, %87 : vector<1x32xf32>
    %89 = arith.truncf %88 : vector<1x32xf32> to vector<1x32xbf16>
    %c0_44 = arith.constant 0 : index
    %c0_45 = arith.constant 0 : index
    %90 = vector.load %arg13[%c0_44, %c0_45] : memref<32x3xbf16, #tpu.memory_space<vmem>>, vector<32x3xbf16>
    %cst_46 = arith.constant dense<0.000000e+00> : vector<1x3xf32>
    %91 = tpu.matmul %89, %90, %cst_46 {dimension_numbers = #tpu.dot_dimension_numbers<[1], [0], [0], [1], [0, 0, 1, 1], [], []>} : vector<1x32xbf16>, vector<32x3xbf16>, vector<1x3xf32> -> vector<1x3xf32>
    %c0_47 = arith.constant 0 : index
    %c0_48 = arith.constant 0 : index
    %92 = vector.load %arg14[%c0_47, %c0_48] : memref<1x3xf32, #tpu.memory_space<vmem>>, vector<1x3xf32>
    %93 = arith.addf %91, %92 : vector<1x3xf32>
    %c0_49 = arith.constant 0 : index
    %c0_50 = arith.constant 0 : index
    %c0_51 = arith.constant 0 : index
    %94 = vector.load %arg16[%c0_49, %c0_50, %c0_51] : memref<1x1x3xf32, #tpu.memory_space<vmem>>, vector<1x1x3xf32>
    %95 = vector.shape_cast %94 : vector<1x1x3xf32> to vector<1x3xf32>
    %96 = vector.shape_cast %93 : vector<1x3xf32> to vector<1x1x3xf32>
    tpu.vector_store %arg16[%c0_49, %c0_50, %c0_51], %96 {strides = array<i32>} : memref<1x1x3xf32, #tpu.memory_space<vmem>>, vector<1x1x3xf32>,
    return
  }
  func.func @transform_0(%arg0: i32) -> (i32, i32) {
    %c0_i32 = arith.constant 0 : i32
    %c0_i32_0 = arith.constant 0 : i32
    %c0_i32_1 = arith.constant 0 : i32
    return %c0_i32, %c0_i32_0 : i32, i32
  }
  func.func @transform_1(%arg0: i32) -> (i32, i32) {
    %c0_i32 = arith.constant 0 : i32
    %c0_i32_0 = arith.constant 0 : i32
    %c0_i32_1 = arith.constant 0 : i32
    return %c0_i32, %c0_i32_0 : i32, i32
  }
  func.func @transform_2(%arg0: i32) -> (i32, i32, i32) {
    %c0_i32 = arith.constant 0 : i32
    %c0_i32_0 = arith.constant 0 : i32
    %c0_i32_1 = arith.constant 0 : i32
    return %arg0, %c0_i32, %c0_i32_0 : i32, i32, i32
  }
  func.func @transform_3(%arg0: i32) -> (i32, i32, i32) {
    %c0_i32 = arith.constant 0 : i32
    %c0_i32_0 = arith.constant 0 : i32
    %c0_i32_1 = arith.constant 0 : i32
    return %arg0, %c0_i32, %c0_i32_0 : i32, i32, i32
  }
  func.func @transform_4(%arg0: i32) -> (i32, i32) {
    %c0_i32 = arith.constant 0 : i32
    %c0_i32_0 = arith.constant 0 : i32
    %c0_i32_1 = arith.constant 0 : i32
    return %c0_i32, %c0_i32_0 : i32, i32
  }
  func.func @transform_5(%arg0: i32) -> (i32, i32) {
    %c0_i32 = arith.constant 0 : i32
    %c0_i32_0 = arith.constant 0 : i32
    %c0_i32_1 = arith.constant 0 : i32
    return %c0_i32, %c0_i32_0 : i32, i32
  }
  func.func @transform_6(%arg0: i32) -> (i32, i32) {
    %c0_i32 = arith.constant 0 : i32
    %c0_i32_0 = arith.constant 0 : i32
    %c0_i32_1 = arith.constant 0 : i32
    return %c0_i32, %c0_i32_0 : i32, i32
  }
  func.func @transform_7(%arg0: i32) -> (i32, i32) {
    %c0_i32 = arith.constant 0 : i32
    %c0_i32_0 = arith.constant 0 : i32
    %c0_i32_1 = arith.constant 0 : i32
    return %c0_i32, %c0_i32_0 : i32, i32
  }
  func.func @transform_8(%arg0: i32) -> (i32, i32) {
    %c0_i32 = arith.constant 0 : i32
    %c0_i32_0 = arith.constant 0 : i32
    %c0_i32_1 = arith.constant 0 : i32
    return %c0_i32, %c0_i32_0 : i32, i32
  }
  func.func @transform_9(%arg0: i32) -> (i32, i32) {
    %c0_i32 = arith.constant 0 : i32
    %c0_i32_0 = arith.constant 0 : i32
    %c0_i32_1 = arith.constant 0 : i32
    return %c0_i32, %c0_i32_0 : i32, i32
  }
  func.func @transform_10(%arg0: i32) -> (i32, i32) {
    %c0_i32 = arith.constant 0 : i32
    %c0_i32_0 = arith.constant 0 : i32
    %c0_i32_1 = arith.constant 0 : i32
    return %c0_i32, %c0_i32_0 : i32, i32
  }
  func.func @transform_11(%arg0: i32) -> (i32, i32) {
    %c0_i32 = arith.constant 0 : i32
    %c0_i32_0 = arith.constant 0 : i32
    %c0_i32_1 = arith.constant 0 : i32
    return %c0_i32, %c0_i32_0 : i32, i32
  }
  func.func @transform_12(%arg0: i32) -> (i32, i32) {
    %c0_i32 = arith.constant 0 : i32
    %c0_i32_0 = arith.constant 0 : i32
    %c0_i32_1 = arith.constant 0 : i32
    return %c0_i32, %c0_i32_0 : i32, i32
  }
  func.func @transform_13(%arg0: i32) -> (i32, i32) {
    %c0_i32 = arith.constant 0 : i32
    %c0_i32_0 = arith.constant 0 : i32
    %c0_i32_1 = arith.constant 0 : i32
    return %c0_i32, %c0_i32_0 : i32, i32
  }
  func.func @transform_14(%arg0: i32) -> (i32, i32, i32) {
    %c0_i32 = arith.constant 0 : i32
    %c0_i32_0 = arith.constant 0 : i32
    %c0_i32_1 = arith.constant 0 : i32
    return %arg0, %c0_i32, %c0_i32_0 : i32, i32, i32
  }
  func.func @transform_15(%arg0: i32) -> (i32, i32, i32) {
    %c0_i32 = arith.constant 0 : i32
    %c0_i32_0 = arith.constant 0 : i32
    %c0_i32_1 = arith.constant 0 : i32
    return %arg0, %c0_i32, %c0_i32_0 : i32, i32, i32
  }
}

</mosaic_0001>

<bundles_post_ra>
// kernel: generalized_rcnn_affinity_forward.3
= control target key start
LH: loop header
LB: loop body
LE: loop exit
PB: predicated region body
PF: predicated region fallthrough
CT: control target
= control target key end

     0   :  { %s1227_s18 = smov 0   ;;  %s1332_s0 = inlined_call_operand.vmem [shape: f32[1,256], index: 0, kind: input, shape index: {}]   ;;  %s1333_s1 = inlined_call_operand.vmem [shape: f32[1,256], index: 1, kind: input, shape index: {}]   ;;  %s1334_s2 = inlined_call_operand.vmem [shape: bf16[2,32,256], index: 2, kind: input, shape index: {}]   ;;  %s1335_s3 = inlined_call_operand.vmem [shape: f32[2,8,4], index: 3, kind: input, shape index: {}]   ;;  %s1336_s4 = inlined_call_operand.vmem [shape: bf16[32,64], index: 4, kind: input, shape index: {}]   ;;  %s1337_s5 = inlined_call_operand.vmem [shape: f32[1,64], index: 5, kind: input, shape index: {}]   ;;  %s1338_s6 = inlined_call_operand.vmem [shape: bf16[32,32], index: 6, kind: input, shape index: {}]   ;;  %s1339_s7 = inlined_call_operand.vmem [shape: f32[1,32], index: 7, kind: input, shape index: {}]   ;;  %s1340_s8 = inlined_call_operand.vmem [shape: bf16[64,25], index: 8, kind: input, shape index: {}]   ;;  %s1341_s9 = inlined_call_operand.vmem [shape: f32[1,25], index: 9, kind: input, shape index: {}]   ;;  %s1342_s10 = inlined_call_operand.vmem [shape: bf16[32,32], index: 10, kind: input, shape index: {}]   ;;  %s1343_s11 = inlined_call_operand.vmem [shape: f32[1,32], index: 11, kind: input, shape index: {}]   ;;  %s1344_s12 = inlined_call_operand.vmem [shape: bf16[32,3], index: 12, kind: input, shape index: {}]   ;;  %s1345_s13 = inlined_call_operand.vmem [shape: f32[1,3], index: 13, kind: input, shape index: {}]   ;;  %s1346_s14 = inlined_call_operand.vmem [shape: f32[2,8,25], index: 14, kind: output, shape index: {0}]   ;;  %s1347_s15 = inlined_call_operand.vmem [shape: f32[2,1,3], index: 15, kind: output, shape index: {1}]  }
   0x1 LB: > { %s998_s19 = sadd.s32 4294967295, %s1138_s18   ;;  %p1002_p0 = scmp.ge.s32.totalorder %s1138_s18, 1  ;;  %s1138_s18 = sphi %s1227_s18, %s26_s18  }
   0x2   : > { %p449_p1 = scmp.lt.s32.totalorder %s1138_s18, 3 }
   0x4   : > { %p450_p2 = pnand %p1002_p0, %p449_p1 }
   0x5   : > { %p503_p3 = scmp.lt.s32.totalorder (!%p450_p2), %s998_s19, 1  ;;  %s1142_s24 = smov (!%p450_p2), 2  }
   0x6   : > { %453 = sbr.rel (%p450_p2) target bundleno = 1290 (0x50a), region = 76  ;;  %s1145_s29 = smov (!%p450_p2), 127  }
   0xb   : > { %v1140_v0 = vmov 0   ;;  %v1141_v1 = vmov 1   ;;  %s1351_s19 = smov (!%p503_p3, %s998_s19), 1  ;;  %v1143_v3 = vmov 2   ;;  %v1144_v4 = vmov 3   ;;  %v1092_v39 = vld [vmem:[%s1336_s4 + $0x8] sm:$0xff] }
   0xc   : > { %1118 = vset.pattern.permute.xlu0 %v1140_v0  ;;  %1120 = vset.pattern.permute.xlu1 %v1141_v1  ;;  %s1005_s20 = sshll.u32 %s1351_s19, 3  ;;  %s1086_s25 = sshll.u32 %s1351_s19, 5  ;;  %v520_v21 = vld [vmem:[%s1332_s0] sm:$0x3]  ;;  %v1146_v31 = vmov 1.0|1.0  }
   0xd   : > { %s511_s23 = scalar_lea.vmem %s1335_s3, %s1005_s20  ;;  %s507_s28 = scalar_lea.vmem %s1334_s2, %s1086_s25  ;;  %v521_v23 = vld [vmem:[%s1333_s1] sm:$0x3]  ;;  %v524_v24 = vperm.slane %v520_v21, 0  ;;  %v525_v25 = vperm.slane %v520_v21, 1  ;;  %v1094_v40 = vld [vmem:[%s1338_s6 + $0x8] sm:$0xff]  ;;  %682 = vmatpush.bf16.msra.mxu2 %v1092_v39  ;;  %v1098_v43 = vld [vmem:[%s1340_s8 + $0x18] sm:$0xff] }
   0xe   : > { %v522_v2 = vld [vmem:[%s511_s23] sm:$0xff]  ;;  %v1019_v5 = vld [vmem:[%s507_s28 + $0x10] sm:$0xf]  ;;  %v1090_v6 = vld [vmem:[%s507_s28 + $0x14] sm:$0xf0]  ;;  %v544_v26 = vperm.slane %v521_v23, 0  ;;  %716 = vmatpush.bf16.msra.mxu3 %v1094_v40  ;;  %s515_s22 = scalar_lea.vmem %s1346_s14, %s1005_s20  ;;  %s518_s23 = scalar_lea.vmem %s1347_s15, %s1351_s19 }
   0xf   : > { %620 = vrot.lane.b32.xlu2 %v522_v2, %s1142_s24  ;;  %530 = vperm.xlu0 %1118, %v522_v2   ;;  %v1089_v7 = vld [vmem:[%s507_s28 + $0x14] sm:$0xf]  ;;  %v1020_v8 = vor.u32 %v1090_v6, %v1019_v5  ;;  %v1021_v9 = vld [vmem:[%s507_s28 + $0x18] sm:$0xf0]  ;;  %v1011_v11 = vld [vmem:[%s507_s28] sm:$0xf] }
  0x10   : > { %549 = vperm.xlu1 %1120, %v522_v2   ;;  %v1024_v10 = vor.u32 %v1089_v7, %v1021_v9  ;;  %v1088_v12 = vld [vmem:[%s507_s28 + $0x4] sm:$0xf0]  ;;  %v1087_v14 = vld [vmem:[%s507_s28 + $0x4] sm:$0xf]  ;;  %v1013_v15 = vld [vmem:[%s507_s28 + $0x8] sm:$0xf0] }
  0x11   : > { %600 = vmatpush.bf16.xpose.msra.mxu0 %v1020_v8  ;;  %v1012_v13 = vor.u32 %v1088_v12, %v1011_v11  ;;  %v1016_v16 = vor.u32 %v1087_v14, %v1013_v15  ;;  %v545_v28 = vperm.slane %v521_v23, 1  ;;  %v1091_v41 = vld [vmem:[%s1336_s4] sm:$0xff]  ;;  %v1097_v44 = vld [vmem:[%s1340_s8 + $0x10] sm:$0xff]  ;;  %v1096_v59 = vld [vmem:[%s1340_s8 + $0x8] sm:$0xff] }
  0x12   : > { %613 = vmatpush.bf16.xpose.msra.mxu1 %v1024_v10  ;;  %v1093_v42 = vld [vmem:[%s1338_s6] sm:$0xff]  ;;  %683 = vmatpush.bf16.msra.mxu2 %v1091_v41 }
  0x13   : > { %717 = vmatpush.bf16.msra.mxu3 %v1093_v42  ;;  %v1095_v60 = vld [vmem:[%s1340_s8] sm:$0xff] }
  0x14   : > { %v1123_v61 = vld [vmem:[%s1337_s5] ss:$0 sm:$0xff] }
  0x15   : > { %v1124_v62 = vld [vmem:[%s1339_s7] ss:$0 sm:$0xff] }
  0x16   : > { %769 = vmatpush.bf16.msrb.mxu2 %v1098_v43  ;;  %v1125_v11 = vld [vmem:[%s1341_s9] ss:$0 sm:$0xff] }
  0x17   : > { %1119 = vset.pattern.permute.xlu0 %v1143_v3  ;;  %v1101_v42 = vld [vmem:[%s1344_s12] sm:$0xff] }
  0x18   : > { %536 = vperm.xlu0 %1119, %v522_v2   ;;  %1121 = vset.pattern.permute.xlu1 %v1144_v4  ;;  %v843_v43 = vld [vmem:[%s1343_s11] sm:$0x1] }
  0x19   : > { %557 = vperm.xlu1 %1121, %v522_v2   ;;  %601 = vmatpush.bf16.xpose.msra.mxu0 %v1012_v13 }
  0x1a   : > { %614 = vmatpush.bf16.xpose.msra.mxu1 %v1016_v16  ;;  %770 = vmatpush.bf16.msrb.mxu2 %v1097_v44 }
  0x1e   : > { %771 = vmatpush.bf16.msrb.mxu2 %v1096_v59 }
  0x21   : > { %1122 = vset.pattern.permute.xlu1 %v1143_v3 }
  0x22   : > { %772 = vmatpush.bf16.msrb.mxu2 %v1095_v60 }
  0x69   : > { %v621_v17 = vpop.permute.xlu2 %620 }
  0x6a   : > { %v623_v18 = vsub.f32 %v522_v2, %v621_v17 }
  0x6c   : > { %v624_v19 = vadd.f32 1.0, %v623_v18 }
  0x6e   : > { %626 = vrot.lane.b32.xlu2 %v624_v19, %s1145_s29 }
  0x81   : > { %v531_v20 = vpop.permute.xlu0 %530 }
  0x82   : > { %v550_v22 = vpop.permute.xlu1 %549  ;;  %vm533_vm0 = vcmp.ge.f32.partialorder %v524_v24, %v531_v20  ;;  %vm1253_vm1 = vcmp.ge.f32.partialorder %v525_v25, %v531_v20 }
  0x83   : > { %vm552_vm2 = vcmp.ge.f32.partialorder %v544_v26, %v550_v22  ;;  %vm553_vm8 = vcmp.ge.f32.partialorder %v545_v28, %v550_v22 }
  0x8a   : > { %v537_v29 = vpop.permute.xlu0 %536 }
  0x8b   : > { %vm539_vm3 = vcmp.le.f32.partialorder %v524_v24, %v537_v29  ;;  %vm540_vm4 = vcmp.le.f32.partialorder %v525_v25, %v537_v29  ;;  %v558_v30 = vpop.permute.xlu1 %557  ;;  %v1099_v29 = vld [vmem:[%s1342_s10] sm:$0xff] }
  0x8c   : > { %vm541_vm5 = vmand %vm533_vm0, %vm539_vm3  ;;  %vm560_vm6 = vcmp.le.f32.partialorder %v544_v26, %v558_v30  ;;  %vm561_vm10 = vcmp.le.f32.partialorder %v545_v28, %v558_v30  ;;  %v1100_v28 = vld [vmem:[%s1342_s10 + $0x8] sm:$0xff] }
  0x8d   : > { %vm542_vm7 = vmand %vm1253_vm1, %vm540_vm4  ;;  %vm672_vm4 = vcmask 261120   ;;  %865 = vmatpush.bf16.msrb.mxu1 %v1100_v28  ;;  %v1102_v30 = vld [vmem:[%s1344_s12 + $0x8] sm:$0xff] }
  0x8e   : > { %vm554_vm9 = vmand %vm541_vm5, %vm552_vm2  ;;  %vm761_vm5 = vcmask 523264  }
  0x8f   : > { %vm562_vm11 = vmand %vm554_vm9, %vm560_vm6  ;;  %vm814_vm6 = vcmask 1043456   ;;  %vm906_vm9 = vcmask 16384  }
  0x90   : > { %vm1025_vm12 = vmpackc.low %vm562_vm11, %vm562_vm11 }
  0x91   : > { %1026 = vmatmul.msk.bf16.vlgmr.msra.gmra.mxu0 %vm1025_vm12, %v1146_v31  ;;  %vm555_vm13 = vmand %vm542_vm7, %vm553_vm8  ;;  %vm778_vm7 = vcmask 203776   ;;  %vm798_vm8 = vcmask 64512   ;;  %866 = vmatpush.bf16.msrb.mxu1 %v1099_v29 }
  0x92   : > { %vm563_vm14 = vmand %vm555_vm13, %vm561_vm10 }
  0x93   : > { %vm1027_vm15 = vmpackc.low %vm563_vm14, %vm563_vm14 }
  0x94   : > { %1028 = vmatmul.msk.bf16.vlgmr.msra.gmra.mxu1 %vm1027_vm15, %v1146_v31 }
  0xc8   : > { %v627_v32 = vpop.permute.xlu2 %626 }
  0xc9   : > { %v629_v33 = vmul.f32 %v627_v32, %v624_v19 }
  0xcb   : > { %v630_v34 = vmax.f32 %v629_v33, 1.0 }
  0xcd   : > { %633 = vperm.xlu1 %1122, %v630_v34  }
 0x10e   : > { %v603_v35 = vpop.f32.mrf.mxu0 }
 0x111   : > { %v616_v36 = vpop.f32.mrf.mxu1 }
 0x112   : > { %v617_v54 = vadd.f32 %v616_v36, %v603_v35 }
 0x116   : > { %v605_v37 = vpop.f32.mrf.mxu0 }
 0x119   : > { %v618_v38 = vpop.f32.mrf.mxu1 }
 0x13f   : > { %v634_v45 = vpop.permute.xlu1 %633 }
 0x140   : > { %1126 = vrcp.f32 %v634_v45  ;;  %v647_v49 = vand.u32 2147483648, %v634_v45  ;;  %v645_v51 = vand.u32 2147483647, %v634_v45  ;;  %vm641_vm1 = vweird.f32 %v634_v45 }
 0x142   : > { %v648_v53 = vor.u32 1.1754944e-38, %v647_v49  ;;  %vm646_vm3 = vcmp.eq.f32.partialorder %v645_v51, 8.507059e+37 }
 0x146   : > { %v1127_v46 = vpop.eup %1126 }
 0x147   : > { %v637_v47 = vmul.f32 %v1127_v46, %v634_v45  ;;  %vm642_vm0 = vweird.f32 %v1127_v46 }
 0x148   : > { %vm643_vm2 = vmor %vm641_vm1, %vm642_vm0 }
 0x149   : > { %v638_v48 = vsub.f32 1.0, %v637_v47 }
 0x14b   : > { %v639_v50 = vmul.f32 %v1127_v46, %v638_v48  ;;  %v877_v48 = vld [vmem:[%s1345_s13] sm:$0x1] }
 0x14d   : > { %v640_v52 = vadd.f32 %v1127_v46, %v639_v50 }
 0x14f   : > { %v644_v55 = vsel %vm643_vm2, %v1127_v46, %v640_v52 }
 0x150   : > { %v649_v56 = vsel %vm646_vm3, %v648_v53, %v644_v55 }
 0x151   : > { %v650_v57 = vmul.f32 %v649_v56, %v617_v54 }
 0x153   : > { %v651_v58 = vpack.c.bf16 %v650_v57, %v650_v57 }
 0x155   : > { %1037 = vmatmul.msk.bf16.vlgmr.msra.gmra.mxu2 %vm672_vm4, %v651_v58  ;;  %1046 = vmatmul.msk.bf16.vlgmr.msra.gmra.mxu3 %vm672_vm4, %v651_v58 }
 0x156   : > { %899 = vmatpush.bf16.msra.mxu2 %v1102_v30 }
 0x15a   : > { %900 = vmatpush.bf16.msra.mxu2 %v1101_v42 }
 0x1d8   : > { %v685_v63 = vpop.f32.mrf.mxu2  ;;  %v719_v0 = vpop.f32.mrf.mxu3 }
 0x1d9   : > { %v686_v1 = vadd.f32 %v1123_v61, %v685_v63  ;;  %v720_v2 = vadd.f32 %v1124_v62, %v719_v0 }
 0x1db   : > { %v689_v3 = vmax.f32 %v686_v1, 0.0  ;;  %v723_v4 = vmax.f32 %v720_v2, 0.0 }
 0x1dd   : > { %v724_v5 = vpack.c.bf16 %v689_v3, %v689_v3  ;;  %v780_v6 = vpack.c.bf16 %v723_v4, %v723_v4 }
 0x1df   : > { %1063 = vmatmul.msk.bf16.vlgmr.msrb.gmra.mxu2 %vm761_vm5, %v724_v5  ;;  %v782_v7 = vsel %vm672_vm4, %v780_v6, 0  ;;  %v815_v8 = vsel %vm814_vm6, %v780_v6, 0 }
 0x1e0   : > { %v687_v9 = vpop.f32.mrf.mxu2  ;;  %v721_v10 = vpop.f32.mrf.mxu3  ;;  %791 = vmatpush.bf16.xpose.msrb.mxu3 %v782_v7  ;;  %824 = vmatpush.bf16.msrb.mxu0 %v815_v8 }
 0x1e7   : > { %1064 = vmatmul.msk.bf16.vlgmr.msrb.gmra.mxu3 %vm672_vm4, %v780_v6 }
 0x262   : > { %v774_v12 = vpop.f32.mrf.mxu2 }
 0x263   : > { %v775_v13 = vadd.f32 %v1125_v11, %v774_v12 }
 0x265   : > { %779 = vst.msk [vmem:[%s515_s22] sm:$0xff] %vm778_vm7, %v775_v13 }
 0x26a   : > { %v776_v14 = vpop.f32.mrf.mxu2  ;;  %v793_v15 = vpop.f32.mrf.mxu3 }
 0x26b   : > { %v797_v16 = vmul.f32 0.17677669, %v793_v15 }
 0x26d   : > { %v799_v17 = vsel %vm798_vm8, %v797_v16, -inf }
 0x26e   : > { %800 = vmax.xlane.f32.xlu2 %v799_v17 }
 0x272   : > { %v795_v18 = vpop.f32.mrf.mxu3 }
 0x2e1   : > { %v801_v19 = vpop.xlane.xlu2 %800 }
 0x2e2   : > { %v802_v20 = vsub.f32 %v797_v16, %v801_v19 }
 0x2e4   : > { %v803_v21 = vmul.f32 1.442695, %v802_v20 }
 0x2e6   : > { %1128 = vpow2.f32 %v803_v21 }
 0x2ec   : > { %v1129_v22 = vpop.eup %1128 }
 0x2ed   : > { %v805_v23 = vsel %vm798_vm8, %v1129_v22, 0.0 }
 0x2ee   : > { %806 = vadd.xlane.f32.xlu0 %v805_v23 }
 0x361   : > { %v807_v24 = vpop.xlane.xlu0 %806 }
 0x362   : > { %1130 = vrcp.f32 %v807_v24 }
 0x368   : > { %v1131_v25 = vpop.eup %1130 }
 0x369   : > { %v809_v26 = vmul.f32 %v1131_v25, %v1129_v22 }
 0x36b   : > { %v810_v27 = vpack.c.bf16 %v809_v26, %v809_v26 }
 0x36d   : > { %1065 = vmatmul.msk.bf16.vlgmr.msrb.gmra.mxu0 %vm798_vm8, %v810_v27 }
 0x3ea   : > { %v826_v31 = vpop.f32.mrf.mxu0 }
 0x3eb   : > { %v830_v32 = vsel %vm672_vm4, %v826_v31, 0.0 }
 0x3ec   : > { %v831_v33 = vrot.slane %v830_v32, 4 }
 0x3ee   : > { %v832_v34 = vadd.f32 %v831_v33, %v830_v32 }
 0x3f0   : > { %v833_v35 = vrot.slane %v832_v34, 2 }
 0x3f2   : > { %v834_v36 = vadd.f32 %v833_v35, %v832_v34  ;;  %v828_v37 = vpop.f32.mrf.mxu0 }
 0x3f4   : > { %v835_v38 = vrot.slane %v834_v36, 1 }
 0x3f6   : > { %v836_v39 = vadd.f32 %v835_v38, %v834_v36 }
 0x3f8   : > { %v837_v40 = vmul.f32 0.125, %v836_v39 }
 0x3fa   : > { %v838_v41 = vpack.c.bf16 %v837_v40, %v837_v40 }
 0x3fc   : > { %1074 = vmatmul.msk.bf16.vlgmr.msrb.gmra.mxu1 %vm672_vm4, %v838_v41 }
 0x479   : > { %v868_v44 = vpop.f32.mrf.mxu1 }
 0x47a   : > { %v869_v45 = vadd.f32 %v868_v44, %v843_v43 }
 0x47c   : > { %v872_v46 = vpack.c.bf16 %v869_v45, %v869_v45 }
 0x47e   : > { %1083 = vmatmul.msk.bf16.vlgmr.msra.gmra.mxu2 %vm672_vm4, %v872_v46 }
 0x481   : > { %v870_v47 = vpop.f32.mrf.mxu1 }
 0x501   : > { %v902_v49 = vpop.f32.mrf.mxu2 }
 0x502   : > { %v903_v50 = vadd.f32 %v902_v49, %v877_v48 }
 0x504   : > { %907 = vst.msk [vmem:[%s518_s23] sm:$0x1] %vm906_vm9, %v903_v50 }
 0x509   : > { %v904_v51 = vpop.f32.mrf.mxu2 }
 0x50a PF: > { %s26_s18 = sadd.s32 1, %s1138_s18  }
 0x50b   : > { %p23_p4 = scmp.ge.s32.totalorder %s26_s18, 4  }
 0x50d   :  { %25 = sbr.rel (!%p23_p4) target bundleno = 1 (0x1), region = 121 }

// kernel: generalized_rcnn_affinity_forward.2
= control target key start
LH: loop header
LB: loop body
LE: loop exit
PB: predicated region body
PF: predicated region fallthrough
CT: control target
= control target key end

     0   :  { %s3091_s13 = smov 0   ;;  %s4111_s0 = inlined_call_operand.vmem [shape: f32[1,256], index: 0, kind: input, shape index: {}]   ;;  %s4112_s1 = inlined_call_operand.vmem [shape: f32[1,256], index: 1, kind: input, shape index: {}]   ;;  %s4113_s2 = inlined_call_operand.vmem [shape: f32[2,3,256], index: 2, kind: input, shape index: {}]   ;;  %s4114_s3 = inlined_call_operand.vmem [shape: bf16[9,32,3], index: 3, kind: input, shape index: {}]   ;;  %s4115_s4 = inlined_call_operand.vmem [shape: f32[32,1], index: 4, kind: input, shape index: {}]   ;;  %s4116_s5 = inlined_call_operand.vmem [shape: bf16[9,32,32], index: 5, kind: input, shape index: {}]   ;;  %s4117_s6 = inlined_call_operand.vmem [shape: f32[32,1], index: 6, kind: input, shape index: {}]   ;;  %s4118_s7 = inlined_call_operand.vmem [shape: bf16[3,32], index: 7, kind: input, shape index: {}]   ;;  %s4119_s8 = inlined_call_operand.vmem [shape: f32[3,1], index: 8, kind: input, shape index: {}]   ;;  %s4120_s9 = inlined_call_operand.vmem [shape: bf16[2,32,256], index: 9, kind: output, shape index: {0}]   ;;  %s4121_s10 = inlined_call_operand.vmem [shape: f32[2,1,256], index: 10, kind: output, shape index: {1}]  }
   0x1 LB: > { %s2369_s14 = sadd.s32 4294967295, %s3024_s13   ;;  %p2373_p0 = scmp.ge.s32.totalorder %s3024_s13, 1  ;;  %s3024_s13 = sphi %s3091_s13, %s21_s13  }
   0x2   : > { %p315_p1 = scmp.lt.s32.totalorder %s3024_s13, 3 }
   0x4   : > { %p316_p2 = pnand %p2373_p0, %p315_p1 }
   0x6   : > { %319 = sbr.rel (%p316_p2) target bundleno = 1028 (0x404), region = 56 }
   0xb   : > { %p357_p3 = scmp.lt.s32.totalorder %s2369_s14, 1  ;;  %s3026_s19 = smov 16   ;;  %v3032_v23 = vmov 0   ;;  %v3122_v25 = vld [vmem:[%s4112_s1] sm:$0x3]  ;;  %v4144_v34 = vlaneseq  ;;  %vm4122_vm11 = vcmask 1040384  }
   0xc   : > { %s3027_s20 = smov 17   ;;  %s3028_s21 = smov 15   ;;  %2857 = vset.pattern.permute.xlu1 %v3032_v23  ;;  %2856 = vset.pattern.permute.xlu0 %v3032_v23  ;;  %v372_v26 = vld [vmem:[%s4111_s0] sm:$0x3]  ;;  %v378_v29 = vadd.f32 -1.0, %v3122_v25  ;;  %v3035_v41 = vmov 65535  }
   0xd   : > { %s4383_s14 = smov (!%p357_p3, %s2369_s14), 1  ;;  %s3029_s22 = smov 1   ;;  %2855 = vset.pattern.permute.xlu2 %v3032_v23  ;;  %vm384_vm0 = vcmp.ge.f32.partialorder %v372_v26, 0.0  ;;  %vm385_vm1 = vcmp.le.f32.partialorder %v372_v26, 15.0  ;;  %v374_v32 = vadd.f32 -1.0, %v372_v26  ;;  %v389_v36 = vadd.f32 1.0, %v372_v26 }
   0xe   : > { %s2759_s15 = sshll.u32 %s4383_s14, 3  ;;  %s3030_s23 = smov 127   ;;  %vm379_vm2 = vcmp.ge.f32.partialorder %v378_v29, 0.0  ;;  %vm3129_vm3 = vmand %vm384_vm0, %vm385_vm1  ;;  %vm381_vm4 = vcmp.le.f32.partialorder %v378_v29, 15.0  ;;  %v3146_v37 = vand.u32 127, %v4144_v34  ;;  %vm484_vm1 = vcmask 1041408  }
   0xf   : > { %s361_s18 = scalar_lea.vmem %s4113_s2, %s2759_s15  ;;  %s3031_s24 = smov 112   ;;  %vm387_vm5 = vmand %vm3129_vm3, %vm379_vm2  ;;  %vm375_vm6 = vcmp.ge.f32.partialorder %v374_v32, 0.0  ;;  %vm376_vm7 = vcmp.le.f32.partialorder %v374_v32, 15.0  ;;  %vm390_vm13 = vcmp.ge.f32.partialorder %v389_v36, 0.0  ;;  %vm391_vm14 = vcmp.le.f32.partialorder %v389_v36, 15.0  ;;  %v2761_v36 = vld [vmem:[%s4114_s3] sm:$0xff] }
  0x10   : > { %v411_v0 = vld [vmem:[%s361_s18] sm:$0x77]  ;;  %s3033_s25 = smov 113   ;;  %s3034_s30 = smov 111   ;;  %vm388_vm8 = vmand %vm387_vm5, %vm381_vm4  ;;  %4190 = vst [vmem:[#allocation2_spill] sm:$0xff] %v3146_v37  ;;  %v485_v42 = vsel %vm4122_vm11, 4294967295, %v3035_v41 }
  0x11   : > { %413 = vst [vmem:[#allocation1] ss:$2 sm:$0xff] %v411_v0  ;;  %vm3137_vm9 = vmand %vm375_vm6, %vm376_vm7  ;;  %v452_v35 = vsel %vm388_vm8, 1, %v3032_v23  ;;  %vm4123_vm6 = vcmp.lt.s32.totalorder %v3146_v37, 16  ;;  %v4193_v44 = vmov 0  ;;  %v4196_v48 = vmov 0 }
  0x12   : > { %vm380_vm10 = vmand %vm3137_vm9, %vm379_vm2  ;;  %v453_v38 = vperm.slane %v452_v35, 0  ;;  %v454_v39 = vperm.slane %v452_v35, 1  ;;  %v3169_v50 = vsel %vm484_vm1, %v485_v42, 0  ;;  %v4199_v63 = vmov 0  ;;  %s2760_s17 = sshll.u32 %s4383_s14, 5  ;;  %s2378_s15 = sshll.u32 %s4383_s14, 1 }
  0x13   : > { %vm382_vm12 = vmand %vm380_vm10, %vm381_vm4  ;;  %vm4124_vm10 = vcmp.lt.s32.totalorder %v3146_v37, 17  ;;  %v4211_v42 = vmov 0  ;;  %v4238_v40 = vmov 0  ;;  %s3526_s27 = scalar_lea.vmem %s4120_s9, %s2760_s17  ;;  %s370_s18 = scalar_lea.vmem %s4121_s10, %s2378_s15 }
  0x14   : > { %vm3149_vm15 = vmand %vm390_vm13, %vm391_vm14  ;;  %vm3159_vm7 = vcmp.eq.s32.totalorder %v453_v38, 1  ;;  %v427_v45 = vsel %vm382_vm12, 1, %v3032_v23  ;;  %vm3164_vm8 = vcmp.eq.s32.totalorder %v454_v39, 1  ;;  %vm398_vm13 = vcmp.le.f32.partialorder %v3122_v25, 15.0 }
  0x15   : > { %vm393_vm0 = vmand %vm3149_vm15, %vm379_vm2  ;;  %v4194_v44 = vsel %vm3159_vm7, 4294967295, %v4193_v44  ;;  %v4197_v48 = vsel %vm3164_vm8, 4294967295, %v4196_v48  ;;  %v428_v53 = vperm.slane %v427_v45, 0  ;;  %v429_v54 = vperm.slane %v427_v45, 1 }
  0x16   : > { %vm394_vm5 = vmand %vm393_vm0, %vm381_vm4  ;;  %4195 = vst [vmem:[#allocation3_spill] sm:$0xff] %v4194_v44  ;;  %vm396_vm2 = vcmp.ge.f32.partialorder %v3122_v25, 0.0  ;;  %vm4140_vm4 = vcmask 23552  }
  0x17   : > { %4198 = vst [vmem:[#allocation4_spill] sm:$0xff] %v4197_v48  ;;  %v603_v49 = vsel %vm394_vm5, 1, %v3032_v23  ;;  %vm397_vm12 = vmand %vm3137_vm9, %vm396_vm2  ;;  %vm3188_vm14 = vcmp.eq.s32.totalorder %v428_v53, 1  ;;  %vm3192_vm0 = vcmp.eq.s32.totalorder %v429_v54, 1  ;;  %vm4126_vm5 = vcmp.lt.s32.totalorder %v3146_v37, 15 }
  0x18   : > { %v414_v1 = vld.sshfl [vmem:[#allocation1] sm:$0xff pattern:$0x75316420]  ;;  %v415_v2 = vld.sshfl [vmem:[#allocation1 + $0x8] sm:$0xff pattern:$0x75316420]  ;;  %vm399_vm1 = vmand %vm397_vm12, %vm398_vm13 }
  0x19   : > { %440 = vst [vmem:[#allocation1] ss:$2 sm:$0xff] %v411_v0  ;;  %v2820_v6 = vpack.i.bf16 %v415_v2, %v414_v1  ;;  %v604_v57 = vperm.slane %v603_v49, 0  ;;  %v605_v58 = vperm.slane %v603_v49, 1  ;;  %v4200_v63 = vsel %vm3188_vm14, 4294967295, %v4199_v63  ;;  %v2763_v2 = vld [vmem:[%s4114_s3 + $0x10] sm:$0xff] }
  0x1a   : > { %4201 = vst [vmem:[#allocation5_spill] sm:$0xff] %v4200_v63  ;;  %vm4125_vm12 = vcmp.lt.s32.totalorder %v3146_v37, 1 }
  0x1b   : > { %vm3202_vm11 = vcmp.eq.s32.totalorder %v604_v57, 1 }
  0x20   : > { %v441_v3 = vld.sshfl [vmem:[#allocation1] sm:$0xff pattern:$0x75316420]  ;;  %v442_v4 = vld.sshfl [vmem:[#allocation1 + $0x8] sm:$0xff pattern:$0x75316420] }
  0x21   : > { %v2815_v5 = vpack.i.bf16 %v442_v4, %v441_v3  ;;  %591 = vst [vmem:[#allocation1] ss:$2 sm:$0xff] %v411_v0  ;;  %v4205_v4 = vmov 0 }
  0x22   : > { %v4206_v4 = vsel %vm3202_vm11, 4294967295, %v4205_v4 }
  0x23   : > { %2816 = vrot.lane.b32.xlu0 %v2815_v5, %s3026_s19  ;;  %4207 = vst [vmem:[#allocation7_spill] sm:$0xff] %v4206_v4  ;;  %v4208_v5 = vmov 0 }
  0x28   : > { %v592_v7 = vld.sshfl [vmem:[#allocation1] sm:$0xff pattern:$0x75316420]  ;;  %v593_v8 = vld.sshfl [vmem:[#allocation1 + $0x8] sm:$0xff pattern:$0x75316420] }
  0x29   : > { %v2825_v9 = vpack.i.bf16 %v593_v8, %v592_v7  ;;  %685 = vst [vmem:[#allocation1] ss:$2 sm:$0xff] %v411_v0 }
  0x2b   : > { %2821 = vrot.lane.b32.xlu0 %v2820_v6, %s3027_s20  ;;  %2826 = vrot.lane.b32.xlu1 %v2825_v9, %s3028_s21  ;;  %v697_v6 = vsel %vm399_vm1, 1, %v3032_v23 }
  0x30   : > { %v686_v10 = vld.sshfl [vmem:[#allocation1] sm:$0xff pattern:$0x75316420]  ;;  %v687_v11 = vld.sshfl [vmem:[#allocation1 + $0x8] sm:$0xff pattern:$0x75316420] }
  0x31   : > { %v2830_v12 = vpack.i.bf16 %v687_v11, %v686_v10  ;;  %784 = vst [vmem:[#allocation1] ss:$2 sm:$0xff] %v411_v0  ;;  %v698_v11 = vperm.slane %v697_v6, 0 }
  0x33   : > { %2831 = vrot.lane.b32.xlu1 %v2830_v12, %s3029_s22  ;;  %v699_v12 = vperm.slane %v697_v6, 1  ;;  %vm3237_vm1 = vcmp.eq.s32.totalorder %v698_v11, 1 }
  0x34   : > { %v4212_v42 = vsel %vm3237_vm1, 4294967295, %v4211_v42 }
  0x35   : > { %4213 = vst [vmem:[#allocation9_spill] sm:$0xff] %v4212_v42 }
  0x38   : > { %v3109_v13 = vld.sshfl [vmem:[#allocation1] sm:$0xff pattern:$0x75316420]  ;;  %v3111_v14 = vld.sshfl [vmem:[#allocation1 + $0x8] sm:$0xff pattern:$0x75316420] }
  0x39   : > { %859 = vst [vmem:[#allocation1] ss:$2 sm:$0xff] %v411_v0  ;;  %v789_v57 = vpack.c.bf16 %v3109_v13, %v3109_v13  ;;  %v4220_v13 = vmov 0 }
  0x40   : > { %v860_v15 = vld.sshfl [vmem:[#allocation1] sm:$0xff pattern:$0x75316420]  ;;  %v861_v16 = vld.sshfl [vmem:[#allocation1 + $0x8] sm:$0xff pattern:$0x75316420] }
  0x41   : > { %v2835_v17 = vpack.i.bf16 %v861_v16, %v860_v15  ;;  %953 = vst [vmem:[#allocation1] ss:$2 sm:$0xff] %v411_v0 }
  0x43   : > { %2836 = vrot.lane.b32.xlu2 %v2835_v17, %s3030_s23 }
  0x48   : > { %v954_v18 = vld.sshfl [vmem:[#allocation1] sm:$0xff pattern:$0x75316420]  ;;  %v955_v19 = vld.sshfl [vmem:[#allocation1 + $0x8] sm:$0xff pattern:$0x75316420] }
  0x49   : > { %1047 = vst [vmem:[#allocation1] ss:$2 sm:$0xff] %v411_v0  ;;  %v2840_v24 = vpack.i.bf16 %v955_v19, %v954_v18 }
  0x4b   : > { %2841 = vrot.lane.b32.xlu2 %v2840_v24, %s3033_s25 }
  0x50   : > { %v1048_v20 = vld.sshfl [vmem:[#allocation1] sm:$0xff pattern:$0x75316420]  ;;  %v1049_v21 = vld.sshfl [vmem:[#allocation1 + $0x8] sm:$0xff pattern:$0x75316420] }
  0x51   : > { %v2845_v22 = vpack.i.bf16 %v1049_v21, %v1048_v20  ;;  %1141 = vst [vmem:[#allocation1] ss:$2 sm:$0xff] %v411_v0  ;;  %v4202_v0 = vmov 0 }
  0x52   : > { %v4203_v0 = vsel %vm3192_vm0, 4294967295, %v4202_v0 }
  0x53   : > { %2846 = vrot.lane.b32.xlu0 %v2845_v22, %s3031_s24  ;;  %4204 = vst [vmem:[#allocation6_spill] sm:$0xff] %v4203_v0 }
  0x58   : > { %v1142_v27 = vld.sshfl [vmem:[#allocation1] sm:$0xff pattern:$0x75316420]  ;;  %v1143_v28 = vld.sshfl [vmem:[#allocation1 + $0x8] sm:$0xff pattern:$0x75316420] }
  0x59   : > { %v2850_v30 = vpack.i.bf16 %v1143_v28, %v1142_v27 }
  0x5b   : > { %2851 = vrot.lane.b32.xlu1 %v2850_v30, %s3034_s30 }
  0x95   : > { %v2817_v43 = vpop.permute.xlu0 %2816 }
  0x96   : > { %v2819_v46 = vunpack.i.h.bf16 %v2817_v43  ;;  %v2818_v47 = vunpack.i.l.bf16 %v2817_v43  ;;  %v4214_v43 = vmov 0 }
  0x98   : > { %v451_v51 = vsel %vm4123_vm6, %v2819_v46, %v2818_v47  ;;  %v450_v52 = vsel %vm4123_vm6, %v2818_v47, %v2819_v46  ;;  %vm3206_vm6 = vcmp.eq.s32.totalorder %v605_v58, 1 }
  0x99   : > { %v457_v55 = vsel %vm3159_vm7, %v451_v51, 0.0  ;;  %v458_v56 = vsel %vm3164_vm8, %v450_v52, 0.0  ;;  %v4209_v5 = vsel %vm3206_vm6, 4294967295, %v4208_v5 }
  0x9a   : > { %v464_v59 = vpack.c.bf16 %v457_v55, %v457_v55  ;;  %v465_v60 = vpack.c.bf16 %v458_v56, %v458_v56  ;;  %4210 = vst [vmem:[#allocation8_spill] sm:$0xff] %v4209_v5  ;;  %v2764_v55 = vld [vmem:[%s4114_s3 + $0x18] sm:$0xff]  ;;  %v2762_v56 = vld [vmem:[%s4114_s3 + $0x8] sm:$0xff] }
  0x9c   : > { %v488_v61 = vand.u32 %v3169_v50, %v464_v59  ;;  %v491_v62 = vand.u32 %v3169_v50, %v465_v60  ;;  %v790_v60 = vpack.c.bf16 %v3111_v14, %v3111_v14 }
  0x9d   : > { %v2822_v1 = vpop.permute.xlu0 %2821  ;;  %v2827_v3 = vpop.permute.xlu1 %2826 }
  0x9e   : > { %v2824_v7 = vunpack.i.h.bf16 %v2822_v1  ;;  %v2823_v8 = vunpack.i.l.bf16 %v2822_v1  ;;  %500 = vmatpush.bf16.msra.mxu0 %v488_v61  ;;  %519 = vmatpush.bf16.msra.mxu1 %v491_v62  ;;  %v2829_v9 = vunpack.i.h.bf16 %v2827_v3  ;;  %v2828_v10 = vunpack.i.l.bf16 %v2827_v3  ;;  %v2837_v59 = vpop.permute.xlu2 %2836 }
  0x9f   : > { %v2839_v1 = vunpack.i.h.bf16 %v2837_v59  ;;  %v808_v3 = vand.u32 %v789_v57, %v3169_v50  ;;  %v811_v6 = vand.u32 %v790_v60, %v3169_v50  ;;  %v2769_v57 = vld [vmem:[%s4114_s3 + $0x40] sm:$0xff] }
  0xa0   : > { %v426_v15 = vsel %vm4124_vm10, %v2824_v7, %v2823_v8  ;;  %v425_v16 = vsel %vm4124_vm10, %v2823_v8, %v2824_v7  ;;  %v602_v17 = vsel %vm4126_vm5, %v2829_v9, %v2828_v10  ;;  %v601_v18 = vsel %vm4126_vm5, %v2828_v10, %v2829_v9  ;;  %v2765_v9 = vld [vmem:[%s4114_s3 + $0x20] sm:$0xff] }
  0xa1   : > { %2391 = vmatmul.msk.bf16.vlgmr.msra.gmra.mxu0 %vm4140_vm4, %v2763_v2  ;;  %2393 = vmatmul.msk.bf16.vlgmr.msra.gmra.mxu1 %vm4140_vm4, %v2763_v2  ;;  %v432_v19 = vsel %vm3188_vm14, %v426_v15, 0.0  ;;  %v433_v20 = vsel %vm3192_vm0, %v425_v16, 0.0  ;;  %v608_v21 = vsel %vm3202_vm11, %v602_v17, 0.0  ;;  %v609_v22 = vsel %vm3206_vm6, %v601_v18, 0.0  ;;  %v2767_v18 = vld [vmem:[%s4114_s3 + $0x30] sm:$0xff] }
  0xa2   : > { %v438_v24 = vpack.c.bf16 %v432_v19, %v432_v19  ;;  %v439_v26 = vpack.c.bf16 %v433_v20, %v433_v20  ;;  %v615_v27 = vpack.c.bf16 %v608_v21, %v608_v21  ;;  %v616_v28 = vpack.c.bf16 %v609_v22, %v609_v22  ;;  %v2766_v20 = vld [vmem:[%s4114_s3 + $0x28] sm:$0xff] }
  0xa3   : > { %vm3241_vm10 = vcmp.eq.s32.totalorder %v699_v12, 1  ;;  %v2838_v2 = vunpack.i.l.bf16 %v2837_v59  ;;  %v4217_v7 = vmov 0  ;;  %v3308_v19 = vadd.f32 1.0, %v3122_v25 }
  0xa4   : > { %v548_v29 = vand.u32 %v3169_v50, %v438_v24  ;;  %v551_v30 = vand.u32 %v3169_v50, %v439_v26  ;;  %v634_v32 = vand.u32 %v615_v27, %v3169_v50  ;;  %v637_v35 = vand.u32 %v616_v28, %v3169_v50  ;;  %v2768_v27 = vld [vmem:[%s4114_s3 + $0x38] sm:$0xff] }
  0xa5   : > { %v2832_v38 = vpop.permute.xlu1 %2831  ;;  %v4215_v43 = vsel %vm3241_vm10, 4294967295, %v4214_v43  ;;  %v4223_v28 = vmov 0 }
  0xa6   : > { %560 = vmatpush.bf16.msra.mxu2 %v548_v29  ;;  %579 = vmatpush.bf16.msra.mxu3 %v551_v30  ;;  %v2834_v39 = vunpack.i.h.bf16 %v2832_v38  ;;  %v2833_v41 = vunpack.i.l.bf16 %v2832_v38  ;;  %4216 = vst [vmem:[#allocation10_spill] sm:$0xff] %v4215_v43  ;;  %v2842_v21 = vpop.permute.xlu2 %2841  ;;  %v4226_v29 = vmov 0 }
  0xa7   : > { %646 = vmatpush.bf16.msrb.mxu0 %v634_v32  ;;  %665 = vmatpush.bf16.msrb.mxu1 %v637_v35  ;;  %v2844_v24 = vunpack.i.h.bf16 %v2842_v21  ;;  %v2843_v26 = vunpack.i.l.bf16 %v2842_v21 }
  0xa8   : > { %v696_v45 = vsel %vm4125_vm12, %v2834_v39, %v2833_v41  ;;  %v695_v46 = vsel %vm4125_vm12, %v2833_v41, %v2834_v39  ;;  %vm400_vm12 = vmand %vm3149_vm15, %vm396_vm2 }
  0xa9   : > { %2403 = vmatmul.msk.bf16.vlgmr.msra.gmra.mxu2 %vm4140_vm4, %v2761_v36  ;;  %2405 = vmatmul.msk.bf16.vlgmr.msra.gmra.mxu3 %vm4140_vm4, %v2761_v36  ;;  %v702_v47 = vsel %vm3237_vm1, %v696_v45, 0.0  ;;  %v703_v49 = vsel %vm3241_vm10, %v695_v46, 0.0  ;;  %vm401_vm5 = vmand %vm400_vm12, %vm398_vm13  ;;  %vm4129_vm10 = vcmp.lt.s32.totalorder %v3146_v37, 127  ;;  %vm405_vm12 = vcmp.le.f32.partialorder %v3308_v19, 15.0 }
  0xaa   : > { %v709_v51 = vpack.c.bf16 %v702_v47, %v702_v47  ;;  %v710_v52 = vpack.c.bf16 %v703_v49, %v703_v49  ;;  %v871_v58 = vsel %vm401_vm5, 1, %v3032_v23  ;;  %v869_v8 = vsel %vm4129_vm10, %v2838_v2, %v2839_v1 }
  0xab   : > { %v872_v61 = vperm.slane %v871_v58, 0  ;;  %v873_v62 = vperm.slane %v871_v58, 1  ;;  %v870_v14 = vsel %vm4129_vm10, %v2839_v1, %v2838_v2  ;;  %820 = vmatpush.bf16.msra.mxu0 %v808_v3  ;;  %839 = vmatpush.bf16.msra.mxu1 %v811_v6  ;;  %vm403_vm5 = vcmp.ge.f32.partialorder %v3308_v19, 0.0  ;;  %v2771_v2 = vld [vmem:[%s4114_s3 + $0x50] sm:$0xff]  ;;  %v2770_v3 = vld [vmem:[%s4114_s3 + $0x48] sm:$0xff] }
  0xac   : > { %v728_v53 = vand.u32 %v709_v51, %v3169_v50  ;;  %v731_v54 = vand.u32 %v710_v52, %v3169_v50  ;;  %vm404_vm10 = vmand %vm3137_vm9, %vm403_vm5 }
  0xad   : > { %vm3281_vm2 = vcmp.eq.s32.totalorder %v872_v61, 1  ;;  %vm3285_vm13 = vcmp.eq.s32.totalorder %v873_v62, 1  ;;  %vm407_vm1 = vmand %vm3129_vm3, %vm403_vm5 }
  0xae   : > { %740 = vmatpush.bf16.msrb.mxu2 %v728_v53  ;;  %759 = vmatpush.bf16.msrb.mxu3 %v731_v54  ;;  %v4218_v7 = vsel %vm3281_vm2, 4294967295, %v4217_v7  ;;  %v4221_v13 = vsel %vm3285_vm13, 4294967295, %v4220_v13  ;;  %v876_v10 = vsel %vm3281_vm2, %v869_v8, 0.0  ;;  %v877_v11 = vsel %vm3285_vm13, %v870_v14, 0.0  ;;  %vm406_vm13 = vmand %vm404_vm10, %vm405_vm12 }
  0xaf   : > { %4219 = vst [vmem:[#allocation11_spill] sm:$0xff] %v4218_v7  ;;  %v883_v12 = vpack.c.bf16 %v876_v10, %v876_v10  ;;  %v884_v15 = vpack.c.bf16 %v877_v11, %v877_v11  ;;  %vm4136_vm2 = vcmp.lt.s32.totalorder %v3146_v37, 113  ;;  %v965_v25 = vsel %vm406_vm13, 1, %v3032_v23  ;;  %vm408_vm3 = vmand %vm407_vm1, %vm405_vm12  ;;  %v2772_v10 = vld [vmem:[%s4114_s3 + $0x58] sm:$0xff] }
  0xb0   : > { %4222 = vst [vmem:[#allocation12_spill] sm:$0xff] %v4221_v13  ;;  %v966_v22 = vperm.slane %v965_v25, 0  ;;  %v967_v33 = vperm.slane %v965_v25, 1  ;;  %v963_v31 = vsel %vm4136_vm2, %v2843_v26, %v2844_v24  ;;  %v964_v30 = vsel %vm4136_vm2, %v2844_v24, %v2843_v26  ;;  %v1235_v24 = vld [vmem:[%s4115_s4] sm:$0xff]  ;;  %v2776_v26 = vld [vmem:[%s4114_s3 + $0x78] sm:$0xff] }
  0xb1   : > { %2392 = vmatmul.msk.bf16.gmra.mxu0 %vm4140_vm4, %v2764_v55  ;;  %2394 = vmatmul.msk.bf16.gmra.mxu1 %vm4140_vm4, %v2764_v55  ;;  %v902_v16 = vand.u32 %v883_v12, %v3169_v50  ;;  %v905_v17 = vand.u32 %v884_v15, %v3169_v50  ;;  %vm4137_vm13 = vcmp.lt.s32.totalorder %v3146_v37, 112  ;;  %v1059_v45 = vsel %vm408_vm3, 1, %v3032_v23  ;;  %vm409_vm3 = vmand %vm3149_vm15, %vm403_vm5 }
  0xb2   : > { %vm3334_vm9 = vcmp.eq.s32.totalorder %v966_v22, 1  ;;  %vm3338_vm10 = vcmp.eq.s32.totalorder %v967_v33, 1  ;;  %v1060_v47 = vperm.slane %v1059_v45, 0  ;;  %v1061_v49 = vperm.slane %v1059_v45, 1  ;;  %v2773_v22 = vld [vmem:[%s4114_s3 + $0x60] sm:$0xff]  ;;  %v2775_v33 = vld [vmem:[%s4114_s3 + $0x70] sm:$0xff]  ;;  %1241 = vperm.xlu1 %2857, %v1235_v24  }
  0xb3   : > { %914 = vmatpush.bf16.msra.mxu2 %v902_v16  ;;  %933 = vmatpush.bf16.msra.mxu3 %v905_v17  ;;  %v4224_v28 = vsel %vm3334_vm9, 4294967295, %v4223_v28  ;;  %v4227_v29 = vsel %vm3338_vm10, 4294967295, %v4226_v29  ;;  %v970_v32 = vsel %vm3334_vm9, %v963_v31, 0.0  ;;  %v971_v35 = vsel %vm3338_vm10, %v964_v30, 0.0 }
  0xb4   : > { %4225 = vst [vmem:[#allocation13_spill] sm:$0xff] %v4224_v28  ;;  %v977_v36 = vpack.c.bf16 %v970_v32, %v970_v32  ;;  %v978_v38 = vpack.c.bf16 %v971_v35, %v971_v35  ;;  %vm3358_vm1 = vcmp.eq.s32.totalorder %v1060_v47, 1  ;;  %v4229_v53 = vmov 0  ;;  %v1237_v32 = vld [vmem:[%s4115_s4 + $0x10] sm:$0xff]  ;;  %v1238_v35 = vld [vmem:[%s4115_s4 + $0x18] sm:$0xff]  ;;  %v2778_v47 = vld [vmem:[%s4114_s3 + $0x88] sm:$0xff] }
  0xb5   : > { %4228 = vst [vmem:[#allocation14_spill] sm:$0xff] %v4227_v29  ;;  %v4230_v53 = vsel %vm3358_vm1, 4294967295, %v4229_v53  ;;  %vm3362_vm2 = vcmp.eq.s32.totalorder %v1061_v49, 1  ;;  %v4232_v54 = vmov 0  ;;  %v4235_v15 = vmov 0  ;;  %1251 = vperm.xlu2 %2855, %v1237_v32   ;;  %1256 = vperm.xlu0 %2856, %v1238_v35   ;;  %v1236_v49 = vld [vmem:[%s4115_s4 + $0x8] sm:$0xff] }
  0xb6   : > { %v996_v39 = vand.u32 %v977_v36, %v3169_v50  ;;  %v999_v41 = vand.u32 %v978_v38, %v3169_v50  ;;  %4231 = vst [vmem:[#allocation15_spill] sm:$0xff] %v4230_v53  ;;  %v4233_v54 = vsel %vm3362_vm2, 4294967295, %v4232_v54  ;;  %vm4241_vm5 = vcmask 23552  }
  0xb7   : > { %4234 = vst [vmem:[#allocation16_spill] sm:$0xff] %v4233_v54 }
  0xb9   : > { %2404 = vmatmul.msk.bf16.gmra.mxu2 %vm4140_vm4, %v2762_v56  ;;  %2406 = vmatmul.msk.bf16.gmra.mxu3 %vm4140_vm4, %v2762_v56 }
  0xbd   : > { %1246 = vperm.xlu2 %2855, %v1236_v49  }
  0xc1   : > { %2419 = vmatmul.msk.bf16.vlgmr.msrb.gmra.mxu0 %vm4140_vm4, %v2765_v9  ;;  %2421 = vmatmul.msk.bf16.vlgmr.msrb.gmra.mxu1 %vm4140_vm4, %v2765_v9 }
  0xc2   : > { %1008 = vmatpush.bf16.msrb.mxu0 %v996_v39  ;;  %1027 = vmatpush.bf16.msrb.mxu1 %v999_v41 }
  0xc5   : > { %v2847_v46 = vpop.permute.xlu0 %2846 }
  0xc6   : > { %v2849_v51 = vunpack.i.h.bf16 %v2847_v46  ;;  %v2848_v52 = vunpack.i.l.bf16 %v2847_v46 }
  0xc8   : > { %v1057_v55 = vsel %vm4137_vm13, %v2848_v52, %v2849_v51  ;;  %v1058_v56 = vsel %vm4137_vm13, %v2849_v51, %v2848_v52  ;;  %vm410_vm13 = vmand %vm409_vm3, %vm405_vm12 }
  0xc9   : > { %2435 = vmatmul.msk.bf16.vlgmr.msrb.gmra.mxu2 %vm4140_vm4, %v2767_v18  ;;  %2437 = vmatmul.msk.bf16.vlgmr.msrb.gmra.mxu3 %vm4140_vm4, %v2767_v18  ;;  %v1064_v58 = vsel %vm3358_vm1, %v1057_v55, 0.0  ;;  %v1065_v59 = vsel %vm3362_vm2, %v1058_v56, 0.0  ;;  %v1153_v6 = vsel %vm410_vm13, 1, %v3032_v23  ;;  %vm4141_vm2 = vcmp.lt.s32.totalorder %v3146_v37, 111  ;;  %vm4242_vm12 = vmmov %vm4241_vm5 }
  0xca   : > { %v1071_v60 = vpack.c.bf16 %v1064_v58, %v1064_v58  ;;  %v1072_v61 = vpack.c.bf16 %v1065_v59, %v1065_v59  ;;  %v1154_v8 = vperm.slane %v1153_v6, 0  ;;  %v1155_v14 = vperm.slane %v1153_v6, 1  ;;  %vm4243_vm13 = vmmov %vm4241_vm5 }
  0xcb   : > { %vm4244_vm3 = vmmov %vm4241_vm5 }
  0xcc   : > { %v1090_v62 = vand.u32 %v1071_v60, %v3169_v50  ;;  %v1093_v1 = vand.u32 %v1072_v61, %v3169_v50  ;;  %vm3406_vm15 = vcmp.eq.s32.totalorder %v1155_v14, 1 }
  0xcd   : > { %v2852_v9 = vpop.permute.xlu1 %2851  ;;  %v4239_v40 = vsel %vm3406_vm15, 4294967295, %v4238_v40 }
  0xce   : > { %1102 = vmatpush.bf16.msrb.mxu2 %v1090_v62  ;;  %1121 = vmatpush.bf16.msrb.mxu3 %v1093_v1  ;;  %v2854_v11 = vunpack.i.h.bf16 %v2852_v9  ;;  %v2853_v12 = vunpack.i.l.bf16 %v2852_v9  ;;  %4240 = vst [vmem:[#allocation18_spill] sm:$0xff] %v4239_v40 }
  0xd0   : > { %v1151_v23 = vsel %vm4141_vm2, %v2853_v12, %v2854_v11  ;;  %v1152_v16 = vsel %vm4141_vm2, %v2854_v11, %v2853_v12  ;;  %vm4250_vm2 = vmmov %vm4244_vm3 }
  0xd1   : > { %2420 = vmatmul.msk.bf16.gmra.mxu0 %vm4140_vm4, %v2766_v20  ;;  %2422 = vmatmul.msk.bf16.gmra.mxu1 %vm4140_vm4, %v2766_v20  ;;  %v1159_v18 = vsel %vm3406_vm15, %v1152_v16, 0.0  ;;  %vm4251_vm15 = vmmov %vm4250_vm2 }
  0xd2   : > { %v1166_v20 = vpack.c.bf16 %v1159_v18, %v1159_v18 }
  0xd4   : > { %v1187_v21 = vand.u32 %v1166_v20, %v3169_v50 }
  0xd9   : > { %2436 = vmatmul.msk.bf16.gmra.mxu2 %vm4140_vm4, %v2768_v27  ;;  %2438 = vmatmul.msk.bf16.gmra.mxu3 %vm4140_vm4, %v2768_v27  ;;  %v2777_v27 = vld [vmem:[%s4114_s3 + $0x80] sm:$0xff] }
  0xe1   : > { %2451 = vmatmul.msk.bf16.vlgmr.msra.gmra.mxu0 %vm4140_vm4, %v2769_v57  ;;  %2453 = vmatmul.msk.bf16.vlgmr.msra.gmra.mxu1 %vm4140_vm4, %v2769_v57 }
  0xe2   : > { %1215 = vmatpush.bf16.msra.mxu1 %v1187_v21 }
  0xe9   : > { %2467 = vmatmul.msk.bf16.vlgmr.msra.gmra.mxu2 %vm4140_vm4, %v2771_v2  ;;  %2469 = vmatmul.msk.bf16.vlgmr.msra.gmra.mxu3 %vm4140_vm4, %v2771_v2 }
  0xf1   : > { %2454 = vmatmul.msk.bf16.gmra.mxu1 %vm4140_vm4, %v2770_v3  ;;  %2452 = vmatmul.msk.bf16.gmra.mxu0 %vm4140_vm4, %v2770_v3  ;;  %vm3402_vm4 = vcmp.eq.s32.totalorder %v1154_v8, 1 }
  0xf2   : > { %v4236_v15 = vsel %vm3402_vm4, 4294967295, %v4235_v15  ;;  %v1158_v17 = vsel %vm3402_vm4, %v1151_v23, 0.0 }
  0xf3   : > { %4237 = vst [vmem:[#allocation17_spill] sm:$0xff] %v4236_v15  ;;  %v1165_v19 = vpack.c.bf16 %v1158_v17, %v1158_v17 }
  0xf5   : > { %v1184_v25 = vand.u32 %v1165_v19, %v3169_v50  ;;  %v2774_v50 = vld [vmem:[%s4114_s3 + $0x68] sm:$0xff] }
  0xf7   : > { %1196 = vmatpush.bf16.msra.mxu0 %v1184_v25 }
  0xf9   : > { %2468 = vmatmul.msk.bf16.gmra.mxu2 %vm4241_vm5, %v2772_v10  ;;  %2470 = vmatmul.msk.bf16.gmra.mxu3 %vm4242_vm12, %v2772_v10  ;;  %vm4245_vm5 = vmmov %vm4244_vm3 }
  0xfa   : > { %vm4246_vm12 = vmmov %vm4244_vm3 }
 0x101   : > { %2483 = vmatmul.msk.bf16.vlgmr.msrb.gmra.mxu0 %vm4243_vm13, %v2773_v22  ;;  %2485 = vmatmul.msk.bf16.vlgmr.msrb.gmra.mxu1 %vm4244_vm3, %v2773_v22  ;;  %vm4247_vm13 = vmmov %vm4244_vm3 }
 0x109   : > { %2499 = vmatmul.msk.bf16.vlgmr.msrb.gmra.mxu2 %vm4245_vm5, %v2775_v33  ;;  %2501 = vmatmul.msk.bf16.vlgmr.msrb.gmra.mxu3 %vm4246_vm12, %v2775_v33  ;;  %vm4248_vm5 = vmmov %vm4244_vm3 }
 0x10a   : > { %vm4249_vm12 = vmmov %vm4244_vm3 }
 0x10f   : > { %v3518_v37 = vpop.permute.xlu2 %1251 }
 0x111   : > { %2486 = vmatmul.msk.bf16.gmra.mxu1 %vm4247_vm13, %v2774_v50  ;;  %2484 = vmatmul.msk.bf16.gmra.mxu0 %vm4244_vm3, %v2774_v50  ;;  %vm4180_vm13 = vmpackc.low %vm3159_vm7, %vm3159_vm7 }
 0x119   : > { %2500 = vmatmul.msk.bf16.gmra.mxu2 %vm4248_vm5, %v2776_v26  ;;  %2502 = vmatmul.msk.bf16.gmra.mxu3 %vm4249_vm12, %v2776_v26  ;;  %vm4179_vm12 = vmpackc.low %vm3164_vm8, %vm3164_vm8 }
 0x11e   : > { %v502_v31 = vpop.f32.mrf.mxu0  ;;  %v521_v30 = vpop.f32.mrf.mxu1 }
 0x121   : > { %2515 = vmatmul.msk.bf16.vlgmr.msra.gmra.mxu0 %vm4250_vm2, %v2777_v27  ;;  %2517 = vmatmul.msk.bf16.vlgmr.msra.gmra.mxu1 %vm4251_vm15, %v2777_v27  ;;  %vm4252_vm15 = vmmov %vm4250_vm2 }
 0x126   : > { %v3456_v36 = vpop.f32.mrf.mxu0  ;;  %v3458_v38 = vpop.f32.mrf.mxu1 }
 0x12c   : > { %v562_v39 = vpop.f32.mrf.mxu2  ;;  %v581_v41 = vpop.f32.mrf.mxu3 }
 0x12d   : > { %v563_v45 = vadd.f32 %v562_v39, %v502_v31  ;;  %v582_v46 = vadd.f32 %v581_v41, %v521_v30 }
 0x12e   : > { %v507_v51 = vpop.f32.mrf.mxu0  ;;  %v526_v52 = vpop.f32.mrf.mxu1 }
 0x131   : > { %2516 = vmatmul.msk.bf16.gmra.mxu0 %vm4250_vm2, %v2778_v47  ;;  %2518 = vmatmul.msk.bf16.gmra.mxu1 %vm4252_vm15, %v2778_v47 }
 0x134   : > { %v564_v55 = vpop.f32.mrf.mxu2  ;;  %v583_v56 = vpop.f32.mrf.mxu3 }
 0x135   : > { %v565_v28 = vadd.f32 %v564_v55, %v3456_v36  ;;  %v584_v43 = vadd.f32 %v583_v56, %v3458_v38 }
 0x136   : > { %v3468_v57 = vpop.f32.mrf.mxu0  ;;  %v3470_v58 = vpop.f32.mrf.mxu1 }
 0x13c   : > { %v567_v59 = vpop.f32.mrf.mxu2  ;;  %v586_v60 = vpop.f32.mrf.mxu3 }
 0x13d   : > { %v568_v61 = vadd.f32 %v567_v59, %v507_v51  ;;  %v587_v62 = vadd.f32 %v586_v60, %v526_v52 }
 0x13e   : > { %v648_v1 = vpop.f32.mrf.mxu0  ;;  %v667_v2 = vpop.f32.mrf.mxu1 }
 0x13f   : > { %v677_v3 = vadd.f32 %v648_v1, %v563_v45  ;;  %v678_v6 = vadd.f32 %v667_v2, %v582_v46 }
 0x144   : > { %v3472_v8 = vpop.f32.mrf.mxu2  ;;  %v3474_v14 = vpop.f32.mrf.mxu3 }
 0x146   : > { %v650_v9 = vpop.f32.mrf.mxu0  ;;  %v669_v10 = vpop.f32.mrf.mxu1 }
 0x147   : > { %v679_v63 = vadd.f32 %v650_v9, %v565_v28  ;;  %v680_v5 = vadd.f32 %v669_v10, %v584_v43 }
 0x14c   : > { %v742_v11 = vpop.f32.mrf.mxu2  ;;  %v761_v12 = vpop.f32.mrf.mxu3 }
 0x14d   : > { %v771_v15 = vadd.f32 %v742_v11, %v677_v3  ;;  %v772_v54 = vadd.f32 %v761_v12, %v678_v6  ;;  %v1242_v3 = vpop.permute.xlu1 %1241 }
 0x14e   : > { %v653_v23 = vpop.f32.mrf.mxu0  ;;  %v672_v16 = vpop.f32.mrf.mxu1 }
 0x14f   : > { %v3476_v17 = vadd.f32 %v653_v23, %v568_v61  ;;  %v3478_v18 = vadd.f32 %v672_v16, %v587_v62 }
 0x154   : > { %v744_v19 = vpop.f32.mrf.mxu2  ;;  %v763_v20 = vpop.f32.mrf.mxu3 }
 0x155   : > { %v773_v6 = vadd.f32 %v744_v19, %v679_v63  ;;  %v774_v11 = vadd.f32 %v763_v20, %v680_v5  ;;  %v1247_v5 = vpop.permute.xlu2 %1246  ;;  %v570_v19 = vadd.f32 %v3472_v8, %v3468_v57  ;;  %v589_v20 = vadd.f32 %v3474_v14, %v3470_v58 }
 0x156   : > { %v3480_v25 = vpop.f32.mrf.mxu0  ;;  %v3482_v21 = vpop.f32.mrf.mxu1 }
 0x15c   : > { %v3484_v22 = vpop.f32.mrf.mxu2  ;;  %v3486_v33 = vpop.f32.mrf.mxu3 }
 0x15e   : > { %v822_v50 = vpop.f32.mrf.mxu0  ;;  %v841_v24 = vpop.f32.mrf.mxu1 }
 0x15f   : > { %v851_v7 = vadd.f32 %v822_v50, %v771_v15  ;;  %v852_v29 = vadd.f32 %v841_v24, %v772_v54 }
 0x164   : > { %v3488_v26 = vpop.f32.mrf.mxu2  ;;  %v3490_v27 = vpop.f32.mrf.mxu3 }
 0x166   : > { %v824_v31 = vpop.f32.mrf.mxu0  ;;  %v843_v30 = vpop.f32.mrf.mxu1 }
 0x167   : > { %v853_v55 = vadd.f32 %v824_v31, %v773_v6  ;;  %v854_v38 = vadd.f32 %v843_v30, %v774_v11 }
 0x16c   : > { %v916_v32 = vpop.f32.mrf.mxu2  ;;  %v935_v35 = vpop.f32.mrf.mxu3 }
 0x16d   : > { %v945_v42 = vadd.f32 %v916_v32, %v851_v7  ;;  %v946_v0 = vadd.f32 %v935_v35, %v852_v29 }
 0x16e   : > { %v3492_v39 = vpop.f32.mrf.mxu0  ;;  %v3494_v41 = vpop.f32.mrf.mxu1 }
 0x174   : > { %v918_v45 = vpop.f32.mrf.mxu2  ;;  %v937_v46 = vpop.f32.mrf.mxu3 }
 0x175   : > { %v947_v28 = vadd.f32 %v918_v45, %v853_v55  ;;  %v948_v43 = vadd.f32 %v937_v46, %v854_v38 }
 0x176   : > { %v3496_v47 = vpop.f32.mrf.mxu0  ;;  %v3498_v49 = vpop.f32.mrf.mxu1 }
 0x17c   : > { %v3500_v59 = vpop.f32.mrf.mxu2  ;;  %v3502_v60 = vpop.f32.mrf.mxu3 }
 0x17e   : > { %v1010_v51 = vpop.f32.mrf.mxu0  ;;  %v1029_v52 = vpop.f32.mrf.mxu1 }
 0x17f   : > { %v1039_v4 = vadd.f32 %v1010_v51, %v945_v42  ;;  %v1040_v48 = vadd.f32 %v1029_v52, %v946_v0 }
 0x184   : > { %v3504_v1 = vpop.f32.mrf.mxu2  ;;  %v3506_v2 = vpop.f32.mrf.mxu3 }
 0x186   : > { %v1012_v61 = vpop.f32.mrf.mxu0  ;;  %v1031_v62 = vpop.f32.mrf.mxu1 }
 0x187   : > { %v1041_v56 = vadd.f32 %v1012_v61, %v947_v28  ;;  %v1042_v9 = vadd.f32 %v1031_v62, %v948_v43 }
 0x18c   : > { %v1104_v34 = vpop.f32.mrf.mxu2  ;;  %v1123_v40 = vpop.f32.mrf.mxu3 }
 0x18d   : > { %v1133_v12 = vadd.f32 %v1104_v34, %v1039_v4  ;;  %v1134_v44 = vadd.f32 %v1123_v40, %v1040_v48  ;;  %v775_v34 = vadd.f32 %v3484_v22, %v3476_v17 }
 0x18e   : > { %v3508_v23 = vpop.f32.mrf.mxu0  ;;  %v3510_v16 = vpop.f32.mrf.mxu1 }
 0x18f   : > { %v855_v24 = vadd.f32 %v3492_v39, %v775_v34 }
 0x191   : > { %v949_v57 = vadd.f32 %v3500_v59, %v855_v24 }
 0x194   : > { %v1106_v15 = vpop.f32.mrf.mxu2  ;;  %v1125_v54 = vpop.f32.mrf.mxu3 }
 0x195   : > { %v1135_v48 = vadd.f32 %v1106_v15, %v1041_v56  ;;  %v1136_v4 = vadd.f32 %v1125_v54, %v1042_v9 }
 0x196   : > { %v3512_v53 = vpop.f32.mrf.mxu0  ;;  %v3514_v13 = vpop.f32.mrf.mxu1 }
 0x19c   : > { %v1109_v35 = vpop.f32.mrf.mxu2  ;;  %v1128_v45 = vpop.f32.mrf.mxu3 }
 0x19e   : > { %v1198_v50 = vpop.f32.mrf.mxu0  ;;  %v1217_v36 = vpop.f32.mrf.mxu1 }
 0x19f   : > { %v1227_v7 = vadd.f32 %v1198_v50, %v1133_v12  ;;  %v1228_v29 = vadd.f32 %v1217_v36, %v1134_v44  ;;  %v776_v44 = vadd.f32 %v3486_v33, %v3478_v18  ;;  %v683_v18 = vadd.f32 %v3480_v25, %v570_v19 }
 0x1a0   : > { %v684_v33 = vadd.f32 %v3482_v21, %v589_v20 }
 0x1a1   : > { %v1259_v42 = vadd.f32 %v1242_v3, %v1227_v7  ;;  %v1260_v0 = vadd.f32 %v1242_v3, %v1228_v29  ;;  %v856_v31 = vadd.f32 %v3494_v41, %v776_v44  ;;  %v777_v46 = vadd.f32 %v3488_v26, %v683_v18  ;;  %v2178_v18 = vld [vmem:[%s4117_s6] sm:$0xff] }
 0x1a2   : > { %v778_v39 = vadd.f32 %v3490_v27, %v684_v33  ;;  %v1043_v41 = vadd.f32 %v3508_v23, %v949_v57  ;;  %v2181_v33 = vld [vmem:[%s4117_s6 + $0x18] sm:$0xff] }
 0x1a3   : > { %v1267_v63 = vmax.f32 %v1259_v42, 0.0  ;;  %v1268_v10 = vmax.f32 %v1260_v0, 0.0  ;;  %v950_v8 = vadd.f32 %v3502_v60, %v856_v31  ;;  %v857_v25 = vadd.f32 %v3496_v47, %v777_v46  ;;  %v1257_v42 = vpop.permute.xlu0 %1256 }
 0x1a4   : > { %v858_v61 = vadd.f32 %v3498_v49, %v778_v39  ;;  %v1137_v62 = vadd.f32 %v1109_v35, %v1043_v41  ;;  %v1111_v12 = vpop.f32.mrf.mxu2  ;;  %v1130_v15 = vpop.f32.mrf.mxu3 }
 0x1a5   : > { %v1275_v40 = vpack.c.bf16 %v1268_v10, %v1267_v63  ;;  %v1044_v51 = vadd.f32 %v3510_v16, %v950_v8  ;;  %v951_v26 = vadd.f32 %v3504_v1, %v857_v25 }
 0x1a6   : > { %v1200_v17 = vpop.f32.mrf.mxu0  ;;  %v1219_v22 = vpop.f32.mrf.mxu1  ;;  %v952_v27 = vadd.f32 %v3506_v2, %v858_v61  ;;  %v4254_v61 = vld [vmem:[#allocation2_spill] sm:$0xff] }
 0x1a7   : > { %v1229_v30 = vadd.f32 %v1200_v17, %v1135_v48  ;;  %v1230_v32 = vadd.f32 %v1219_v22, %v1136_v4  ;;  %1279 = vst [vmem:[%s3526_s27] sm:$0xff] %v1275_v40  ;;  %v1138_v59 = vadd.f32 %v1128_v45, %v1044_v51  ;;  %v1045_v50 = vadd.f32 %v3512_v53, %v951_v26  ;;  %v2223_v45 = vld [vmem:[%s4119_s8] sm:$0x7] }
 0x1a8   : > { %v1046_v1 = vadd.f32 %v3514_v13, %v952_v27  ;;  %v1698_v55 = vunpack.c.l.b16 %v1275_v40  ;;  %v1699_v7 = vunpack.c.h.b16 %v1275_v40  ;;  %vm4255_vm3 = vcmp.lt.s32.totalorder %v4254_v61, 16 }
 0x1a9   : > { %v1261_v58 = vadd.f32 %v1247_v5, %v1229_v30  ;;  %v1262_v14 = vadd.f32 %v1247_v5, %v1230_v32  ;;  %v1139_v28 = vadd.f32 %v1111_v12, %v1045_v50  ;;  %v2180_v30 = vld [vmem:[%s4117_s6 + $0x10] sm:$0xff]  ;;  %v2179_v32 = vld [vmem:[%s4117_s6 + $0x8] sm:$0xff]  ;;  %vm4256_vm5 = vmmov %vm4255_vm3 }
 0x1aa   : > { %v1140_v43 = vadd.f32 %v1130_v15, %v1046_v1  ;;  %vm4258_vm2 = vmmov %vm4255_vm3 }
 0x1ab   : > { %v1269_v52 = vmax.f32 %v1261_v58, 0.0  ;;  %v1270_v21 = vmax.f32 %v1262_v14, 0.0  ;;  %vm4259_vm15 = vmmov %vm4258_vm2 }
 0x1ad   : > { %v3547_v3 = vpack.i.bf16 %v1269_v52, %v1267_v63  ;;  %v3553_v47 = vpack.i.bf16 %v1270_v21, %v1268_v10  ;;  %v1276_v54 = vpack.c.bf16 %v1270_v21, %v1269_v52 }
 0x1ae   : > { %v1203_v60 = vpop.f32.mrf.mxu0  ;;  %v1222_v6 = vpop.f32.mrf.mxu1 }
 0x1af   : > { %v1231_v23 = vadd.f32 %v1203_v60, %v1137_v62  ;;  %v1232_v11 = vadd.f32 %v1222_v6, %v1138_v59  ;;  %2869 = vrot.lane.b32.xlu0 %v3547_v3, %s3026_s19  ;;  %1280 = vst [vmem:[%s3526_s27 + $0x8] sm:$0xff] %v1276_v54  ;;  %v1700_v38 = vunpack.c.l.b16 %v1276_v54  ;;  %v1701_v29 = vunpack.c.h.b16 %v1276_v54 }
 0x1b1   : > { %v1263_v49 = vadd.f32 %v3518_v37, %v1231_v23  ;;  %v1264_v16 = vadd.f32 %v3518_v37, %v1232_v11  ;;  %v3560_v9 = vpack.c.b16 %v1700_v38, %v1698_v55  ;;  %v3562_v53 = vpack.c.b16 %v1701_v29, %v1699_v7 }
 0x1b3   : > { %v1271_v36 = vmax.f32 %v1263_v49, 0.0  ;;  %v1272_v2 = vmax.f32 %v1264_v16, 0.0 }
 0x1b5   : > { %v1277_v0 = vpack.c.bf16 %v1272_v2, %v1271_v36 }
 0x1b6   : > { %v1205_v37 = vpop.f32.mrf.mxu0  ;;  %v1224_v56 = vpop.f32.mrf.mxu1 }
 0x1b7   : > { %v1233_v13 = vadd.f32 %v1205_v37, %v1139_v28  ;;  %v1234_v63 = vadd.f32 %v1224_v56, %v1140_v43  ;;  %2879 = vrot.lane.b32.xlu0 %v3547_v3, %s3028_s21  ;;  %1281 = vst [vmem:[%s3526_s27 + $0x10] sm:$0xff] %v1277_v0  ;;  %v1702_v19 = vunpack.c.l.b16 %v1277_v0  ;;  %v1703_v17 = vunpack.c.h.b16 %v1277_v0 }
 0x1b9   : > { %v1265_v10 = vadd.f32 %v1257_v42, %v1233_v13  ;;  %v1266_v34 = vadd.f32 %v1257_v42, %v1234_v63  ;;  %v2780_v13 = vld [vmem:[%s4116_s5 + $0x8] sm:$0xff] }
 0x1bb   : > { %v1273_v44 = vmax.f32 %v1265_v10, 0.0  ;;  %v1274_v48 = vmax.f32 %v1266_v34, 0.0  ;;  %v2781_v34 = vld [vmem:[%s4116_s5 + $0x10] sm:$0xff] }
 0x1bd   : > { %v2863_v4 = vpack.i.bf16 %v1274_v48, %v1272_v2  ;;  %v2858_v5 = vpack.i.bf16 %v1273_v44, %v1271_v36  ;;  %v1278_v40 = vpack.c.bf16 %v1274_v48, %v1273_v44 }
 0x1bf   : > { %2864 = vrot.lane.b32.xlu2 %v2863_v4, %s3026_s19  ;;  %2889 = vrot.lane.b32.xlu0 %v2863_v4, %s3028_s21  ;;  %1282 = vst [vmem:[%s3526_s27 + $0x18] sm:$0xff] %v1278_v40  ;;  %v1704_v20 = vunpack.c.l.b16 %v1278_v40  ;;  %v1705_v22 = vunpack.c.h.b16 %v1278_v40 }
 0x1c0   : > { %2859 = vrot.lane.b32.xlu1 %v2858_v5, %s3026_s19 }
 0x1c1   : > { %v3571_v24 = vpack.c.b16 %v1704_v20, %v1702_v19  ;;  %v3573_v31 = vpack.c.b16 %v1705_v22, %v1703_v17 }
 0x1c7   : > { %2914 = vrot.lane.b32.xlu0 %v3553_v47, %s3027_s20  ;;  %2884 = vrot.lane.b32.xlu2 %v2858_v5, %s3028_s21 }
 0x1c8   : > { %2874 = vrot.lane.b32.xlu1 %v3553_v47, %s3026_s19 }
 0x1cf   : > { %2929 = vrot.lane.b32.xlu0 %v3547_v3, %s3029_s22  ;;  %2904 = vrot.lane.b32.xlu2 %v2863_v4, %s3027_s20 }
 0x1d0   : > { %2894 = vrot.lane.b32.xlu1 %v2858_v5, %s3027_s20 }
 0x1d7   : > { %2939 = vrot.lane.b32.xlu0 %v3547_v3, %s3033_s25  ;;  %2909 = vrot.lane.b32.xlu2 %v3547_v3, %s3027_s20 }
 0x1d8   : > { %2899 = vrot.lane.b32.xlu1 %v3553_v47, %s3028_s21 }
 0x1df   : > { %2949 = vrot.lane.b32.xlu0 %v2863_v4, %s3033_s25  ;;  %2924 = vrot.lane.b32.xlu2 %v2863_v4, %s3029_s22 }
 0x1e0   : > { %2919 = vrot.lane.b32.xlu1 %v2858_v5, %s3029_s22 }
 0x1e7   : > { %2974 = vrot.lane.b32.xlu0 %v3553_v47, %s3030_s23  ;;  %2944 = vrot.lane.b32.xlu2 %v2858_v5, %s3033_s25 }
 0x1e8   : > { %2934 = vrot.lane.b32.xlu1 %v3553_v47, %s3029_s22 }
 0x1ef   : > { %2994 = vrot.lane.b32.xlu0 %v2858_v5, %s3031_s24  ;;  %2964 = vrot.lane.b32.xlu2 %v2863_v4, %s3030_s23 }
 0x1f0   : > { %2954 = vrot.lane.b32.xlu1 %v2858_v5, %s3030_s23 }
 0x1f7   : > { %2999 = vrot.lane.b32.xlu0 %v3553_v47, %s3034_s30  ;;  %2969 = vrot.lane.b32.xlu2 %v3547_v3, %s3030_s23 }
 0x1f8   : > { %2959 = vrot.lane.b32.xlu1 %v3553_v47, %s3033_s25 }
 0x1ff   : > { %2194 = vperm.xlu0 %2856, %v2180_v30   ;;  %2979 = vrot.lane.b32.xlu2 %v3547_v3, %s3034_s30 }
 0x200   : > { %2984 = vrot.lane.b32.xlu1 %v2858_v5, %s3034_s30 }
 0x207   : > { %2189 = vperm.xlu0 %2856, %v2179_v32   ;;  %2989 = vrot.lane.b32.xlu2 %v2863_v4, %s3034_s30 }
 0x208   : > { %3004 = vrot.lane.b32.xlu1 %v2863_v4, %s3031_s24 }
 0x20f   : > { %3014 = vrot.lane.b32.xlu2 %v3553_v47, %s3031_s24 }
 0x210   : > { %3009 = vrot.lane.b32.xlu1 %v3547_v3, %s3031_s24 }
 0x217   : > { %2184 = vperm.xlu2 %2855, %v2178_v18  }
 0x218   : > { %2199 = vperm.xlu1 %2857, %v2181_v33  }
 0x219   : > { %v2865_v35 = vpop.permute.xlu2 %2864 }
 0x21a   : > { %v2867_v41 = vunpack.i.h.bf16 %v2865_v35  ;;  %v2866_v25 = vunpack.i.l.bf16 %v2865_v35 }
 0x220   : > { %2226 = vperm.xlu1 %2857, %v2223_v45  }
 0x221   : > { %v2870_v57 = vpop.permute.xlu0 %2869  ;;  %v2885_v8 = vpop.permute.xlu2 %2884 }
 0x222   : > { %v2887_v16 = vunpack.i.h.bf16 %v2885_v8  ;;  %v2886_v12 = vunpack.i.l.bf16 %v2885_v8  ;;  %v2872_v54 = vunpack.i.h.bf16 %v2870_v57  ;;  %v2871_v36 = vunpack.i.l.bf16 %v2870_v57 }
 0x229   : > { %v3631_v58 = vpop.permute.xlu0 %2879  ;;  %v3633_v14 = vpop.permute.xlu2 %2904 }
 0x22a   : > { %v2907_v44 = vunpack.i.h.bf16 %v3633_v14  ;;  %v2906_v48 = vunpack.i.l.bf16 %v3633_v14  ;;  %v2881_v3 = vunpack.i.l.bf16 %v3631_v58 }
 0x231   : > { %v2890_v46 = vpop.permute.xlu0 %2889  ;;  %v2910_v47 = vpop.permute.xlu2 %2909 }
 0x232   : > { %v2860_v39 = vpop.permute.xlu1 %2859  ;;  %v2892_v23 = vunpack.i.h.bf16 %v2890_v46  ;;  %v2891_v11 = vunpack.i.l.bf16 %v2890_v46  ;;  %v2912_v32 = vunpack.i.h.bf16 %v2910_v47  ;;  %v2911_v18 = vunpack.i.l.bf16 %v2910_v47 }
 0x233   : > { %v2862_v51 = vunpack.i.h.bf16 %v2860_v39  ;;  %v2861_v52 = vunpack.i.l.bf16 %v2860_v39 }
 0x235   : > { %v1342_v62 = vsel %vm4255_vm3, %v2862_v51, %v2867_v41  ;;  %v1346_v59 = vsel %vm4256_vm5, %v2867_v41, %v2862_v51  ;;  %v1341_v60 = vsel %vm4258_vm2, %v2861_v52, %v2866_v25  ;;  %v1345_v6 = vsel %vm4259_vm15, %v2866_v25, %v2861_v52 }
 0x236   : > { %v2532_v26 = vpack.c.bf16 %v1346_v59, %v1345_v6  ;;  %v2540_v27 = vpack.c.bf16 %v1342_v62, %v1341_v60  ;;  %vm4260_vm3 = vcmp.lt.s32.totalorder %v4254_v61, 15  ;;  %v2882_v59 = vunpack.i.h.bf16 %v3631_v58 }
 0x237   : > { %v1491_v2 = vsel %vm4260_vm3, %v2886_v12, %v2891_v11  ;;  %vm4261_vm5 = vmmov %vm4260_vm3 }
 0x238   : > { %2533 = vmatpush.bf16.msk.msra.mxu2 %vm4180_vm13, %v2532_v26  ;;  %2541 = vmatpush.bf16.msk.msra.mxu3 %vm4179_vm12, %v2540_v27  ;;  %v1492_v55 = vsel %vm4261_vm5, %v2887_v16, %v2892_v23  ;;  %vm4262_vm2 = vmmov %vm4260_vm3  ;;  %vm4264_vm12 = vcmp.lt.s32.totalorder %v4254_v61, 16  ;;  %v2779_v26 = vld [vmem:[%s4116_s5] sm:$0xff] }
 0x239   : > { %v2915_v49 = vpop.permute.xlu0 %2914  ;;  %v1495_v38 = vsel %vm4262_vm2, %v2891_v11, %v2886_v12  ;;  %vm4263_vm15 = vmmov %vm4262_vm2  ;;  %v2592_v10 = vpack.c.bf16 %v1492_v55, %v1491_v2  ;;  %v2925_v20 = vpop.permute.xlu2 %2924 }
 0x23a   : > { %v2875_v15 = vpop.permute.xlu1 %2874  ;;  %v1496_v7 = vsel %vm4263_vm15, %v2892_v23, %v2887_v16  ;;  %vm4265_vm13 = vmmov %vm4264_vm12  ;;  %v2917_v40 = vunpack.i.h.bf16 %v2915_v49  ;;  %v2916_v19 = vunpack.i.l.bf16 %v2915_v49  ;;  %vm4274_vm15 = vcmp.lt.s32.totalorder %v4254_v61, 17 }
 0x23b   : > { %v2877_v50 = vunpack.i.h.bf16 %v2875_v15  ;;  %v2876_v1 = vunpack.i.l.bf16 %v2875_v15  ;;  %vm4266_vm4 = vmmov %vm4264_vm12  ;;  %v2584_v63 = vpack.c.bf16 %v1496_v7, %v1495_v38  ;;  %v2782_v15 = vld [vmem:[%s4116_s5 + $0x18] sm:$0xff]  ;;  %v2926_v2 = vunpack.i.l.bf16 %v2925_v20  ;;  %v4294_v7 = vld [vmem:[#allocation9_spill] sm:$0xff] }
 0x23c   : > { %vm4267_vm3 = vmmov %vm4266_vm4 }
 0x23d   : > { %v1340_v29 = vsel %vm4264_vm12, %v2872_v54, %v2877_v50  ;;  %v1344_v28 = vsel %vm4265_vm13, %v2877_v50, %v2872_v54  ;;  %v1339_v43 = vsel %vm4266_vm4, %v2871_v36, %v2876_v1  ;;  %v1343_v42 = vsel %vm4267_vm3, %v2876_v1, %v2871_v36  ;;  %vm4184_vm5 = vmpackc.low %vm3202_vm11, %vm3202_vm11 }
 0x23e   : > { %v2535_v37 = vpack.c.bf16 %v1344_v28, %v1343_v42  ;;  %v2543_v56 = vpack.c.bf16 %v1340_v29, %v1339_v43  ;;  %vm4183_vm2 = vmpackc.low %vm3206_vm6, %vm3206_vm6  ;;  %vm4185_vm12 = vcmask 261120   ;;  %v2927_v50 = vunpack.i.h.bf16 %v2925_v20  ;;  %v4298_v28 = vld [vmem:[#allocation10_spill] sm:$0xff] }
 0x23f   : > { %vm4270_vm4 = vmpackc.low %vm3159_vm7, %vm3159_vm7 }
 0x240   : > { %2536 = vmatpush.bf16.msk.msra.mxu2 %vm4270_vm4, %v2535_v37  ;;  %vm4271_vm13 = vmpackc.low %vm3164_vm8, %vm3164_vm8 }
 0x241   : > { %2544 = vmatpush.bf16.msk.msra.mxu3 %vm4271_vm13, %v2543_v56  ;;  %v3706_v4 = vpop.permute.xlu0 %2929  ;;  %vm2555_vm7 = vmpackc.low %vm3188_vm14, %vm3188_vm14  ;;  %v2945_v58 = vpop.permute.xlu2 %2944  ;;  %vm4286_vm14 = vcmask 261120  }
 0x242   : > { %v2895_v5 = vpop.permute.xlu1 %2894  ;;  %vm2563_vm8 = vmpackc.low %vm3192_vm0, %vm3192_vm0  ;;  %v2947_v20 = vunpack.i.h.bf16 %v2945_v58 }
 0x243   : > { %v2897_v17 = vunpack.i.h.bf16 %v2895_v5  ;;  %v2896_v22 = vunpack.i.l.bf16 %v2895_v5  ;;  %2537 = vmatmul.msk.bf16.vlgmr.msra.gmra.mxu2 %vm4185_vm12, %v2781_v34  ;;  %vm4275_vm3 = vmmov %vm4274_vm15  ;;  %v2946_v5 = vunpack.i.l.bf16 %v2945_v58 }
 0x244   : > { %2585 = vmatpush.bf16.msk.msrb.mxu2 %vm4184_vm5, %v2584_v63  ;;  %2545 = vmatmul.msk.bf16.vlgmr.msra.gmra.mxu3 %vm4185_vm12, %v2781_v34  ;;  %vm4276_vm4 = vmmov %vm4275_vm3  ;;  %v2931_v63 = vunpack.i.l.bf16 %v3706_v4 }
 0x245   : > { %2593 = vmatpush.bf16.msk.msrb.mxu3 %vm4183_vm2, %v2592_v10  ;;  %v1302_v35 = vsel %vm4274_vm15, %v2897_v17, %v2907_v44  ;;  %v1306_v45 = vsel %vm4275_vm3, %v2907_v44, %v2897_v17  ;;  %v1301_v57 = vsel %vm4276_vm4, %v2896_v22, %v2906_v48  ;;  %vm4277_vm13 = vmmov %vm4275_vm3  ;;  %vm4291_vm4 = vcmp.lt.s32.totalorder %v4254_v61, 1 }
 0x246   : > { %v1305_v8 = vsel %vm4277_vm13, %v2906_v48, %v2896_v22  ;;  %v2564_v46 = vpack.c.bf16 %v1302_v35, %v1301_v57  ;;  %vm4278_vm2 = vmmov %vm4275_vm3 }
 0x247   : > { %v2556_v14 = vpack.c.bf16 %v1306_v45, %v1305_v8  ;;  %v1299_v39 = vsel %vm4278_vm2, %v2911_v18, %v2916_v19  ;;  %vm4279_vm5 = vmmov %vm4278_vm2 }
 0x248   : > { %v1300_v41 = vsel %vm4279_vm5, %v2912_v32, %v2917_v40  ;;  %vm4280_vm12 = vmmov %vm4278_vm2  ;;  %2565 = vmatpush.bf16.msk.msrb.mxu1 %vm2563_vm8, %v2564_v46  ;;  %vm4282_vm5 = vcmp.lt.s32.totalorder %v4254_v61, 15 }
 0x249   : > { %v1303_v51 = vsel %vm4280_vm12, %v2916_v19, %v2911_v18  ;;  %vm4281_vm15 = vmmov %vm4278_vm2  ;;  %2557 = vmatpush.bf16.msk.msrb.mxu0 %vm2555_vm7, %v2556_v14  ;;  %v2567_v21 = vpack.c.bf16 %v1300_v41, %v1299_v39  ;;  %v3747_v27 = vpop.permute.xlu0 %2939  ;;  %v2965_v43 = vpop.permute.xlu2 %2964 }
 0x24a   : > { %v1304_v52 = vsel %vm4281_vm15, %v2917_v40, %v2912_v32  ;;  %v2900_v62 = vpop.permute.xlu1 %2899  ;;  %vm4283_vm2 = vmmov %vm4282_vm5  ;;  %vm4295_vm15 = vnez %v4294_v7  ;;  %v2783_v32 = vld [vmem:[%s4116_s5 + $0x20] sm:$0xff]  ;;  %v2967_v57 = vunpack.i.h.bf16 %v2965_v43  ;;  %v2966_v8 = vunpack.i.l.bf16 %v2965_v43 }
 0x24b   : > { %v2559_v25 = vpack.c.bf16 %v1304_v52, %v1303_v51  ;;  %v2902_v60 = vunpack.i.h.bf16 %v2900_v62  ;;  %v2901_v6 = vunpack.i.l.bf16 %v2900_v62  ;;  %vm4284_vm12 = vmmov %vm4283_vm2 }
 0x24c   : > { %2568 = vmatpush.bf16.msk.msrb.mxu1 %vm2563_vm8, %v2567_v21  ;;  %vm4285_vm3 = vmmov %vm4283_vm2 }
 0x24d   : > { %2560 = vmatpush.bf16.msk.msrb.mxu0 %vm2555_vm7, %v2559_v25  ;;  %v1490_v23 = vsel %vm4282_vm5, %v2882_v59, %v2902_v60  ;;  %v1494_v11 = vsel %vm4283_vm2, %v2902_v60, %v2882_v59  ;;  %v1489_v47 = vsel %vm4284_vm12, %v2881_v3, %v2901_v6  ;;  %v1493_v49 = vsel %vm4285_vm3, %v2901_v6, %v2881_v3  ;;  %vm4287_vm7 = vmmov %vm4286_vm14  ;;  %v4313_v60 = vld [vmem:[#allocation11_spill] sm:$0xff] }
 0x24e   : > { %v2587_v16 = vpack.c.bf16 %v1494_v11, %v1493_v49  ;;  %v2595_v12 = vpack.c.bf16 %v1490_v23, %v1489_v47  ;;  %vm4288_vm0 = vmpackc.low %vm3202_vm11, %vm3202_vm11  ;;  %vm4299_vm3 = vnez %v4298_v28  ;;  %v4320_v11 = vld [vmem:[#allocation12_spill] sm:$0xff] }
 0x24f   : > { %2569 = vmatmul.msk.bf16.vlgmr.msrb.gmra.mxu1 %vm4287_vm7, %v2779_v26  ;;  %vm4289_vm8 = vmpackc.low %vm3206_vm6, %vm3206_vm6 }
 0x250   : > { %2561 = vmatmul.msk.bf16.vlgmr.msrb.gmra.mxu0 %vm4286_vm14, %v2779_v26  ;;  %2588 = vmatpush.bf16.msk.msrb.mxu2 %vm4288_vm0, %v2587_v16  ;;  %vm4290_vm11 = vmmov %vm4287_vm7 }
 0x251   : > { %2596 = vmatpush.bf16.msk.msrb.mxu3 %vm4289_vm8, %v2595_v12  ;;  %vm4292_vm6 = vmmov %vm4291_vm4  ;;  %v2970_v45 = vpop.permute.xlu2 %2969 }
 0x252   : > { %v2920_v54 = vpop.permute.xlu1 %2919  ;;  %vm4293_vm13 = vmmov %vm4287_vm7  ;;  %v2972_v59 = vunpack.i.h.bf16 %v2970_v45  ;;  %v2971_v3 = vunpack.i.l.bf16 %v2970_v45 }
 0x253   : > { %v2922_v1 = vunpack.i.h.bf16 %v2920_v54  ;;  %v2921_v36 = vunpack.i.l.bf16 %v2920_v54  ;;  %2538 = vmatmul.msk.bf16.gmra.mxu2 %vm4290_vm11, %v2782_v15  ;;  %vm2611_vm5 = vmpackc.low %vm4295_vm15, %vm4295_vm15 }
 0x254   : > { %1726 = vmatpush.bf16.msra.mxu2 %v3571_v24  ;;  %2546 = vmatmul.msk.bf16.gmra.mxu3 %vm4293_vm13, %v2782_v15  ;;  %v2950_v24 = vpop.permute.xlu0 %2949  ;;  %vm4296_vm2 = vmmov %vm4291_vm4 }
 0x255   : > { %1745 = vmatpush.bf16.msra.mxu3 %v3573_v31  ;;  %v1595_v55 = vsel %vm4291_vm4, %v2922_v1, %v2927_v50  ;;  %v1599_v38 = vsel %vm4292_vm6, %v2927_v50, %v2922_v1  ;;  %v1594_v31 = vsel %vm4296_vm2, %v2921_v36, %v2926_v2  ;;  %vm4297_vm12 = vmmov %vm4296_vm2  ;;  %v2951_v10 = vunpack.i.l.bf16 %v2950_v24 }
 0x256   : > { %v1598_v29 = vsel %vm4297_vm12, %v2926_v2, %v2921_v36  ;;  %vm2619_vm14 = vmpackc.low %vm4299_vm3, %vm4299_vm3  ;;  %v2620_v0 = vpack.c.bf16 %v1595_v55, %v1594_v31  ;;  %v2952_v34 = vunpack.i.h.bf16 %v2950_v24  ;;  %vm4314_vm3 = vnez %v4313_v60  ;;  %v2785_v24 = vld [vmem:[%s4116_s5 + $0x30] sm:$0xff]  ;;  %v4347_v60 = vld [vmem:[#allocation17_spill] sm:$0xff] }
 0x257   : > { %v2612_v42 = vpack.c.bf16 %v1599_v38, %v1598_v29  ;;  %vm4300_vm7 = vmmov %vm4296_vm2  ;;  %v2942_v36 = vunpack.i.h.bf16 %v3747_v27  ;;  %v2941_v31 = vunpack.i.l.bf16 %v3747_v27 }
 0x258   : > { %1727 = vmatpush.bf16.msra.mxu2 %v3560_v9  ;;  %2621 = vmatpush.bf16.msk.msra.mxu1 %vm2619_vm14, %v2620_v0  ;;  %vm4301_vm0 = vmmov %vm4296_vm2 }
 0x259   : > { %1746 = vmatpush.bf16.msra.mxu3 %v3562_v53  ;;  %2613 = vmatpush.bf16.msk.msra.mxu0 %vm2611_vm5, %v2612_v42  ;;  %v2932_v53 = vunpack.i.h.bf16 %v3706_v4  ;;  %vm4302_vm8 = vmmov %vm4301_vm0  ;;  %v3899_v55 = vpop.permute.xlu2 %2979 }
 0x25a   : > { %v2935_v9 = vpop.permute.xlu1 %2934  ;;  %vm4303_vm11 = vmmov %vm4301_vm0  ;;  %v2982_v46 = vunpack.i.h.bf16 %v3899_v55 }
 0x25b   : > { %v2937_v37 = vunpack.i.h.bf16 %v2935_v9  ;;  %v2936_v56 = vunpack.i.l.bf16 %v2935_v9  ;;  %vm4304_vm4 = vmmov %vm4293_vm13  ;;  %vm4306_vm13 = vcmp.lt.s32.totalorder %v4254_v61, 113  ;;  %v2784_v9 = vld [vmem:[%s4116_s5 + $0x28] sm:$0xff] }
 0x25c   : > { %vm4305_vm6 = vmmov %vm4304_vm4  ;;  %v1887_v4 = vsel %vm4306_vm13, %v2946_v5, %v2951_v10  ;;  %v2975_v30 = vpop.permute.xlu0 %2974 }
 0x25d   : > { %v1593_v44 = vsel %vm4300_vm7, %v2932_v53, %v2937_v37  ;;  %v1597_v48 = vsel %vm4301_vm0, %v2937_v37, %v2932_v53  ;;  %v1592_v40 = vsel %vm4302_vm8, %v2931_v63, %v2936_v56  ;;  %v1596_v19 = vsel %vm4303_vm11, %v2936_v56, %v2931_v63  ;;  %vm4307_vm2 = vmmov %vm4306_vm13 }
 0x25e   : > { %v2615_v17 = vpack.c.bf16 %v1597_v48, %v1596_v19  ;;  %v2623_v22 = vpack.c.bf16 %v1593_v44, %v1592_v40  ;;  %v1888_v18 = vsel %vm4307_vm2, %v2947_v20, %v2952_v34  ;;  %vm4308_vm12 = vmmov %vm4307_vm2  ;;  %v2977_v39 = vunpack.i.h.bf16 %v2975_v30  ;;  %v2786_v48 = vld [vmem:[%s4116_s5 + $0x38] sm:$0xff] }
 0x25f   : > { %2570 = vmatmul.msk.bf16.gmra.mxu1 %vm4305_vm6, %v2780_v13  ;;  %v1891_v33 = vsel %vm4308_vm12, %v2951_v10, %v2946_v5  ;;  %vm4309_vm7 = vmmov %vm4307_vm2  ;;  %v2976_v41 = vunpack.i.l.bf16 %v2975_v30  ;;  %v2684_v21 = vpack.c.bf16 %v1888_v18, %v1887_v4  ;;  %vm4315_vm8 = vcmp.lt.s32.totalorder %v4254_v61, 127 }
 0x260   : > { %2562 = vmatmul.msk.bf16.gmra.mxu0 %vm4304_vm4, %v2780_v13  ;;  %v1892_v35 = vsel %vm4309_vm7, %v2952_v34, %v2947_v20  ;;  %2624 = vmatpush.bf16.msk.msra.mxu1 %vm2619_vm14, %v2623_v22  ;;  %vm2683_vm0 = vmpackc.low %vm3334_vm9, %vm3334_vm9  ;;  %vm4321_vm2 = vnez %v4320_v11  ;;  %v4351_v11 = vld [vmem:[#allocation18_spill] sm:$0xff] }
 0x261   : > { %2616 = vmatpush.bf16.msk.msra.mxu0 %vm2611_vm5, %v2615_v17  ;;  %vm2691_vm15 = vmpackc.low %vm3338_vm10, %vm3338_vm10  ;;  %v2692_v62 = vpack.c.bf16 %v1892_v35, %v1891_v33  ;;  %v2990_v56 = vpop.permute.xlu2 %2989  ;;  %vm4335_vm10 = vcmp.lt.s32.totalorder %v4254_v61, 112 }
 0x262   : > { %v2955_v14 = vpop.permute.xlu1 %2954  ;;  %vm4312_vm5 = vmmov %vm4304_vm4  ;;  %v2992_v35 = vunpack.i.h.bf16 %v2990_v56  ;;  %v2991_v45 = vunpack.i.l.bf16 %v2990_v56 }
 0x263   : > { %v2957_v51 = vunpack.i.h.bf16 %v2955_v14  ;;  %v2956_v52 = vunpack.i.l.bf16 %v2955_v14  ;;  %2589 = vmatmul.msk.bf16.vlgmr.msrb.gmra.mxu2 %vm4312_vm5, %v2783_v32  ;;  %vm2655_vm14 = vmpackc.low %vm4314_vm3, %vm4314_vm3  ;;  %vm4330_vm3 = vcmask 261120  }
 0x264   : > { %vm4316_vm11 = vmmov %vm4315_vm8  ;;  %2685 = vmatpush.bf16.msk.msrb.mxu2 %vm2683_vm0, %v2684_v21  ;;  %v2995_v53 = vpop.permute.xlu0 %2994 }
 0x265   : > { %v1785_v6 = vsel %vm4315_vm8, %v2957_v51, %v2967_v57  ;;  %v1789_v26 = vsel %vm4316_vm11, %v2967_v57, %v2957_v51  ;;  %vm4317_vm4 = vmmov %vm4315_vm8  ;;  %v2997_v63 = vunpack.i.h.bf16 %v2995_v53  ;;  %v2996_v10 = vunpack.i.l.bf16 %v2995_v53 }
 0x266   : > { %v1784_v58 = vsel %vm4317_vm4, %v2956_v52, %v2966_v8  ;;  %vm4318_vm6 = vmmov %vm4317_vm4 }
 0x267   : > { %v1788_v23 = vsel %vm4318_vm6, %v2966_v8, %v2956_v52  ;;  %vm4319_vm13 = vmmov %vm4312_vm5  ;;  %v2656_v47 = vpack.c.bf16 %v1785_v6, %v1784_v58 }
 0x268   : > { %2597 = vmatmul.msk.bf16.vlgmr.msrb.gmra.mxu3 %vm4319_vm13, %v2783_v32  ;;  %vm2663_vm12 = vmpackc.low %vm4321_vm2, %vm4321_vm2  ;;  %v2664_v49 = vpack.c.bf16 %v1789_v26, %v1788_v23  ;;  %v4339_v32 = vld [vmem:[#allocation16_spill] sm:$0xff] }
 0x269   : > { %2693 = vmatpush.bf16.msk.msrb.mxu3 %vm2691_vm15, %v2692_v62  ;;  %vm4322_vm7 = vmmov %vm4317_vm4  ;;  %2657 = vmatpush.bf16.msk.msrb.mxu0 %vm2655_vm14, %v2656_v47  ;;  %v3015_v14 = vpop.permute.xlu2 %3014 }
 0x26a   : > { %v1782_v16 = vsel %vm4322_vm7, %v2971_v3, %v2976_v41  ;;  %vm4323_vm5 = vmmov %vm4317_vm4  ;;  %2665 = vmatpush.bf16.msk.msrb.mxu1 %vm2663_vm12, %v2664_v49  ;;  %v2960_v1 = vpop.permute.xlu1 %2959  ;;  %v3017_v62 = vunpack.i.h.bf16 %v3015_v14 }
 0x26b   : > { %v1783_v12 = vsel %vm4323_vm5, %v2972_v59, %v2977_v39  ;;  %vm4324_vm8 = vmmov %vm4317_vm4  ;;  %v2962_v38 = vunpack.i.h.bf16 %v2960_v1  ;;  %v2961_v7 = vunpack.i.l.bf16 %v2960_v1 }
 0x26c   : > { %v1786_v15 = vsel %vm4324_vm8, %v2976_v41, %v2971_v3  ;;  %vm4325_vm11 = vmmov %vm4317_vm4  ;;  %v2659_v50 = vpack.c.bf16 %v1783_v12, %v1782_v16  ;;  %vm4326_vm4 = vcmp.lt.s32.totalorder %v4254_v61, 113  ;;  %v3000_v5 = vpop.permute.xlu0 %2999  ;;  %vm4340_vm8 = vnez %v4339_v32  ;;  %v2787_v41 = vld [vmem:[%s4116_s5 + $0x40] sm:$0xff] }
 0x26d   : > { %v1787_v54 = vsel %vm4325_vm11, %v2977_v39, %v2972_v59  ;;  %v1886_v29 = vsel %vm4326_vm4, %v2942_v36, %v2962_v38  ;;  %vm4327_vm6 = vmmov %vm4326_vm4  ;;  %v3002_v57 = vunpack.i.h.bf16 %v3000_v5  ;;  %v3001_v8 = vunpack.i.l.bf16 %v3000_v5 }
 0x26e   : > { %v2667_v2 = vpack.c.bf16 %v1787_v54, %v1786_v15  ;;  %2660 = vmatpush.bf16.msk.msrb.mxu0 %vm2655_vm14, %v2659_v50  ;;  %v1890_v28 = vsel %vm4327_vm6, %v2962_v38, %v2942_v36  ;;  %vm4328_vm13 = vmmov %vm4326_vm4  ;;  %v2981_v39 = vunpack.i.l.bf16 %v3899_v55  ;;  %v3016_v59 = vunpack.i.l.bf16 %v3015_v14 }
 0x26f   : > { %v1885_v27 = vsel %vm4328_vm13, %v2941_v31, %v2961_v7  ;;  %vm4329_vm7 = vmmov %vm4326_vm4  ;;  %vm4343_vm13 = vcmp.lt.s32.totalorder %v4254_v61, 111 }
 0x270   : > { %2668 = vmatpush.bf16.msk.msrb.mxu1 %vm2663_vm12, %v2667_v2  ;;  %v1889_v43 = vsel %vm4329_vm7, %v2961_v7, %v2941_v31  ;;  %v2687_v42 = vpack.c.bf16 %v1886_v29, %v1885_v27  ;;  %2617 = vmatmul.msk.bf16.vlgmr.msra.gmra.mxu0 %vm4330_vm3, %v2785_v24  ;;  %vm4331_vm14 = vmmov %vm4330_vm3  ;;  %v2788_v7 = vld [vmem:[%s4116_s5 + $0x48] sm:$0xff]  ;;  %v2791_v31 = vld [vmem:[%s4116_s5 + $0x60] sm:$0xff] }
 0x271   : > { %v2695_v0 = vpack.c.bf16 %v1890_v28, %v1889_v43  ;;  %2625 = vmatmul.msk.bf16.vlgmr.msra.gmra.mxu1 %vm4331_vm14, %v2785_v24  ;;  %vm4332_vm2 = vmmov %vm4330_vm3  ;;  %v2790_v24 = vld [vmem:[%s4116_s5 + $0x58] sm:$0xff]  ;;  %v2793_v29 = vld [vmem:[%s4116_s5 + $0x70] sm:$0xff] }
 0x272   : > { %2688 = vmatpush.bf16.msk.msrb.mxu2 %vm2683_vm0, %v2687_v42  ;;  %v2985_v37 = vpop.permute.xlu1 %2984  ;;  %vm4333_vm12 = vmmov %vm4332_vm2  ;;  %v2792_v28 = vld [vmem:[%s4116_s5 + $0x68] sm:$0xff]  ;;  %v2794_v27 = vld [vmem:[%s4116_s5 + $0x78] sm:$0xff] }
 0x273   : > { %2696 = vmatpush.bf16.msk.msrb.mxu3 %vm2691_vm15, %v2695_v0  ;;  %2590 = vmatmul.msk.bf16.gmra.mxu2 %vm4332_vm2, %v2784_v9  ;;  %v2987_v40 = vunpack.i.h.bf16 %v2985_v37  ;;  %v2986_v19 = vunpack.i.l.bf16 %v2985_v37  ;;  %vm2711_vm9 = vmpackc.low %vm3358_vm1, %vm3358_vm1  ;;  %v2795_v43 = vld [vmem:[%s4116_s5 + $0x80] sm:$0xff] }
 0x274   : > { %vm4336_vm0 = vmmov %vm4335_vm10 }
 0x275   : > { %vm4337_vm15 = vmmov %vm4336_vm0  ;;  %v2094_v51 = vsel %vm4343_vm13, %v2987_v40, %v2992_v35 }
 0x276   : > { %vm4338_vm5 = vmmov %vm4336_vm0 }
 0x277   : > { %vm2719_vm11 = vmpackc.low %vm4340_vm8, %vm4340_vm8 }
 0x278   : > { %2598 = vmatmul.msk.bf16.gmra.mxu3 %vm4333_vm12, %v2784_v9  ;;  %vm4341_vm4 = vmmov %vm4332_vm2 }
 0x279   : > { %vm4342_vm6 = vmmov %vm4332_vm2  ;;  %vm4348_vm2 = vnez %v4347_v60 }
 0x27a   : > { %v3005_v13 = vpop.permute.xlu1 %3004  ;;  %vm4344_vm7 = vmmov %vm4343_vm13  ;;  %vm4355_vm13 = vcmask 261120  }
 0x27b   : > { %v3007_v34 = vunpack.i.h.bf16 %v3005_v13  ;;  %v3006_v44 = vunpack.i.l.bf16 %v3005_v13  ;;  %v2098_v52 = vsel %vm4344_vm7, %v2992_v35, %v2987_v40  ;;  %vm4345_vm3 = vmmov %vm4344_vm7  ;;  %vm4356_vm7 = vcmp.lt.s32.totalorder %v4254_v61, 112  ;;  %v2789_v61 = vld [vmem:[%s4116_s5 + $0x50] sm:$0xff] }
 0x27c   : > { %v2093_v25 = vsel %vm4345_vm3, %v2986_v19, %v2991_v45  ;;  %vm4346_vm14 = vmmov %vm4345_vm3 }
 0x27d   : > { %v1991_v17 = vsel %vm4335_vm10, %v2997_v63, %v3007_v34  ;;  %v1995_v22 = vsel %vm4336_vm0, %v3007_v34, %v2997_v63  ;;  %v1990_v4 = vsel %vm4337_vm15, %v2996_v10, %v3006_v44  ;;  %v1994_v30 = vsel %vm4338_vm5, %v3006_v44, %v2996_v10  ;;  %vm2739_vm12 = vmpackc.low %vm4348_vm2, %vm4348_vm2  ;;  %v2796_v10 = vld [vmem:[%s4116_s5 + $0x88] sm:$0xff] }
 0x27e   : > { %v2712_v18 = vpack.c.bf16 %v1991_v17, %v1990_v4  ;;  %v2720_v33 = vpack.c.bf16 %v1995_v22, %v1994_v30  ;;  %v2097_v21 = vsel %vm4346_vm14, %v2991_v45, %v2986_v19  ;;  %vm4349_vm10 = vmmov %vm4345_vm3  ;;  %vm4352_vm15 = vnez %v4351_v11 }
 0x27f   : > { %v2091_v6 = vsel %vm4349_vm10, %v2981_v39, %v3001_v8  ;;  %vm4350_vm0 = vmmov %vm4345_vm3  ;;  %v2740_v16 = vpack.c.bf16 %v2094_v51, %v2093_v25  ;;  %v2748_v12 = vpack.c.bf16 %v2098_v52, %v2097_v21 }
 0x280   : > { %2618 = vmatmul.msk.bf16.gmra.mxu0 %vm4341_vm4, %v2786_v48  ;;  %2721 = vmatpush.bf16.msk.msra.mxu1 %vm2719_vm11, %v2720_v33  ;;  %v2092_v26 = vsel %vm4350_vm0, %v2982_v46, %v3002_v57  ;;  %vm2747_vm5 = vmpackc.low %vm4352_vm15, %vm4352_vm15 }
 0x281   : > { %2626 = vmatmul.msk.bf16.gmra.mxu1 %vm4342_vm6, %v2786_v48  ;;  %2713 = vmatpush.bf16.msk.msra.mxu0 %vm2711_vm9, %v2712_v18  ;;  %vm4353_vm4 = vmmov %vm4350_vm0  ;;  %v2743_v55 = vpack.c.bf16 %v2092_v26, %v2091_v6 }
 0x282   : > { %v3010_v3 = vpop.permute.xlu1 %3009  ;;  %v2095_v47 = vsel %vm4353_vm4, %v3001_v8, %v2981_v39  ;;  %vm4354_vm6 = vmmov %vm4350_vm0 }
 0x283   : > { %v3012_v58 = vunpack.i.h.bf16 %v3010_v3  ;;  %v3011_v23 = vunpack.i.l.bf16 %v3010_v3  ;;  %v2096_v49 = vsel %vm4354_vm6, %v3002_v57, %v2982_v46  ;;  %2639 = vmatmul.msk.bf16.vlgmr.msra.gmra.mxu2 %vm4355_vm13, %v2787_v41  ;;  %vm4357_vm3 = vmmov %vm4356_vm7 }
 0x284   : > { %vm4358_vm14 = vmmov %vm4357_vm3  ;;  %2741 = vmatpush.bf16.msk.msra.mxu2 %vm2739_vm12, %v2740_v16  ;;  %v2751_v38 = vpack.c.bf16 %v2096_v49, %v2095_v47 }
 0x285   : > { %v1989_v15 = vsel %vm4356_vm7, %v3012_v58, %v3017_v62  ;;  %v1993_v54 = vsel %vm4357_vm3, %v3017_v62, %v3012_v58  ;;  %v1988_v50 = vsel %vm4358_vm14, %v3011_v23, %v3016_v59  ;;  %vm4359_vm10 = vmmov %vm4357_vm3 }
 0x286   : > { %v1992_v1 = vsel %vm4359_vm10, %v3016_v59, %v3011_v23  ;;  %vm4360_vm0 = vmmov %vm4355_vm13  ;;  %v2715_v36 = vpack.c.bf16 %v1989_v15, %v1988_v50 }
 0x287   : > { %v2723_v2 = vpack.c.bf16 %v1993_v54, %v1992_v1  ;;  %vm4361_vm1 = vmmov %vm4360_vm0 }
 0x288   : > { %2641 = vmatmul.msk.bf16.vlgmr.msra.gmra.mxu3 %vm4360_vm0, %v2787_v41  ;;  %2716 = vmatpush.bf16.msk.msra.mxu0 %vm2711_vm9, %v2715_v36  ;;  %vm4362_vm9 = vmmov %vm4360_vm0 }
 0x289   : > { %2749 = vmatpush.bf16.msk.msra.mxu3 %vm2747_vm5, %v2748_v12  ;;  %2724 = vmatpush.bf16.msk.msra.mxu1 %vm2719_vm11, %v2723_v2  ;;  %vm4363_vm8 = vmmov %vm4360_vm0 }
 0x28a   : > { %2744 = vmatpush.bf16.msk.msra.mxu2 %vm2739_vm12, %v2743_v55  ;;  %vm4364_vm11 = vmmov %vm4360_vm0 }
 0x28b   : > { %vm4365_vm2 = vmmov %vm4360_vm0 }
 0x28c   : > { %vm4366_vm12 = vmmov %vm4360_vm0 }
 0x28d   : > { %2752 = vmatpush.bf16.msk.msra.mxu3 %vm2747_vm5, %v2751_v38  ;;  %vm4367_vm15 = vmmov %vm4360_vm0 }
 0x28e   : > { %vm4368_vm5 = vmmov %vm4360_vm0 }
 0x28f   : > { %vm4369_vm4 = vmmov %vm4360_vm0 }
 0x290   : > { %2661 = vmatmul.msk.bf16.vlgmr.msrb.gmra.mxu0 %vm4361_vm1, %v2789_v61  ;;  %vm4370_vm6 = vmmov %vm4360_vm0 }
 0x291   : > { %2669 = vmatmul.msk.bf16.vlgmr.msrb.gmra.mxu1 %vm4362_vm9, %v2789_v61  ;;  %vm4371_vm13 = vmmov %vm4360_vm0 }
 0x292   : > { %vm4372_vm7 = vmmov %vm4360_vm0 }
 0x293   : > { %2640 = vmatmul.msk.bf16.gmra.mxu2 %vm4363_vm8, %v2788_v7  ;;  %vm4373_vm3 = vmmov %vm4360_vm0 }
 0x294   : > { %vm4374_vm14 = vmmov %vm4360_vm0 }
 0x295   : > { %vm4375_vm10 = vmmov %vm4360_vm0 }
 0x296   : > { %vm4376_vm1 = vmmov %vm4360_vm0 }
 0x297   : > { %vm4377_vm9 = vmmov %vm4360_vm0 }
 0x298   : > { %2642 = vmatmul.msk.bf16.gmra.mxu3 %vm4364_vm11, %v2788_v7  ;;  %vm4378_vm8 = vmmov %vm4360_vm0 }
 0x299   : > { %vm4379_vm11 = vmmov %vm4360_vm0 }
 0x2a0   : > { %2662 = vmatmul.msk.bf16.gmra.mxu0 %vm4365_vm2, %v2790_v24  ;;  %vm2258_vm2 = vcmask 1042432  }
 0x2a1   : > { %2670 = vmatmul.msk.bf16.gmra.mxu1 %vm4366_vm12, %v2790_v24 }
 0x2a3   : > { %2689 = vmatmul.msk.bf16.vlgmr.msrb.gmra.mxu2 %vm4367_vm15, %v2791_v31  ;;  %vm4381_vm15 = vcmask 1040384  }
 0x2a8   : > { %2697 = vmatmul.msk.bf16.vlgmr.msrb.gmra.mxu3 %vm4368_vm5, %v2791_v31 }
 0x2b0   : > { %2717 = vmatmul.msk.bf16.vlgmr.msra.gmra.mxu0 %vm4369_vm4, %v2793_v29 }
 0x2b1   : > { %2725 = vmatmul.msk.bf16.vlgmr.msra.gmra.mxu1 %vm4370_vm6, %v2793_v29 }
 0x2b3   : > { %2690 = vmatmul.msk.bf16.gmra.mxu2 %vm4371_vm13, %v2792_v28 }
 0x2b8   : > { %2698 = vmatmul.msk.bf16.gmra.mxu3 %vm4372_vm7, %v2792_v28 }
 0x2c0   : > { %2718 = vmatmul.msk.bf16.gmra.mxu0 %vm4373_vm3, %v2794_v27 }
 0x2c1   : > { %2726 = vmatmul.msk.bf16.gmra.mxu1 %vm4374_vm14, %v2794_v27 }
 0x2c3   : > { %2745 = vmatmul.msk.bf16.vlgmr.msra.gmra.mxu2 %vm4375_vm10, %v2795_v43 }
 0x2c6   : > { %v1390_v42 = vpop.f32.mrf.mxu2 }
 0x2c7   : > { %v1409_v0 = vpop.f32.mrf.mxu3 }
 0x2c8   : > { %2753 = vmatmul.msk.bf16.vlgmr.msra.gmra.mxu3 %vm4360_vm0, %v2795_v43 }
 0x2cc   : > { %v1463_v53 = vpop.f32.mrf.mxu1 }
 0x2cd   : > { %v1444_v9 = vpop.f32.mrf.mxu0  ;;  %v1464_v56 = vadd.f32 %v1463_v53, %v1409_v0 }
 0x2ce   : > { %v1445_v37 = vadd.f32 %v1444_v9, %v1390_v42  ;;  %v1392_v13 = vpop.f32.mrf.mxu2 }
 0x2cf   : > { %v1411_v63 = vpop.f32.mrf.mxu3 }
 0x2d3   : > { %2746 = vmatmul.msk.bf16.gmra.mxu2 %vm4376_vm1, %v2796_v10 }
 0x2d4   : > { %v1465_v44 = vpop.f32.mrf.mxu1 }
 0x2d5   : > { %v1446_v34 = vpop.f32.mrf.mxu0  ;;  %v1466_v5 = vadd.f32 %v1465_v44, %v1411_v63 }
 0x2d6   : > { %v1447_v48 = vadd.f32 %v1446_v34, %v1392_v13  ;;  %v1395_v40 = vpop.f32.mrf.mxu2 }
 0x2d7   : > { %v1414_v19 = vpop.f32.mrf.mxu3 }
 0x2d8   : > { %2754 = vmatmul.msk.bf16.gmra.mxu3 %vm4377_vm9, %v2796_v10 }
 0x2dc   : > { %v1468_v17 = vpop.f32.mrf.mxu1 }
 0x2dd   : > { %v1449_v20 = vpop.f32.mrf.mxu0  ;;  %v1469_v4 = vadd.f32 %v1468_v17, %v1414_v19 }
 0x2de   : > { %v1450_v22 = vadd.f32 %v1449_v20, %v1395_v40  ;;  %v1397_v30 = vpop.f32.mrf.mxu2 }
 0x2df   : > { %v1416_v32 = vpop.f32.mrf.mxu3 }
 0x2e4   : > { %v1470_v33 = vpop.f32.mrf.mxu1 }
 0x2e5   : > { %v1451_v18 = vpop.f32.mrf.mxu0  ;;  %v1471_v45 = vadd.f32 %v1470_v33, %v1416_v32 }
 0x2e6   : > { %v1452_v35 = vadd.f32 %v1451_v18, %v1397_v30  ;;  %v1539_v57 = vpop.f32.mrf.mxu2 }
 0x2e7   : > { %v1568_v8 = vadd.f32 %v1539_v57, %v1445_v37 }
 0x2eb   : > { %v1558_v14 = vpop.f32.mrf.mxu3 }
 0x2ec   : > { %v1569_v46 = vadd.f32 %v1558_v14, %v1464_v56 }
 0x2ed   : > { %v1642_v39 = vpop.f32.mrf.mxu0 }
 0x2ee   : > { %v1661_v41 = vpop.f32.mrf.mxu1  ;;  %v1671_v51 = vadd.f32 %v1642_v39, %v1568_v8  ;;  %v1541_v25 = vpop.f32.mrf.mxu2 }
 0x2ef   : > { %v1672_v52 = vadd.f32 %v1661_v41, %v1569_v46  ;;  %v1570_v21 = vadd.f32 %v1541_v25, %v1447_v48 }
 0x2f3   : > { %v1560_v62 = vpop.f32.mrf.mxu3 }
 0x2f4   : > { %v1571_v59 = vadd.f32 %v1560_v62, %v1466_v5 }
 0x2f5   : > { %v1644_v3 = vpop.f32.mrf.mxu0 }
 0x2f6   : > { %v1663_v60 = vpop.f32.mrf.mxu1  ;;  %v1673_v6 = vadd.f32 %v1644_v3, %v1570_v21  ;;  %v1544_v58 = vpop.f32.mrf.mxu2 }
 0x2f7   : > { %v1674_v26 = vadd.f32 %v1663_v60, %v1571_v59  ;;  %v1572_v23 = vadd.f32 %v1544_v58, %v1450_v22  ;;  %v2185_v58 = vpop.permute.xlu2 %2184 }
 0x2fb   : > { %v1563_v11 = vpop.f32.mrf.mxu3 }
 0x2fc   : > { %v1573_v47 = vadd.f32 %v1563_v11, %v1469_v4 }
 0x2fd   : > { %v1647_v49 = vpop.f32.mrf.mxu0 }
 0x2fe   : > { %v1666_v16 = vpop.f32.mrf.mxu1  ;;  %v1675_v12 = vadd.f32 %v1647_v49, %v1572_v23  ;;  %v1546_v54 = vpop.f32.mrf.mxu2 }
 0x2ff   : > { %v1676_v15 = vadd.f32 %v1666_v16, %v1573_v47  ;;  %v4081_v50 = vadd.f32 %v1546_v54, %v1452_v35  ;;  %v4089_v35 = vpop.permute.xlu0 %2194 }
 0x303   : > { %v1565_v1 = vpop.f32.mrf.mxu3 }
 0x304   : > { %v4083_v36 = vadd.f32 %v1565_v1, %v1471_v45 }
 0x305   : > { %v4085_v7 = vpop.f32.mrf.mxu0 }
 0x306   : > { %v1729_v2 = vpop.f32.mrf.mxu2  ;;  %v4087_v24 = vpop.f32.mrf.mxu1 }
 0x307   : > { %v1758_v55 = vadd.f32 %v1729_v2, %v1671_v51 }
 0x30b   : > { %v1748_v38 = vpop.f32.mrf.mxu3 }
 0x30c   : > { %v1759_v61 = vadd.f32 %v1748_v38, %v1672_v52 }
 0x30d   : > { %v1832_v43 = vpop.f32.mrf.mxu0 }
 0x30e   : > { %v1731_v31 = vpop.f32.mrf.mxu2  ;;  %v1851_v42 = vpop.f32.mrf.mxu1  ;;  %v1861_v45 = vadd.f32 %v1832_v43, %v1758_v55 }
 0x30f   : > { %v1760_v29 = vadd.f32 %v1731_v31, %v1673_v6  ;;  %v1862_v57 = vadd.f32 %v1851_v42, %v1759_v61 }
 0x313   : > { %v1750_v28 = vpop.f32.mrf.mxu3 }
 0x314   : > { %v1761_v27 = vadd.f32 %v1750_v28, %v1674_v26 }
 0x315   : > { %v1834_v56 = vpop.f32.mrf.mxu0 }
 0x316   : > { %v1734_v0 = vpop.f32.mrf.mxu2  ;;  %v1853_v63 = vpop.f32.mrf.mxu1  ;;  %v1863_v52 = vadd.f32 %v1834_v56, %v1760_v29 }
 0x317   : > { %v1762_v9 = vadd.f32 %v1734_v0, %v1675_v12  ;;  %v1864_v21 = vadd.f32 %v1853_v63, %v1761_v27  ;;  %v2190_v12 = vpop.permute.xlu0 %2189  ;;  %v1677_v27 = vadd.f32 %v4085_v7, %v4081_v50  ;;  %v1678_v0 = vadd.f32 %v4087_v24, %v4083_v36 }
 0x31b   : > { %v1753_v53 = vpop.f32.mrf.mxu3 }
 0x31c   : > { %v1763_v37 = vadd.f32 %v1753_v53, %v1676_v15 }
 0x31d   : > { %v1837_v48 = vpop.f32.mrf.mxu0 }
 0x31e   : > { %v1736_v13 = vpop.f32.mrf.mxu2  ;;  %v1856_v5 = vpop.f32.mrf.mxu1  ;;  %v1865_v43 = vadd.f32 %v1837_v48, %v1762_v9 }
 0x31f   : > { %v1866_v53 = vadd.f32 %v1856_v5, %v1763_v37 }
 0x323   : > { %v1755_v10 = vpop.f32.mrf.mxu3 }
 0x325   : > { %v1839_v20 = vpop.f32.mrf.mxu0 }
 0x326   : > { %v1935_v34 = vpop.f32.mrf.mxu2  ;;  %v1858_v17 = vpop.f32.mrf.mxu1 }
 0x327   : > { %v1964_v46 = vadd.f32 %v1935_v34, %v1861_v45  ;;  %v1764_v34 = vadd.f32 %v1736_v13, %v1677_v27 }
 0x32b   : > { %v1954_v44 = vpop.f32.mrf.mxu3 }
 0x32c   : > { %v1965_v51 = vadd.f32 %v1954_v44, %v1862_v57 }
 0x32d   : > { %v2038_v30 = vpop.f32.mrf.mxu0 }
 0x32e   : > { %v1937_v40 = vpop.f32.mrf.mxu2  ;;  %v2057_v32 = vpop.f32.mrf.mxu1  ;;  %v2067_v25 = vadd.f32 %v2038_v30, %v1964_v46 }
 0x32f   : > { %v2068_v62 = vadd.f32 %v2057_v32, %v1965_v51  ;;  %v1966_v59 = vadd.f32 %v1937_v40, %v1863_v52  ;;  %v1867_v32 = vadd.f32 %v1839_v20, %v1764_v34 }
 0x333   : > { %v1956_v19 = vpop.f32.mrf.mxu3 }
 0x334   : > { %v1967_v60 = vadd.f32 %v1956_v19, %v1864_v21  ;;  %v1765_v19 = vadd.f32 %v1755_v10, %v1678_v0  ;;  %v2218_v21 = vld [vmem:[%s4118_s7] sm:$0x3] }
 0x335   : > { %v2040_v8 = vpop.f32.mrf.mxu0 }
 0x336   : > { %v1940_v22 = vpop.f32.mrf.mxu2  ;;  %v2059_v39 = vpop.f32.mrf.mxu1  ;;  %v2069_v26 = vadd.f32 %v2040_v8, %v1966_v59  ;;  %v1868_v57 = vadd.f32 %v1858_v17, %v1765_v19 }
 0x337   : > { %v2070_v23 = vadd.f32 %v2059_v39, %v1967_v60  ;;  %v1968_v44 = vadd.f32 %v1940_v22, %v1865_v43  ;;  %v2200_v22 = vpop.permute.xlu1 %2199 }
 0x33b   : > { %v1959_v4 = vpop.f32.mrf.mxu3 }
 0x33c   : > { %v1969_v30 = vadd.f32 %v1959_v4, %v1866_v53 }
 0x33d   : > { %v2043_v15 = vpop.f32.mrf.mxu0 }
 0x33e   : > { %v1942_v18 = vpop.f32.mrf.mxu2  ;;  %v2062_v2 = vpop.f32.mrf.mxu1  ;;  %v2071_v45 = vadd.f32 %v2043_v15, %v1968_v44 }
 0x33f   : > { %v2072_v8 = vadd.f32 %v2062_v2, %v1969_v30  ;;  %v1970_v46 = vadd.f32 %v1942_v18, %v1867_v32 }
 0x343   : > { %v1961_v33 = vpop.f32.mrf.mxu3 }
 0x344   : > { %v1971_v9 = vadd.f32 %v1961_v33, %v1868_v57 }
 0x346   : > { %v2141_v14 = vpop.f32.mrf.mxu2  ;;  %v2064_v50 = vpop.f32.mrf.mxu1 }
 0x347   : > { %v2170_v3 = vadd.f32 %v2141_v14, %v2067_v25  ;;  %v2045_v14 = vpop.f32.mrf.mxu0  ;;  %v2074_v36 = vadd.f32 %v2064_v50, %v1971_v9 }
 0x348   : > { %v2073_v39 = vadd.f32 %v2045_v14, %v1970_v46 }
 0x349   : > { %v2202_v47 = vadd.f32 %v2185_v58, %v2170_v3 }
 0x34b   : > { %v2160_v41 = vpop.f32.mrf.mxu3  ;;  %v2210_v61 = vmax.f32 %v2202_v47, 0.0 }
 0x34c   : > { %v2171_v6 = vadd.f32 %v2160_v41, %v2068_v62 }
 0x34e   : > { %v2143_v11 = vpop.f32.mrf.mxu2  ;;  %v2203_v54 = vadd.f32 %v2185_v58, %v2171_v6 }
 0x34f   : > { %v2172_v49 = vadd.f32 %v2143_v11, %v2069_v26 }
 0x350   : > { %v2211_v29 = vmax.f32 %v2203_v54, 0.0 }
 0x351   : > { %v2204_v55 = vadd.f32 %v2190_v12, %v2172_v49 }
 0x353   : > { %v2162_v16 = vpop.f32.mrf.mxu3  ;;  %v2212_v31 = vmax.f32 %v2204_v55, 0.0 }
 0x354   : > { %v2173_v1 = vadd.f32 %v2162_v16, %v2070_v23 }
 0x355   : > { %v2219_v42 = vpack.c.bf16 %v2212_v31, %v2210_v61 }
 0x356   : > { %v2205_v38 = vadd.f32 %v2190_v12, %v2173_v1  ;;  %v2146_v56 = vpop.f32.mrf.mxu2 }
 0x357   : > { %v2174_v7 = vadd.f32 %v2146_v56, %v2071_v45 }
 0x358   : > { %v2213_v28 = vmax.f32 %v2205_v38, 0.0 }
 0x359   : > { %v2206_v37 = vadd.f32 %v4089_v35, %v2174_v7 }
 0x35a   : > { %v2220_v63 = vpack.c.bf16 %v2213_v28, %v2211_v29  ;;  %v4380_v29 = vlaneseq }
 0x35b   : > { %v2165_v40 = vpop.f32.mrf.mxu3  ;;  %v2214_v41 = vmax.f32 %v2206_v37, 0.0 }
 0x35c   : > { %v2175_v48 = vadd.f32 %v2165_v40, %v2072_v8  ;;  %vm2280_vm12 = vcmp.lt.s32.totalorder %v4380_v29, 256 }
 0x35e   : > { %v2148_v24 = vpop.f32.mrf.mxu2  ;;  %v2207_v10 = vadd.f32 %v4089_v35, %v2175_v48  ;;  %v2227_v35 = vpop.permute.xlu1 %2226 }
 0x35f   : > { %v2176_v13 = vadd.f32 %v2148_v24, %v2073_v39 }
 0x360   : > { %v2215_v18 = vmax.f32 %v2207_v10, 0.0 }
 0x361   : > { %v2208_v4 = vadd.f32 %v2200_v22, %v2176_v13 }
 0x363   : > { %v2167_v5 = vpop.f32.mrf.mxu3  ;;  %v2216_v51 = vmax.f32 %v2208_v4, 0.0 }
 0x364   : > { %v2177_v20 = vadd.f32 %v2167_v5, %v2074_v36 }
 0x365   : > { %v2221_v25 = vpack.c.bf16 %v2216_v51, %v2214_v41 }
 0x366   : > { %v2209_v17 = vadd.f32 %v2200_v22, %v2177_v20 }
 0x367   : > { %2238 = vmatpush.bf16.msrb.mxu0 %v2221_v25 }
 0x368   : > { %v2217_v52 = vmax.f32 %v2209_v17, 0.0 }
 0x36a   : > { %v2222_v33 = vpack.c.bf16 %v2217_v52, %v2215_v18 }
 0x36b   : > { %2239 = vmatpush.bf16.msrb.mxu0 %v2219_v42 }
 0x36c   : > { %2251 = vmatpush.bf16.msrb.mxu1 %v2222_v33 }
 0x36e   : > { %2755 = vmatmul.msk.bf16.vlgmr.msrb.gmra.mxu0 %vm4378_vm8, %v2218_v21 }
 0x370   : > { %2252 = vmatpush.bf16.msrb.mxu1 %v2220_v63 }
 0x373   : > { %2756 = vmatmul.msk.bf16.vlgmr.msrb.gmra.mxu1 %vm4379_vm11, %v2218_v21 }
 0x3eb   : > { %v2241_v62 = vpop.f32.mrf.mxu0 }
 0x3ec   : > { %v2242_v59 = vadd.f32 %v2241_v62, %v2227_v35 }
 0x3ee   : > { %v2259_v6 = vsel %vm2258_vm2, %v2242_v59, -inf }
 0x3ef   : > { %v2260_v26 = vrot.slane %v2259_v6, 4 }
 0x3f0   : > { %v2254_v3 = vpop.f32.mrf.mxu1 }
 0x3f1   : > { %v2255_v60 = vadd.f32 %v2254_v3, %v2227_v35  ;;  %v2261_v11 = vmax.f32 %v2259_v6, %v2260_v26 }
 0x3f3   : > { %v2266_v58 = vsel %vm2258_vm2, %v2255_v60, -inf  ;;  %v2262_v49 = vrot.slane %v2261_v11, 2  ;;  %v2243_v16 = vpop.f32.mrf.mxu0 }
 0x3f4   : > { %v2267_v23 = vrot.slane %v2266_v58, 4 }
 0x3f5   : > { %v2263_v54 = vmax.f32 %v2261_v11, %v2262_v49 }
 0x3f6   : > { %v2268_v47 = vmax.f32 %v2266_v58, %v2267_v23 }
 0x3f7   : > { %v2264_v2 = vrot.slane %v2263_v54, 1 }
 0x3f8   : > { %v2269_v12 = vrot.slane %v2268_v47, 2  ;;  %v2256_v15 = vpop.f32.mrf.mxu1 }
 0x3f9   : > { %v2265_v61 = vmax.f32 %v2263_v54, %v2264_v2 }
 0x3fa   : > { %v2270_v1 = vmax.f32 %v2268_v47, %v2269_v12 }
 0x3fc   : > { %v2271_v55 = vrot.slane %v2270_v1, 1 }
 0x3fe   : > { %v2272_v38 = vmax.f32 %v2270_v1, %v2271_v55 }
 0x400   : > { %v2275_v31 = vrot.slane %v2272_v38, 7 }
 0x402   : > { %v2276_v28 = vsel %vm4381_vm15, %v2265_v61, %v2275_v31 }
 0x403   : > { %2282 = vst.msk [vmem:[%s370_s18] sm:$0x3] %vm2280_vm12, %v2276_v28 }
 0x404 PF: > { %s21_s13 = sadd.s32 1, %s3024_s13  }
 0x405   : > { %p18_p4 = scmp.ge.s32.totalorder %s21_s13, 4  }
 0x407   :  { %20 = sbr.rel (!%p18_p4) target bundleno = 1 (0x1), region = 114 }

</bundles_post_ra>
